<compile_context>
chip_gen: v7x
topology: tpu7x:2x2x1
jax: 0.10.0
libtpu: 0.0.40
codegen_flags: <defaults>
</compile_context>

<pallas_src>
import math
import functools
import numpy as np

import jax
import jax.numpy as jnp
from jax import lax
from jax.experimental import pallas as pl
from jax.experimental.pallas import tpu as pltpu

# ----------------------------- configuration --------------------------------
HIDDEN = 32                      # opt.hiddenSize
GAT_HEAD = 2                     # opt.gat_head
ATT_HIDDEN = HIDDEN // GAT_HEAD  # per-head width
ORDER_LIST = (1, 2)              # opt.order_list
N_ORDERS = len(ORDER_LIST)
MEM_SIZE = 4                     # opt.memory_size
N_NODE = 257                     # vocab size (item id 0 = padding)
B = 2                            # batch
N = 8                            # graph nodes per session
L = 8                            # sequence length
NEG_SLOPE = 0.2                  # LeakyReLU slope
NEG_BIG = -1e12


def _stable_softmax_last(x):
    m = jnp.max(x, axis=-1, keepdims=True)
    e = jnp.exp(x - m)
    return e / jnp.sum(e, axis=-1, keepdims=True)


def _leaky(x):
    return jnp.where(x >= 0, x, NEG_SLOPE * x)


# =============================================================================
# Kernel 1: fused GAT (all orders x all heads, one pallas_call, no grid)
# =============================================================================
def _gat_fused_kernel(adj_in_ref, adj_out_ref, x_in_ref, x_out_ref,
                      w_hin_ref, w_hout_ref, attv_in_ref, attv_out_ref,
                      w_ein_ref, w_eout_ref, b_iah_ref, b_oah_ref,
                      out_ref, *, orders, heads, ah):
    A_in0 = adj_in_ref[...]          # (B, N, N)
    A_out0 = adj_out_ref[...]
    x_in = x_in_ref[...]             # (B, N, H)
    x_out = x_out_ref[...]

    # all heads / all orders projected with a single matmul per direction
    h_in_all = jnp.einsum('bnh,hk->bnk', x_in, w_hin_ref[...],
                          preferred_element_type=jnp.float32)   # (B, N, T*ah)
    h_out_all = jnp.einsum('bnh,hk->bnk', x_out, w_hout_ref[...],
                           preferred_element_type=jnp.float32)
    attv_in = attv_in_ref[...]       # (T, ah)
    attv_out = attv_out_ref[...]
    w_ein = w_ein_ref[...]           # (T, H, ah)
    w_eout = w_eout_ref[...]
    b_iah = b_iah_ref[...]           # (T, ah)
    b_oah = b_oah_ref[...]

    # adjacency power expansion + binarization: hoisted, computed ONCE and
    # shared by every head of the corresponding order.
    masks = {}
    acc_in, acc_out = A_in0, A_out0
    pw_in, pw_out = A_in0, A_out0
    for o in range(1, max(orders) + 1):
        if o > 1:
            pw_in = jnp.einsum('bij,bjk->bik', pw_in, A_in0,
                               preferred_element_type=jnp.float32)
            pw_out = jnp.einsum('bij,bjk->bik', pw_out, A_out0,
                                preferred_element_type=jnp.float32)
            acc_in = acc_in + pw_in
            acc_out = acc_out + pw_out
        if o in orders:
            masks[o] = (jnp.where(acc_in > 0, jnp.ones_like(acc_in), acc_in),
                        jnp.where(acc_out > 0, jnp.ones_like(acc_out), acc_out))

    def head_output(h, attv, a_mask, x_src, w_e, b_e):
        # score[b,i,j] = leaky( sum_d h[b,i,d] * attv[d] * h[b,j,d] )
        s = jnp.einsum('bia,bja->bij', h * attv[None, None, :], h,
                       preferred_element_type=jnp.float32)
        s = _leaky(s)
        p = _stable_softmax_last(jnp.where(a_mask > 0, s, NEG_BIG)) * a_mask
        agg = jnp.einsum('bij,bjh->bih', p, x_src,
                         preferred_element_type=jnp.float32)
        return (jnp.einsum('bih,ha->bia', agg, w_e,
                           preferred_element_type=jnp.float32)
                + b_e[None, None, :])

    for gi, order in enumerate(orders):
        am_in, am_out = masks[order]
        outs_in, outs_out = [], []
        for hd in range(heads):
            t = gi * heads + hd
            sl = slice(t * ah, (t + 1) * ah)
            outs_in.append(head_output(h_in_all[:, :, sl], attv_in[t], am_in,
                                       x_in, w_ein[t], b_iah[t]))
            outs_out.append(head_output(h_out_all[:, :, sl], attv_out[t], am_out,
                                        x_out, w_eout[t], b_oah[t]))
        cat_in = outs_in[0] if heads == 1 else jnp.concatenate(outs_in, axis=-1)
        cat_out = outs_out[0] if heads == 1 else jnp.concatenate(outs_out, axis=-1)
        # GAT epilogue (residual + LeakyReLU) and the in+out sum, fused here.
        out_ref[gi] = _leaky(cat_in + x_in) + _leaky(cat_out + x_out)


def pallas_gat_fused(A_in, A_out, x_in, x_out, gp):
    Bc, Nc = A_in.shape[0], A_in.shape[1]
    kernel = functools.partial(_gat_fused_kernel, orders=tuple(ORDER_LIST),
                               heads=GAT_HEAD, ah=ATT_HIDDEN)
    return pl.pallas_call(
        kernel,
        out_shape=jax.ShapeDtypeStruct((N_ORDERS, Bc, Nc, HIDDEN), jnp.float32),
    )(A_in, A_out, x_in, x_out,
      gp['w_hin'], gp['w_hout'], gp['attv_in'], gp['attv_out'],
      gp['w_ein'], gp['w_eout'], gp['b_iah'], gp['b_oah'])


# =============================================================================
# Kernel 2: fused scorer (both orders stacked) — QKV proj, both co-attentions,
# FFNs, alpha pooling, session transform and the item score matmul in one call.
# =============================================================================
def _scorer_fused_kernel(seq1_ref, seq2_ref, pos_ref, q11_ref, srl_ref,
                         mask_ref, item_ref,
                         qkv1_w_ref, k2v2_w_ref,
                         ffn1_w_ref, ffn1_b_ref, ffn2_w_ref, ffn2_b_ref,
                         memk_t_ref, memv_ref,
                         w3a_ref, w3b_ref, wta_ref, wtb_ref, bt_ref,
                         sess_ref, score_ref, *, scale):
    G_, Bc, Lc, H_ = seq1_ref.shape
    mask = mask_ref[...]                           # (B, L) float
    qm = mask[:, :, None]                          # (B, L, 1)
    pos = pos_ref[...]                             # (B, L, H)
    item = item_ref[...]                           # (V, H) bf16

    rows = lax.broadcasted_iota(jnp.int32, (Lc, Lc), 0)
    cols = lax.broadcasted_iota(jnp.int32, (Lc, Lc), 1)
    causal = cols <= rows
    kvalid = jnp.logical_and(causal[None, :, :], mask[:, None, :] > 0)  # (B,L,L)

    for g in range(G_):                            # static unroll, G_ == 2
        seq1 = seq1_ref[g] * qm                    # masked sequence emb (order g)
        seq2 = seq2_ref[g] * qm

        # --- fused Q/K/V projection (H -> 3H) + positional add --------------
        qkv = jnp.einsum('blh,hk->blk', seq1, qkv1_w_ref[g],
                         preferred_element_type=jnp.float32)
        Q1 = qkv[:, :, :H_] + pos
        K1 = qkv[:, :, H_:2 * H_] + pos
        V1 = qkv[:, :, 2 * H_:] + pos

        # --- causal self co-attention (mem_size = 0) -------------------------
        s1 = jnp.einsum('blh,bmh->blm', Q1, K1,
                        preferred_element_type=jnp.float32) * scale
        p1 = _stable_softmax_last(jnp.where(kvalid, s1, NEG_BIG))
        o1 = jnp.einsum('blm,bmh->blh', p1, V1,
                        preferred_element_type=jnp.float32) * qm
        e1 = (jnp.einsum('blh,hk->blk', o1, ffn1_w_ref[g],
                         preferred_element_type=jnp.float32)
              + ffn1_b_ref[g][None, None, :])

        # --- memory-augmented co-attention (mem slots always visible) -------
        # joint softmax over [memory | causal sequence], computed without
        # concatenating K/V along the sequence axis.
        kv2 = jnp.einsum('blh,hk->blk', seq2, k2v2_w_ref[g],
                         preferred_element_type=jnp.float32)
        K2 = kv2[:, :, :H_]
        V2 = kv2[:, :, H_:]
        s_mem = jnp.einsum('blh,hm->blm', Q1, memk_t_ref[g],
                           preferred_element_type=jnp.float32) * scale  # (B,L,M)
        s_seq = jnp.einsum('blh,bmh->blm', Q1, K2,
                           preferred_element_type=jnp.float32) * scale  # (B,L,L)
        s_seq = jnp.where(kvalid, s_seq, NEG_BIG)
        m2 = jnp.maximum(jnp.max(s_mem, axis=-1, keepdims=True),
                         jnp.max(s_seq, axis=-1, keepdims=True))
        e_mem = jnp.exp(s_mem - m2)
        e_seq = jnp.exp(s_seq - m2)
        denom = (jnp.sum(e_mem, axis=-1, keepdims=True)
                 + jnp.sum(e_seq, axis=-1, keepdims=True))
        o2 = (jnp.einsum('blm,mh->blh', e_mem, memv_ref[g],
                         preferred_element_type=jnp.float32)
              + jnp.einsum('blm,bmh->blh', e_seq, V2,
                           preferred_element_type=jnp.float32)) / denom
        o2 = o2 * qm
        e2 = (jnp.einsum('blh,hk->blk', o2, ffn2_w_ref[g],
                         preferred_element_type=jnp.float32)
              + ffn2_b_ref[g][None, None, :])

        # --- alpha attention pooling + session transform (VMEM epilogue) ----
        att = jnp.maximum(e1 + e2, 0.0)                       # relu
        alpha_logit = (jnp.sum(att * w3a_ref[g][None, None, :], axis=-1)
                       + jnp.sum(q11_ref[g] * w3b_ref[g][None, :],
                                 axis=-1, keepdims=True))     # (B, L)
        alpha_logit = jnp.where(mask > 0, alpha_logit, NEG_BIG)
        alpha = _stable_softmax_last(alpha_logit)
        sess_sum = jnp.sum(alpha[:, :, None] * seq1, axis=1)  # (B, H)
        sess = (jnp.dot(sess_sum, wta_ref[g], preferred_element_type=jnp.float32)
                + jnp.dot(srl_ref[g], wtb_ref[g], preferred_element_type=jnp.float32)
                + bt_ref[g][None, :])
        sess_ref[g] = sess

        # --- lane-dense score matmul: (B,H) x (V,H)^T, bf16 MXU, f32 acc ----
        score_ref[g] = jnp.einsum('bh,vh->bv', sess.astype(item.dtype), item,
                                  preferred_element_type=jnp.float32)


def pallas_scorer_fused(seq1, seq2, pos_add, q11, srl, maskf, item_bf16, sp):
    G_, Bc, Lc, H_ = seq1.shape
    Vn = item_bf16.shape[0]
    # split the tiny "concat" weights so no lane-concat is needed in-kernel
    w3 = sp['W_three_1'][:, :, 0]                 # (G, 2H)
    w3a, w3b = w3[:, :H_], w3[:, H_:]
    wt = sp['W_transform_1']                      # (G, 2H, H)
    wta, wtb = wt[:, :H_, :], wt[:, H_:, :]
    mem_k_t = jnp.swapaxes(sp['mem_k'], 1, 2)     # (G, H, MEM) tiny, free
    kernel = functools.partial(_scorer_fused_kernel, scale=1.0 / math.sqrt(H_))
    return pl.pallas_call(
        kernel,
        out_shape=(jax.ShapeDtypeStruct((G_, Bc, H_), jnp.float32),
                   jax.ShapeDtypeStruct((G_, Bc, Vn), jnp.float32)),
    )(seq1, seq2, pos_add, q11, srl, maskf, item_bf16,
      sp['QKV1_w'], sp['K2V2_w'],
      sp['FFN1_w'], sp['FFN1_b'], sp['FFN2_w'], sp['FFN2_b'],
      mem_k_t, sp['mem_v'],
      w3a, w3b, wta, wtb, sp['b_transform_1'])


# ----------------------------- plain-JAX glue --------------------------------
def _build_pos_table(n_position, d_hid):
    pos = np.arange(n_position)[:, None].astype(np.float64)
    j = np.arange(d_hid)[None, :]
    angle = pos / np.power(10000.0, 2.0 * (j // 2) / d_hid)
    table = angle.copy()
    table[:, 0::2] = np.sin(angle[:, 0::2])
    table[:, 1::2] = np.cos(angle[:, 1::2])
    return jnp.asarray(table, dtype=jnp.float32)


POS_TABLE = _build_pos_table(L, HIDDEN)   # (L, H)


def gru_forward_stacked(x, layers):
    """2-layer batch-first GRU (PyTorch gate order r,z,n), zero initial state,
    stacked over the ORDER_LIST axis.  Input projection hoisted out of scan."""
    G_ = layers[0]['w_ih'].shape[0]
    Bc, Lc, H_ = x.shape
    out = jnp.broadcast_to(x[None], (G_, Bc, Lc, H_))
    for lp in layers:
        w_ih, w_hh, b_ih, b_hh = lp['w_ih'], lp['w_hh'], lp['b_ih'], lp['b_hh']
        # all timesteps in one matmul (per the performance review)
        gx = (jnp.einsum('gblh,gkh->gblk', out, w_ih)
              + b_ih[:, None, None, :])                      # (G,B,L,3H)
        gx_t = jnp.moveaxis(gx, 2, 0)                        # (L,G,B,3H)
        h0 = jnp.zeros((G_, Bc, H_), jnp.float32)

        def step(h, gxt):
            gh = jnp.einsum('gbh,gkh->gbk', h, w_hh) + b_hh[:, None, :]
            r = jax.nn.sigmoid(gxt[..., :H_] + gh[..., :H_])
            z = jax.nn.sigmoid(gxt[..., H_:2 * H_] + gh[..., H_:2 * H_])
            n = jnp.tanh(gxt[..., 2 * H_:] + r * gh[..., 2 * H_:])
            h_new = (1.0 - z) * n + z * h
            return h_new, h_new

        _, ys = lax.scan(step, h0, gx_t)
        out = jnp.moveaxis(ys, 0, 2)                         # (G,B,L,H)
    return out


def session_graph_forward(params, items, A, A_I, alias_inputs, mask):
    del A_I  # not used by the reference forward either
    Bc, Lc = mask.shape
    Nc = A.shape[1]
    flag = (items > 0).astype(jnp.float32)[:, :, None]
    hidden_1 = params['emb1'][items] * flag                 # (B, N, H)
    hidden_2 = params['emb2'][items] * flag

    A_in = A[:, :, :Nc]
    A_out = A[:, :, Nc:]

    # --- GNN stage: ONE fused kernel for all orders x heads -----------------
    results = pallas_gat_fused(A_in, A_out, hidden_1, hidden_1, params['gat'])
    # results: (G, B, N, H)

    batch_idx = jnp.arange(Bc)[:, None]
    seq1 = results[:, batch_idx, alias_inputs]              # (G, B, L, H)
    seq_emb_2 = hidden_2[batch_idx, alias_inputs]           # (B, L, H)

    maskf = mask.astype(jnp.float32)
    lengths = jnp.sum(mask, axis=1).astype(jnp.int32)
    last_idx = lengths - 1

    sp = params['scorer']
    # GRU over the second embedding stream (both scorers stacked)
    seq2 = gru_forward_stacked(seq_emb_2, sp['gru'])        # (G, B, L, H)

    # positional add and the "last click" query (tiny, plain JAX)
    pos_idx = jnp.abs(jnp.arange(Lc, dtype=jnp.int32)[None, :] - last_idx[:, None])
    pos_add = POS_TABLE[pos_idx]                            # (B, L, H)
    sr_l_1 = seq1[:, jnp.arange(Bc), last_idx]              # (G, B, H)
    q1_1 = (jnp.einsum('gbh,ghk->gbk', sr_l_1, sp['W_one_1'])
            + sp['b_one_1'][:, None, :] + POS_TABLE[0][None, None, :])

    item_emb = params['emb1'][1:]                           # (V, H)
    item_bf16 = item_emb.astype(jnp.bfloat16)               # bf16 MXU operand

    # --- scorer stage: ONE fused kernel for both orders ----------------------
    sess_emb, score = pallas_scorer_fused(
        seq1, seq2, pos_add, q1_1, sr_l_1, maskf, item_bf16, sp)
    # sess_emb: (G, B, H), score: (G, B, V)

    # per-session item flags over the (n_node - 1) real items
    oh = jax.nn.one_hot(items - 1, N_NODE - 1, dtype=jnp.float32)
    oh = oh * flag
    item_flag = (jnp.sum(oh, axis=1) > 0).astype(jnp.float32)   # (B, V)

    # RENorm + tail beta fusion (tiny, plain JAX per the review)
    score_in = jax.nn.softmax(jnp.where(item_flag[None] > 0, score, -jnp.inf),
                              axis=-1)
    score_ex = jax.nn.softmax(jnp.where(item_flag[None] > 0, -jnp.inf, score),
                              axis=-1)
    tail = jax.nn.relu(jnp.einsum('gbh,ghk->gbk', sess_emb, sp['W_tail_1'])
                       + sp['b_tail_1'][:, None, :])
    beta = jax.nn.softmax(jnp.einsum('gbh,ghk->gbk', tail, sp['W_tail_2']),
                          axis=-1)                          # (G, B, 2)
    boundary = jnp.mean(jnp.abs(beta[..., 0] - beta[..., 1]), axis=-1)  # (G,)
    final_g = beta[..., 0:1] * score_in + beta[..., 1:2] * score_ex     # (G,B,V)

    g_w = jax.nn.softmax(params['alpha'])[:, None, None]
    final = jnp.sum(final_g * g_w, axis=0)                  # (B, V)
    return jnp.log(final), jnp.mean(boundary)


# ----------------------------- parameter init --------------------------------
def init_params(key):
    stdv = 1.0 / math.sqrt(HIDDEN)
    keys = iter(jax.random.split(key, 128))

    def uni(shape):
        return jax.random.uniform(next(keys), shape, jnp.float32, -stdv, stdv)

    def nrm(shape):
        return jax.random.normal(next(keys), shape, jnp.float32) * stdv

    def zeros(shape):
        return jnp.zeros(shape, jnp.float32)

    G_ = N_ORDERS
    T = G_ * GAT_HEAD
    ah = ATT_HIDDEN

    params = {'emb1': nrm((N_NODE, HIDDEN)), 'emb2': nrm((N_NODE, HIDDEN))}

    # GAT weights, pre-stacked across (orders x heads) for the fused kernel
    params['gat'] = dict(
        w_hin=uni((HIDDEN, T * ah)), w_hout=uni((HIDDEN, T * ah)),
        attv_in=uni((T, ah)), attv_out=uni((T, ah)),
        w_ein=uni((T, HIDDEN, ah)), w_eout=uni((T, HIDDEN, ah)),
        b_iah=zeros((T, ah)), b_oah=zeros((T, ah)))

    # Scorer weights, stacked over the ORDER_LIST axis.
    # (Q2 of the reference is initialized but never used in forward -> dropped.)
    gru = [dict(w_ih=uni((G_, 3 * HIDDEN, HIDDEN)),
                w_hh=uni((G_, 3 * HIDDEN, HIDDEN)),
                b_ih=zeros((G_, 3 * HIDDEN)), b_hh=zeros((G_, 3 * HIDDEN)))
           for _ in range(2)]
    params['scorer'] = dict(
        gru=gru,
        W_one_1=uni((G_, HIDDEN, HIDDEN)), b_one_1=zeros((G_, HIDDEN)),
        W_three_1=uni((G_, 2 * HIDDEN, 1)),
        W_transform_1=uni((G_, 2 * HIDDEN, HIDDEN)),
        b_transform_1=zeros((G_, HIDDEN)),
        W_tail_1=uni((G_, HIDDEN, HIDDEN)), b_tail_1=zeros((G_, HIDDEN)),
        W_tail_2=uni((G_, HIDDEN, 2)),
        QKV1_w=uni((G_, HIDDEN, 3 * HIDDEN)),      # fused Q1|K1|V1
        K2V2_w=uni((G_, HIDDEN, 2 * HIDDEN)),      # fused K2|V2
        FFN1_w=uni((G_, HIDDEN, HIDDEN)), FFN1_b=zeros((G_, HIDDEN)),
        FFN2_w=uni((G_, HIDDEN, HIDDEN)), FFN2_b=zeros((G_, HIDDEN)),
        mem_k=nrm((G_, MEM_SIZE, HIDDEN)), mem_v=nrm((G_, MEM_SIZE, HIDDEN)))

    params['alpha'] = jnp.zeros((N_ORDERS,), jnp.float32).at[0].set(1.0)
    return params


# --------------------------------- main --------------------------------------
if __name__ == "__main__":
    key = jax.random.PRNGKey(0)
    kp, ka = jax.random.split(key, 2)
    params = init_params(kp)

    # items: graph node ids (0 = padding)
    items = jnp.array([[5, 12, 7, 33, 2, 0, 0, 0],
                       [101, 9, 45, 0, 0, 0, 0, 0]], dtype=jnp.int32)
    # adjacency (B, N, 2N): [A_in | A_out], sparse non-negative
    A = jax.random.uniform(ka, (B, N, 2 * N), jnp.float32)
    A = jnp.where(A > 0.6, A, 0.0)
    A_I = jnp.broadcast_to(jnp.eye(N, dtype=jnp.float32)[None], (B, N, N))
    # alias_inputs: per-position index into the graph-node axis
    alias_inputs = jnp.array([[0, 1, 2, 1, 3, 4, 0, 0],
                              [0, 1, 2, 1, 0, 0, 0, 0]], dtype=jnp.int32)
    mask = jnp.array([[1, 1, 1, 1, 1, 1, 0, 0],
                      [1, 1, 1, 1, 0, 0, 0, 0]], dtype=jnp.int32)

    fwd = jax.jit(session_graph_forward)
    scores, boundary = fwd(params, items, A, A_I, alias_inputs, mask)
    jax.block_until_ready((scores, boundary))
    assert scores.shape == (B, N_NODE - 1)
    assert jnp.all(jnp.isfinite(scores)) and jnp.isfinite(boundary)
    print("KERNEL_OK")
</pallas_src>

<mosaic_0001>
module attributes {stable_mosaic.version = 11 : i64} {
  func.func @_gat_fused_kernel(%arg0: memref<2x8x8xf32, #tpu.memory_space<vmem>>, %arg1: memref<2x8x8xf32, #tpu.memory_space<vmem>>, %arg2: memref<2x8x32xf32, #tpu.memory_space<vmem>>, %arg3: memref<2x8x32xf32, #tpu.memory_space<vmem>>, %arg4: memref<32x64xf32, #tpu.memory_space<vmem>>, %arg5: memref<32x64xf32, #tpu.memory_space<vmem>>, %arg6: memref<4x16xf32, #tpu.memory_space<vmem>>, %arg7: memref<4x16xf32, #tpu.memory_space<vmem>>, %arg8: memref<4x32x16xf32, #tpu.memory_space<vmem>>, %arg9: memref<4x32x16xf32, #tpu.memory_space<vmem>>, %arg10: memref<4x16xf32, #tpu.memory_space<vmem>>, %arg11: memref<4x16xf32, #tpu.memory_space<vmem>>, %arg12: memref<2x2x8x32xf32, #tpu.memory_space<vmem>>) attributes {dimension_semantics = [], scalar_prefetch = 0 : i64, scratch_operands = 0 : i64, tpu.core_type = #tpu.core_type<tc>} {
    %c0 = arith.constant 0 : index
    %c0_0 = arith.constant 0 : index
    %c0_1 = arith.constant 0 : index
    %0 = vector.load %arg0[%c0, %c0_0, %c0_1] : memref<2x8x8xf32, #tpu.memory_space<vmem>>, vector<2x8x8xf32>
    %c0_2 = arith.constant 0 : index
    %c0_3 = arith.constant 0 : index
    %c0_4 = arith.constant 0 : index
    %1 = vector.load %arg1[%c0_2, %c0_3, %c0_4] : memref<2x8x8xf32, #tpu.memory_space<vmem>>, vector<2x8x8xf32>
    %c0_5 = arith.constant 0 : index
    %c0_6 = arith.constant 0 : index
    %c0_7 = arith.constant 0 : index
    %2 = vector.load %arg2[%c0_5, %c0_6, %c0_7] : memref<2x8x32xf32, #tpu.memory_space<vmem>>, vector<2x8x32xf32>
    %c0_8 = arith.constant 0 : index
    %c0_9 = arith.constant 0 : index
    %c0_10 = arith.constant 0 : index
    %3 = vector.load %arg3[%c0_8, %c0_9, %c0_10] : memref<2x8x32xf32, #tpu.memory_space<vmem>>, vector<2x8x32xf32>
    %c0_11 = arith.constant 0 : index
    %c0_12 = arith.constant 0 : index
    %4 = vector.load %arg4[%c0_11, %c0_12] : memref<32x64xf32, #tpu.memory_space<vmem>>, vector<32x64xf32>
    "tpu.trace_start"() <{level = 10 : i32, message = "bnh,hk->bnk"}> : () -> ()
    %cst = arith.constant dense<0.000000e+00> : vector<2x8x64xf32>
    %5 = tpu.matmul %2, %4, %cst {dimension_numbers = #tpu.dot_dimension_numbers<[2], [0], [0, 1], [1], [0, 0, 0, 1, 1, 1], [], []>} : vector<2x8x32xf32>, vector<32x64xf32>, vector<2x8x64xf32> -> vector<2x8x64xf32>
    "tpu.trace_stop"() : () -> ()
    %c0_13 = arith.constant 0 : index
    %c0_14 = arith.constant 0 : index
    %6 = vector.load %arg5[%c0_13, %c0_14] : memref<32x64xf32, #tpu.memory_space<vmem>>, vector<32x64xf32>
    "tpu.trace_start"() <{level = 10 : i32, message = "bnh,hk->bnk"}> : () -> ()
    %cst_15 = arith.constant dense<0.000000e+00> : vector<2x8x64xf32>
    %7 = tpu.matmul %3, %6, %cst_15 {dimension_numbers = #tpu.dot_dimension_numbers<[2], [0], [0, 1], [1], [0, 0, 0, 1, 1, 1], [], []>} : vector<2x8x32xf32>, vector<32x64xf32>, vector<2x8x64xf32> -> vector<2x8x64xf32>
    "tpu.trace_stop"() : () -> ()
    %c0_16 = arith.constant 0 : index
    %c0_17 = arith.constant 0 : index
    %8 = vector.load %arg6[%c0_16, %c0_17] : memref<4x16xf32, #tpu.memory_space<vmem>>, vector<4x16xf32>
    %c0_18 = arith.constant 0 : index
    %c0_19 = arith.constant 0 : index
    %9 = vector.load %arg7[%c0_18, %c0_19] : memref<4x16xf32, #tpu.memory_space<vmem>>, vector<4x16xf32>
    %c0_20 = arith.constant 0 : index
    %c0_21 = arith.constant 0 : index
    %c0_22 = arith.constant 0 : index
    %10 = vector.load %arg8[%c0_20, %c0_21, %c0_22] : memref<4x32x16xf32, #tpu.memory_space<vmem>>, vector<4x32x16xf32>
    %c0_23 = arith.constant 0 : index
    %c0_24 = arith.constant 0 : index
    %c0_25 = arith.constant 0 : index
    %11 = vector.load %arg9[%c0_23, %c0_24, %c0_25] : memref<4x32x16xf32, #tpu.memory_space<vmem>>, vector<4x32x16xf32>
    %c0_26 = arith.constant 0 : index
    %c0_27 = arith.constant 0 : index
    %12 = vector.load %arg10[%c0_26, %c0_27] : memref<4x16xf32, #tpu.memory_space<vmem>>, vector<4x16xf32>
    %c0_28 = arith.constant 0 : index
    %c0_29 = arith.constant 0 : index
    %13 = vector.load %arg11[%c0_28, %c0_29] : memref<4x16xf32, #tpu.memory_space<vmem>>, vector<4x16xf32>
    %cst_30 = arith.constant 0.000000e+00 : f32
    %14 = vector.broadcast %cst_30 : f32 to vector<2x8x8xf32>
    %15 = arith.cmpf ogt, %0, %14 : vector<2x8x8xf32>
    %cst_31 = arith.constant 1.000000e+00 : f32
    %16 = vector.broadcast %cst_31 : f32 to vector<2x8x8xf32>
    %17 = arith.select %15, %16, %0 : vector<2x8x8xi1>, vector<2x8x8xf32>
    %cst_32 = arith.constant 0.000000e+00 : f32
    %18 = vector.broadcast %cst_32 : f32 to vector<2x8x8xf32>
    %19 = arith.cmpf ogt, %1, %18 : vector<2x8x8xf32>
    %cst_33 = arith.constant 1.000000e+00 : f32
    %20 = vector.broadcast %cst_33 : f32 to vector<2x8x8xf32>
    %21 = arith.select %19, %20, %1 : vector<2x8x8xi1>, vector<2x8x8xf32>
    "tpu.trace_start"() <{level = 10 : i32, message = "bij,bjk->bik"}> : () -> ()
    %cst_34 = arith.constant dense<0.000000e+00> : vector<2x8x8xf32>
    %22 = tpu.matmul %0, %0, %cst_34 {dimension_numbers = #tpu.dot_dimension_numbers<[2], [1], [1], [2], [0, 0, 0, 1, 1, 2], [0], [0]>} : vector<2x8x8xf32>, vector<2x8x8xf32>, vector<2x8x8xf32> -> vector<2x8x8xf32>
    %cst_35 = arith.constant dense<0.000000e+00> : vector<2x8x8xf32>
    %23 = tpu.matmul %1, %1, %cst_35 {dimension_numbers = #tpu.dot_dimension_numbers<[2], [1], [1], [2], [0, 0, 0, 1, 1, 2], [0], [0]>} : vector<2x8x8xf32>, vector<2x8x8xf32>, vector<2x8x8xf32> -> vector<2x8x8xf32>
    "tpu.trace_stop"() : () -> ()
    %24 = arith.addf %0, %22 : vector<2x8x8xf32>
    %25 = arith.addf %1, %23 : vector<2x8x8xf32>
    %cst_36 = arith.constant 0.000000e+00 : f32
    %26 = vector.broadcast %cst_36 : f32 to vector<2x8x8xf32>
    %27 = arith.cmpf ogt, %24, %26 : vector<2x8x8xf32>
    %cst_37 = arith.constant 1.000000e+00 : f32
    %28 = vector.broadcast %cst_37 : f32 to vector<2x8x8xf32>
    %29 = arith.select %27, %28, %24 : vector<2x8x8xi1>, vector<2x8x8xf32>
    %cst_38 = arith.constant 0.000000e+00 : f32
    %30 = vector.broadcast %cst_38 : f32 to vector<2x8x8xf32>
    %31 = arith.cmpf ogt, %25, %30 : vector<2x8x8xf32>
    %cst_39 = arith.constant 1.000000e+00 : f32
    %32 = vector.broadcast %cst_39 : f32 to vector<2x8x8xf32>
    %33 = arith.select %31, %32, %25 : vector<2x8x8xi1>, vector<2x8x8xf32>
    %34 = vector.extract_strided_slice %5 {offsets = [0, 0, 0], sizes = [2, 8, 16], strides = [1, 1, 1]} : vector<2x8x64xf32> to vector<2x8x16xf32>
    %35 = vector.extract_strided_slice %8 {offsets = [0, 0], sizes = [1, 16], strides = [1, 1]} : vector<4x16xf32> to vector<1x16xf32>
    %36 = vector.shape_cast %35 : vector<1x16xf32> to vector<16xf32>
    %37 = vector.extract_strided_slice %10 {offsets = [0, 0, 0], sizes = [1, 32, 16], strides = [1, 1, 1]} : vector<4x32x16xf32> to vector<1x32x16xf32>
    %38 = vector.shape_cast %37 : vector<1x32x16xf32> to vector<32x16xf32>
    %39 = vector.extract_strided_slice %12 {offsets = [0, 0], sizes = [1, 16], strides = [1, 1]} : vector<4x16xf32> to vector<1x16xf32>
    %40 = vector.shape_cast %39 : vector<1x16xf32> to vector<16xf32>
    %41 = vector.shape_cast %36 : vector<16xf32> to vector<1x1x16xf32>
    %42 = vector.broadcast %41 : vector<1x1x16xf32> to vector<2x8x16xf32>
    %43 = arith.mulf %34, %42 : vector<2x8x16xf32>
    "tpu.trace_start"() <{level = 10 : i32, message = "bia,bja->bij"}> : () -> ()
    %cst_40 = arith.constant dense<0.000000e+00> : vector<2x8x8xf32>
    %44 = tpu.matmul %43, %34, %cst_40 {dimension_numbers = #tpu.dot_dimension_numbers<[2], [2], [1], [1], [0, 0, 0, 1, 1, 1], [0], [0]>} : vector<2x8x16xf32>, vector<2x8x16xf32>, vector<2x8x8xf32> -> vector<2x8x8xf32>
    %cst_41 = arith.constant 0.000000e+00 : f32
    "tpu.trace_stop"() : () -> ()
    %45 = vector.broadcast %cst_41 : f32 to vector<2x8x8xf32>
    %46 = arith.cmpf oge, %44, %45 : vector<2x8x8xf32>
    %cst_42 = arith.constant 2.000000e-01 : f32
    %47 = vector.broadcast %cst_42 : f32 to vector<2x8x8xf32>
    %48 = arith.mulf %47, %44 : vector<2x8x8xf32>
    %49 = arith.select %46, %44, %48 : vector<2x8x8xi1>, vector<2x8x8xf32>
    %cst_43 = arith.constant 0.000000e+00 : f32
    %50 = vector.broadcast %cst_43 : f32 to vector<2x8x8xf32>
    %51 = arith.cmpf ogt, %17, %50 : vector<2x8x8xf32>
    %cst_44 = arith.constant -9.99999995E+11 : f32
    %52 = vector.broadcast %cst_44 : f32 to vector<2x8x8xf32>
    %53 = arith.select %51, %49, %52 : vector<2x8x8xi1>, vector<2x8x8xf32>
    %cst_45 = arith.constant dense<0xFF800000> : vector<2x8xf32>
    %54 = vector.multi_reduction <maximumf>, %53, %cst_45 [2] : vector<2x8x8xf32> to vector<2x8xf32>
    %55 = vector.shape_cast %54 : vector<2x8xf32> to vector<2x8x1xf32>
    %56 = vector.broadcast %55 : vector<2x8x1xf32> to vector<2x8x8xf32>
    %57 = arith.subf %53, %56 : vector<2x8x8xf32>
    %58 = math.exp %57 : vector<2x8x8xf32>
    %cst_46 = arith.constant dense<0.000000e+00> : vector<2x8xf32>
    %59 = vector.multi_reduction <add>, %58, %cst_46 [2] : vector<2x8x8xf32> to vector<2x8xf32>
    %60 = vector.shape_cast %59 : vector<2x8xf32> to vector<2x8x1xf32>
    %61 = vector.broadcast %60 : vector<2x8x1xf32> to vector<2x8x8xf32>
    %62 = arith.divf %58, %61 : vector<2x8x8xf32>
    %63 = arith.mulf %62, %17 : vector<2x8x8xf32>
    "tpu.trace_start"() <{level = 10 : i32, message = "bij,bjh->bih"}> : () -> ()
    %cst_47 = arith.constant dense<0.000000e+00> : vector<2x8x32xf32>
    %64 = tpu.matmul %63, %2, %cst_47 {dimension_numbers = #tpu.dot_dimension_numbers<[2], [1], [1], [2], [0, 0, 0, 1, 1, 2], [0], [0]>} : vector<2x8x8xf32>, vector<2x8x32xf32>, vector<2x8x32xf32> -> vector<2x8x32xf32>
    "tpu.trace_stop"() : () -> ()
    "tpu.trace_start"() <{level = 10 : i32, message = "bih,ha->bia"}> : () -> ()
    %cst_48 = arith.constant dense<0.000000e+00> : vector<2x8x16xf32>
    %65 = tpu.matmul %64, %38, %cst_48 {dimension_numbers = #tpu.dot_dimension_numbers<[2], [0], [0, 1], [1], [0, 0, 0, 1, 1, 1], [], []>} : vector<2x8x32xf32>, vector<32x16xf32>, vector<2x8x16xf32> -> vector<2x8x16xf32>
    "tpu.trace_stop"() : () -> ()
    %66 = vector.shape_cast %40 : vector<16xf32> to vector<1x1x16xf32>
    %67 = vector.broadcast %66 : vector<1x1x16xf32> to vector<2x8x16xf32>
    %68 = arith.addf %65, %67 : vector<2x8x16xf32>
    %69 = vector.extract_strided_slice %7 {offsets = [0, 0, 0], sizes = [2, 8, 16], strides = [1, 1, 1]} : vector<2x8x64xf32> to vector<2x8x16xf32>
    %70 = vector.extract_strided_slice %9 {offsets = [0, 0], sizes = [1, 16], strides = [1, 1]} : vector<4x16xf32> to vector<1x16xf32>
    %71 = vector.shape_cast %70 : vector<1x16xf32> to vector<16xf32>
    %72 = vector.extract_strided_slice %11 {offsets = [0, 0, 0], sizes = [1, 32, 16], strides = [1, 1, 1]} : vector<4x32x16xf32> to vector<1x32x16xf32>
    %73 = vector.shape_cast %72 : vector<1x32x16xf32> to vector<32x16xf32>
    %74 = vector.extract_strided_slice %13 {offsets = [0, 0], sizes = [1, 16], strides = [1, 1]} : vector<4x16xf32> to vector<1x16xf32>
    %75 = vector.shape_cast %74 : vector<1x16xf32> to vector<16xf32>
    %76 = vector.shape_cast %71 : vector<16xf32> to vector<1x1x16xf32>
    %77 = vector.broadcast %76 : vector<1x1x16xf32> to vector<2x8x16xf32>
    %78 = arith.mulf %69, %77 : vector<2x8x16xf32>
    "tpu.trace_start"() <{level = 10 : i32, message = "bia,bja->bij"}> : () -> ()
    %cst_49 = arith.constant dense<0.000000e+00> : vector<2x8x8xf32>
    %79 = tpu.matmul %78, %69, %cst_49 {dimension_numbers = #tpu.dot_dimension_numbers<[2], [2], [1], [1], [0, 0, 0, 1, 1, 1], [0], [0]>} : vector<2x8x16xf32>, vector<2x8x16xf32>, vector<2x8x8xf32> -> vector<2x8x8xf32>
    %cst_50 = arith.constant 0.000000e+00 : f32
    "tpu.trace_stop"() : () -> ()
    %80 = vector.broadcast %cst_50 : f32 to vector<2x8x8xf32>
    %81 = arith.cmpf oge, %79, %80 : vector<2x8x8xf32>
    %cst_51 = arith.constant 2.000000e-01 : f32
    %82 = vector.broadcast %cst_51 : f32 to vector<2x8x8xf32>
    %83 = arith.mulf %82, %79 : vector<2x8x8xf32>
    %84 = arith.select %81, %79, %83 : vector<2x8x8xi1>, vector<2x8x8xf32>
    %cst_52 = arith.constant 0.000000e+00 : f32
    %85 = vector.broadcast %cst_52 : f32 to vector<2x8x8xf32>
    %86 = arith.cmpf ogt, %21, %85 : vector<2x8x8xf32>
    %cst_53 = arith.constant -9.99999995E+11 : f32
    %87 = vector.broadcast %cst_53 : f32 to vector<2x8x8xf32>
    %88 = arith.select %86, %84, %87 : vector<2x8x8xi1>, vector<2x8x8xf32>
    %cst_54 = arith.constant dense<0xFF800000> : vector<2x8xf32>
    %89 = vector.multi_reduction <maximumf>, %88, %cst_54 [2] : vector<2x8x8xf32> to vector<2x8xf32>
    %90 = vector.shape_cast %89 : vector<2x8xf32> to vector<2x8x1xf32>
    %91 = vector.broadcast %90 : vector<2x8x1xf32> to vector<2x8x8xf32>
    %92 = arith.subf %88, %91 : vector<2x8x8xf32>
    %93 = math.exp %92 : vector<2x8x8xf32>
    %cst_55 = arith.constant dense<0.000000e+00> : vector<2x8xf32>
    %94 = vector.multi_reduction <add>, %93, %cst_55 [2] : vector<2x8x8xf32> to vector<2x8xf32>
    %95 = vector.shape_cast %94 : vector<2x8xf32> to vector<2x8x1xf32>
    %96 = vector.broadcast %95 : vector<2x8x1xf32> to vector<2x8x8xf32>
    %97 = arith.divf %93, %96 : vector<2x8x8xf32>
    %98 = arith.mulf %97, %21 : vector<2x8x8xf32>
    "tpu.trace_start"() <{level = 10 : i32, message = "bij,bjh->bih"}> : () -> ()
    %cst_56 = arith.constant dense<0.000000e+00> : vector<2x8x32xf32>
    %99 = tpu.matmul %98, %3, %cst_56 {dimension_numbers = #tpu.dot_dimension_numbers<[2], [1], [1], [2], [0, 0, 0, 1, 1, 2], [0], [0]>} : vector<2x8x8xf32>, vector<2x8x32xf32>, vector<2x8x32xf32> -> vector<2x8x32xf32>
    "tpu.trace_stop"() : () -> ()
    "tpu.trace_start"() <{level = 10 : i32, message = "bih,ha->bia"}> : () -> ()
    %cst_57 = arith.constant dense<0.000000e+00> : vector<2x8x16xf32>
    %100 = tpu.matmul %99, %73, %cst_57 {dimension_numbers = #tpu.dot_dimension_numbers<[2], [0], [0, 1], [1], [0, 0, 0, 1, 1, 1], [], []>} : vector<2x8x32xf32>, vector<32x16xf32>, vector<2x8x16xf32> -> vector<2x8x16xf32>
    "tpu.trace_stop"() : () -> ()
    %101 = vector.shape_cast %75 : vector<16xf32> to vector<1x1x16xf32>
    %102 = vector.broadcast %101 : vector<1x1x16xf32> to vector<2x8x16xf32>
    %103 = arith.addf %100, %102 : vector<2x8x16xf32>
    %104 = vector.extract_strided_slice %5 {offsets = [0, 0, 16], sizes = [2, 8, 16], strides = [1, 1, 1]} : vector<2x8x64xf32> to vector<2x8x16xf32>
    %105 = vector.extract_strided_slice %8 {offsets = [1, 0], sizes = [1, 16], strides = [1, 1]} : vector<4x16xf32> to vector<1x16xf32>
    %106 = vector.shape_cast %105 : vector<1x16xf32> to vector<16xf32>
    %107 = vector.extract_strided_slice %10 {offsets = [1, 0, 0], sizes = [1, 32, 16], strides = [1, 1, 1]} : vector<4x32x16xf32> to vector<1x32x16xf32>
    %108 = vector.shape_cast %107 : vector<1x32x16xf32> to vector<32x16xf32>
    %109 = vector.extract_strided_slice %12 {offsets = [1, 0], sizes = [1, 16], strides = [1, 1]} : vector<4x16xf32> to vector<1x16xf32>
    %110 = vector.shape_cast %109 : vector<1x16xf32> to vector<16xf32>
    %111 = vector.shape_cast %106 : vector<16xf32> to vector<1x1x16xf32>
    %112 = vector.broadcast %111 : vector<1x1x16xf32> to vector<2x8x16xf32>
    %113 = arith.mulf %104, %112 : vector<2x8x16xf32>
    "tpu.trace_start"() <{level = 10 : i32, message = "bia,bja->bij"}> : () -> ()
    %cst_58 = arith.constant dense<0.000000e+00> : vector<2x8x8xf32>
    %114 = tpu.matmul %113, %104, %cst_58 {dimension_numbers = #tpu.dot_dimension_numbers<[2], [2], [1], [1], [0, 0, 0, 1, 1, 1], [0], [0]>} : vector<2x8x16xf32>, vector<2x8x16xf32>, vector<2x8x8xf32> -> vector<2x8x8xf32>
    %cst_59 = arith.constant 0.000000e+00 : f32
    "tpu.trace_stop"() : () -> ()
    %115 = vector.broadcast %cst_59 : f32 to vector<2x8x8xf32>
    %116 = arith.cmpf oge, %114, %115 : vector<2x8x8xf32>
    %cst_60 = arith.constant 2.000000e-01 : f32
    %117 = vector.broadcast %cst_60 : f32 to vector<2x8x8xf32>
    %118 = arith.mulf %117, %114 : vector<2x8x8xf32>
    %119 = arith.select %116, %114, %118 : vector<2x8x8xi1>, vector<2x8x8xf32>
    %cst_61 = arith.constant 0.000000e+00 : f32
    %120 = vector.broadcast %cst_61 : f32 to vector<2x8x8xf32>
    %121 = arith.cmpf ogt, %17, %120 : vector<2x8x8xf32>
    %cst_62 = arith.constant -9.99999995E+11 : f32
    %122 = vector.broadcast %cst_62 : f32 to vector<2x8x8xf32>
    %123 = arith.select %121, %119, %122 : vector<2x8x8xi1>, vector<2x8x8xf32>
    %cst_63 = arith.constant dense<0xFF800000> : vector<2x8xf32>
    %124 = vector.multi_reduction <maximumf>, %123, %cst_63 [2] : vector<2x8x8xf32> to vector<2x8xf32>
    %125 = vector.shape_cast %124 : vector<2x8xf32> to vector<2x8x1xf32>
    %126 = vector.broadcast %125 : vector<2x8x1xf32> to vector<2x8x8xf32>
    %127 = arith.subf %123, %126 : vector<2x8x8xf32>
    %128 = math.exp %127 : vector<2x8x8xf32>
    %cst_64 = arith.constant dense<0.000000e+00> : vector<2x8xf32>
    %129 = vector.multi_reduction <add>, %128, %cst_64 [2] : vector<2x8x8xf32> to vector<2x8xf32>
    %130 = vector.shape_cast %129 : vector<2x8xf32> to vector<2x8x1xf32>
    %131 = vector.broadcast %130 : vector<2x8x1xf32> to vector<2x8x8xf32>
    %132 = arith.divf %128, %131 : vector<2x8x8xf32>
    %133 = arith.mulf %132, %17 : vector<2x8x8xf32>
    "tpu.trace_start"() <{level = 10 : i32, message = "bij,bjh->bih"}> : () -> ()
    %cst_65 = arith.constant dense<0.000000e+00> : vector<2x8x32xf32>
    %134 = tpu.matmul %133, %2, %cst_65 {dimension_numbers = #tpu.dot_dimension_numbers<[2], [1], [1], [2], [0, 0, 0, 1, 1, 2], [0], [0]>} : vector<2x8x8xf32>, vector<2x8x32xf32>, vector<2x8x32xf32> -> vector<2x8x32xf32>
    "tpu.trace_stop"() : () -> ()
    "tpu.trace_start"() <{level = 10 : i32, message = "bih,ha->bia"}> : () -> ()
    %cst_66 = arith.constant dense<0.000000e+00> : vector<2x8x16xf32>
    %135 = tpu.matmul %134, %108, %cst_66 {dimension_numbers = #tpu.dot_dimension_numbers<[2], [0], [0, 1], [1], [0, 0, 0, 1, 1, 1], [], []>} : vector<2x8x32xf32>, vector<32x16xf32>, vector<2x8x16xf32> -> vector<2x8x16xf32>
    "tpu.trace_stop"() : () -> ()
    %136 = vector.shape_cast %110 : vector<16xf32> to vector<1x1x16xf32>
    %137 = vector.broadcast %136 : vector<1x1x16xf32> to vector<2x8x16xf32>
    %138 = arith.addf %135, %137 : vector<2x8x16xf32>
    %139 = vector.extract_strided_slice %7 {offsets = [0, 0, 16], sizes = [2, 8, 16], strides = [1, 1, 1]} : vector<2x8x64xf32> to vector<2x8x16xf32>
    %140 = vector.extract_strided_slice %9 {offsets = [1, 0], sizes = [1, 16], strides = [1, 1]} : vector<4x16xf32> to vector<1x16xf32>
    %141 = vector.shape_cast %140 : vector<1x16xf32> to vector<16xf32>
    %142 = vector.extract_strided_slice %11 {offsets = [1, 0, 0], sizes = [1, 32, 16], strides = [1, 1, 1]} : vector<4x32x16xf32> to vector<1x32x16xf32>
    %143 = vector.shape_cast %142 : vector<1x32x16xf32> to vector<32x16xf32>
    %144 = vector.extract_strided_slice %13 {offsets = [1, 0], sizes = [1, 16], strides = [1, 1]} : vector<4x16xf32> to vector<1x16xf32>
    %145 = vector.shape_cast %144 : vector<1x16xf32> to vector<16xf32>
    %146 = vector.shape_cast %141 : vector<16xf32> to vector<1x1x16xf32>
    %147 = vector.broadcast %146 : vector<1x1x16xf32> to vector<2x8x16xf32>
    %148 = arith.mulf %139, %147 : vector<2x8x16xf32>
    "tpu.trace_start"() <{level = 10 : i32, message = "bia,bja->bij"}> : () -> ()
    %cst_67 = arith.constant dense<0.000000e+00> : vector<2x8x8xf32>
    %149 = tpu.matmul %148, %139, %cst_67 {dimension_numbers = #tpu.dot_dimension_numbers<[2], [2], [1], [1], [0, 0, 0, 1, 1, 1], [0], [0]>} : vector<2x8x16xf32>, vector<2x8x16xf32>, vector<2x8x8xf32> -> vector<2x8x8xf32>
    %cst_68 = arith.constant 0.000000e+00 : f32
    "tpu.trace_stop"() : () -> ()
    %150 = vector.broadcast %cst_68 : f32 to vector<2x8x8xf32>
    %151 = arith.cmpf oge, %149, %150 : vector<2x8x8xf32>
    %cst_69 = arith.constant 2.000000e-01 : f32
    %152 = vector.broadcast %cst_69 : f32 to vector<2x8x8xf32>
    %153 = arith.mulf %152, %149 : vector<2x8x8xf32>
    %154 = arith.select %151, %149, %153 : vector<2x8x8xi1>, vector<2x8x8xf32>
    %cst_70 = arith.constant 0.000000e+00 : f32
    %155 = vector.broadcast %cst_70 : f32 to vector<2x8x8xf32>
    %156 = arith.cmpf ogt, %21, %155 : vector<2x8x8xf32>
    %cst_71 = arith.constant -9.99999995E+11 : f32
    %157 = vector.broadcast %cst_71 : f32 to vector<2x8x8xf32>
    %158 = arith.select %156, %154, %157 : vector<2x8x8xi1>, vector<2x8x8xf32>
    %cst_72 = arith.constant dense<0xFF800000> : vector<2x8xf32>
    %159 = vector.multi_reduction <maximumf>, %158, %cst_72 [2] : vector<2x8x8xf32> to vector<2x8xf32>
    %160 = vector.shape_cast %159 : vector<2x8xf32> to vector<2x8x1xf32>
    %161 = vector.broadcast %160 : vector<2x8x1xf32> to vector<2x8x8xf32>
    %162 = arith.subf %158, %161 : vector<2x8x8xf32>
    %163 = math.exp %162 : vector<2x8x8xf32>
    %cst_73 = arith.constant dense<0.000000e+00> : vector<2x8xf32>
    %164 = vector.multi_reduction <add>, %163, %cst_73 [2] : vector<2x8x8xf32> to vector<2x8xf32>
    %165 = vector.shape_cast %164 : vector<2x8xf32> to vector<2x8x1xf32>
    %166 = vector.broadcast %165 : vector<2x8x1xf32> to vector<2x8x8xf32>
    %167 = arith.divf %163, %166 : vector<2x8x8xf32>
    %168 = arith.mulf %167, %21 : vector<2x8x8xf32>
    "tpu.trace_start"() <{level = 10 : i32, message = "bij,bjh->bih"}> : () -> ()
    %cst_74 = arith.constant dense<0.000000e+00> : vector<2x8x32xf32>
    %169 = tpu.matmul %168, %3, %cst_74 {dimension_numbers = #tpu.dot_dimension_numbers<[2], [1], [1], [2], [0, 0, 0, 1, 1, 2], [0], [0]>} : vector<2x8x8xf32>, vector<2x8x32xf32>, vector<2x8x32xf32> -> vector<2x8x32xf32>
    "tpu.trace_stop"() : () -> ()
    "tpu.trace_start"() <{level = 10 : i32, message = "bih,ha->bia"}> : () -> ()
    %cst_75 = arith.constant dense<0.000000e+00> : vector<2x8x16xf32>
    %170 = tpu.matmul %169, %143, %cst_75 {dimension_numbers = #tpu.dot_dimension_numbers<[2], [0], [0, 1], [1], [0, 0, 0, 1, 1, 1], [], []>} : vector<2x8x32xf32>, vector<32x16xf32>, vector<2x8x16xf32> -> vector<2x8x16xf32>
    "tpu.trace_stop"() : () -> ()
    %171 = vector.shape_cast %145 : vector<16xf32> to vector<1x1x16xf32>
    %172 = vector.broadcast %171 : vector<1x1x16xf32> to vector<2x8x16xf32>
    %173 = arith.addf %170, %172 : vector<2x8x16xf32>
    %174 = tpu.concatenate %68, %138 in 2 : vector<2x8x16xf32>, vector<2x8x16xf32> -> vector<2x8x32xf32>
    %175 = tpu.concatenate %103, %173 in 2 : vector<2x8x16xf32>, vector<2x8x16xf32> -> vector<2x8x32xf32>
    %176 = arith.addf %174, %2 : vector<2x8x32xf32>
    %cst_76 = arith.constant 0.000000e+00 : f32
    %177 = vector.broadcast %cst_76 : f32 to vector<2x8x32xf32>
    %178 = arith.cmpf oge, %176, %177 : vector<2x8x32xf32>
    %cst_77 = arith.constant 2.000000e-01 : f32
    %179 = vector.broadcast %cst_77 : f32 to vector<2x8x32xf32>
    %180 = arith.mulf %179, %176 : vector<2x8x32xf32>
    %181 = arith.select %178, %176, %180 : vector<2x8x32xi1>, vector<2x8x32xf32>
    %182 = arith.addf %175, %3 : vector<2x8x32xf32>
    %cst_78 = arith.constant 0.000000e+00 : f32
    %183 = vector.broadcast %cst_78 : f32 to vector<2x8x32xf32>
    %184 = arith.cmpf oge, %182, %183 : vector<2x8x32xf32>
    %cst_79 = arith.constant 2.000000e-01 : f32
    %185 = vector.broadcast %cst_79 : f32 to vector<2x8x32xf32>
    %186 = arith.mulf %185, %182 : vector<2x8x32xf32>
    %187 = arith.select %184, %182, %186 : vector<2x8x32xi1>, vector<2x8x32xf32>
    %188 = arith.addf %181, %187 : vector<2x8x32xf32>
    %c0_80 = arith.constant 0 : index
    %c0_81 = arith.constant 0 : index
    %c0_82 = arith.constant 0 : index
    %c0_83 = arith.constant 0 : index
    %189 = vector.load %arg12[%c0_80, %c0_81, %c0_82, %c0_83] : memref<2x2x8x32xf32, #tpu.memory_space<vmem>>, vector<1x2x8x32xf32>
    %190 = vector.shape_cast %189 : vector<1x2x8x32xf32> to vector<2x8x32xf32>
    %191 = vector.shape_cast %188 : vector<2x8x32xf32> to vector<1x2x8x32xf32>
    tpu.vector_store %arg12[%c0_80, %c0_81, %c0_82, %c0_83], %191 {strides = array<i32>} : memref<2x2x8x32xf32, #tpu.memory_space<vmem>>, vector<1x2x8x32xf32>,
    %192 = vector.extract_strided_slice %5 {offsets = [0, 0, 32], sizes = [2, 8, 16], strides = [1, 1, 1]} : vector<2x8x64xf32> to vector<2x8x16xf32>
    %193 = vector.extract_strided_slice %8 {offsets = [2, 0], sizes = [1, 16], strides = [1, 1]} : vector<4x16xf32> to vector<1x16xf32>
    %194 = vector.shape_cast %193 : vector<1x16xf32> to vector<16xf32>
    %195 = vector.extract_strided_slice %10 {offsets = [2, 0, 0], sizes = [1, 32, 16], strides = [1, 1, 1]} : vector<4x32x16xf32> to vector<1x32x16xf32>
    %196 = vector.shape_cast %195 : vector<1x32x16xf32> to vector<32x16xf32>
    %197 = vector.extract_strided_slice %12 {offsets = [2, 0], sizes = [1, 16], strides = [1, 1]} : vector<4x16xf32> to vector<1x16xf32>
    %198 = vector.shape_cast %197 : vector<1x16xf32> to vector<16xf32>
    %199 = vector.shape_cast %194 : vector<16xf32> to vector<1x1x16xf32>
    %200 = vector.broadcast %199 : vector<1x1x16xf32> to vector<2x8x16xf32>
    %201 = arith.mulf %192, %200 : vector<2x8x16xf32>
    "tpu.trace_start"() <{level = 10 : i32, message = "bia,bja->bij"}> : () -> ()
    %cst_84 = arith.constant dense<0.000000e+00> : vector<2x8x8xf32>
    %202 = tpu.matmul %201, %192, %cst_84 {dimension_numbers = #tpu.dot_dimension_numbers<[2], [2], [1], [1], [0, 0, 0, 1, 1, 1], [0], [0]>} : vector<2x8x16xf32>, vector<2x8x16xf32>, vector<2x8x8xf32> -> vector<2x8x8xf32>
    %cst_85 = arith.constant 0.000000e+00 : f32
    "tpu.trace_stop"() : () -> ()
    %203 = vector.broadcast %cst_85 : f32 to vector<2x8x8xf32>
    %204 = arith.cmpf oge, %202, %203 : vector<2x8x8xf32>
    %cst_86 = arith.constant 2.000000e-01 : f32
    %205 = vector.broadcast %cst_86 : f32 to vector<2x8x8xf32>
    %206 = arith.mulf %205, %202 : vector<2x8x8xf32>
    %207 = arith.select %204, %202, %206 : vector<2x8x8xi1>, vector<2x8x8xf32>
    %cst_87 = arith.constant 0.000000e+00 : f32
    %208 = vector.broadcast %cst_87 : f32 to vector<2x8x8xf32>
    %209 = arith.cmpf ogt, %29, %208 : vector<2x8x8xf32>
    %cst_88 = arith.constant -9.99999995E+11 : f32
    %210 = vector.broadcast %cst_88 : f32 to vector<2x8x8xf32>
    %211 = arith.select %209, %207, %210 : vector<2x8x8xi1>, vector<2x8x8xf32>
    %cst_89 = arith.constant dense<0xFF800000> : vector<2x8xf32>
    %212 = vector.multi_reduction <maximumf>, %211, %cst_89 [2] : vector<2x8x8xf32> to vector<2x8xf32>
    %213 = vector.shape_cast %212 : vector<2x8xf32> to vector<2x8x1xf32>
    %214 = vector.broadcast %213 : vector<2x8x1xf32> to vector<2x8x8xf32>
    %215 = arith.subf %211, %214 : vector<2x8x8xf32>
    %216 = math.exp %215 : vector<2x8x8xf32>
    %cst_90 = arith.constant dense<0.000000e+00> : vector<2x8xf32>
    %217 = vector.multi_reduction <add>, %216, %cst_90 [2] : vector<2x8x8xf32> to vector<2x8xf32>
    %218 = vector.shape_cast %217 : vector<2x8xf32> to vector<2x8x1xf32>
    %219 = vector.broadcast %218 : vector<2x8x1xf32> to vector<2x8x8xf32>
    %220 = arith.divf %216, %219 : vector<2x8x8xf32>
    %221 = arith.mulf %220, %29 : vector<2x8x8xf32>
    "tpu.trace_start"() <{level = 10 : i32, message = "bij,bjh->bih"}> : () -> ()
    %cst_91 = arith.constant dense<0.000000e+00> : vector<2x8x32xf32>
    %222 = tpu.matmul %221, %2, %cst_91 {dimension_numbers = #tpu.dot_dimension_numbers<[2], [1], [1], [2], [0, 0, 0, 1, 1, 2], [0], [0]>} : vector<2x8x8xf32>, vector<2x8x32xf32>, vector<2x8x32xf32> -> vector<2x8x32xf32>
    "tpu.trace_stop"() : () -> ()
    "tpu.trace_start"() <{level = 10 : i32, message = "bih,ha->bia"}> : () -> ()
    %cst_92 = arith.constant dense<0.000000e+00> : vector<2x8x16xf32>
    %223 = tpu.matmul %222, %196, %cst_92 {dimension_numbers = #tpu.dot_dimension_numbers<[2], [0], [0, 1], [1], [0, 0, 0, 1, 1, 1], [], []>} : vector<2x8x32xf32>, vector<32x16xf32>, vector<2x8x16xf32> -> vector<2x8x16xf32>
    "tpu.trace_stop"() : () -> ()
    %224 = vector.shape_cast %198 : vector<16xf32> to vector<1x1x16xf32>
    %225 = vector.broadcast %224 : vector<1x1x16xf32> to vector<2x8x16xf32>
    %226 = arith.addf %223, %225 : vector<2x8x16xf32>
    %227 = vector.extract_strided_slice %7 {offsets = [0, 0, 32], sizes = [2, 8, 16], strides = [1, 1, 1]} : vector<2x8x64xf32> to vector<2x8x16xf32>
    %228 = vector.extract_strided_slice %9 {offsets = [2, 0], sizes = [1, 16], strides = [1, 1]} : vector<4x16xf32> to vector<1x16xf32>
    %229 = vector.shape_cast %228 : vector<1x16xf32> to vector<16xf32>
    %230 = vector.extract_strided_slice %11 {offsets = [2, 0, 0], sizes = [1, 32, 16], strides = [1, 1, 1]} : vector<4x32x16xf32> to vector<1x32x16xf32>
    %231 = vector.shape_cast %230 : vector<1x32x16xf32> to vector<32x16xf32>
    %232 = vector.extract_strided_slice %13 {offsets = [2, 0], sizes = [1, 16], strides = [1, 1]} : vector<4x16xf32> to vector<1x16xf32>
    %233 = vector.shape_cast %232 : vector<1x16xf32> to vector<16xf32>
    %234 = vector.shape_cast %229 : vector<16xf32> to vector<1x1x16xf32>
    %235 = vector.broadcast %234 : vector<1x1x16xf32> to vector<2x8x16xf32>
    %236 = arith.mulf %227, %235 : vector<2x8x16xf32>
    "tpu.trace_start"() <{level = 10 : i32, message = "bia,bja->bij"}> : () -> ()
    %cst_93 = arith.constant dense<0.000000e+00> : vector<2x8x8xf32>
    %237 = tpu.matmul %236, %227, %cst_93 {dimension_numbers = #tpu.dot_dimension_numbers<[2], [2], [1], [1], [0, 0, 0, 1, 1, 1], [0], [0]>} : vector<2x8x16xf32>, vector<2x8x16xf32>, vector<2x8x8xf32> -> vector<2x8x8xf32>
    %cst_94 = arith.constant 0.000000e+00 : f32
    "tpu.trace_stop"() : () -> ()
    %238 = vector.broadcast %cst_94 : f32 to vector<2x8x8xf32>
    %239 = arith.cmpf oge, %237, %238 : vector<2x8x8xf32>
    %cst_95 = arith.constant 2.000000e-01 : f32
    %240 = vector.broadcast %cst_95 : f32 to vector<2x8x8xf32>
    %241 = arith.mulf %240, %237 : vector<2x8x8xf32>
    %242 = arith.select %239, %237, %241 : vector<2x8x8xi1>, vector<2x8x8xf32>
    %cst_96 = arith.constant 0.000000e+00 : f32
    %243 = vector.broadcast %cst_96 : f32 to vector<2x8x8xf32>
    %244 = arith.cmpf ogt, %33, %243 : vector<2x8x8xf32>
    %cst_97 = arith.constant -9.99999995E+11 : f32
    %245 = vector.broadcast %cst_97 : f32 to vector<2x8x8xf32>
    %246 = arith.select %244, %242, %245 : vector<2x8x8xi1>, vector<2x8x8xf32>
    %cst_98 = arith.constant dense<0xFF800000> : vector<2x8xf32>
    %247 = vector.multi_reduction <maximumf>, %246, %cst_98 [2] : vector<2x8x8xf32> to vector<2x8xf32>
    %248 = vector.shape_cast %247 : vector<2x8xf32> to vector<2x8x1xf32>
    %249 = vector.broadcast %248 : vector<2x8x1xf32> to vector<2x8x8xf32>
    %250 = arith.subf %246, %249 : vector<2x8x8xf32>
    %251 = math.exp %250 : vector<2x8x8xf32>
    %cst_99 = arith.constant dense<0.000000e+00> : vector<2x8xf32>
    %252 = vector.multi_reduction <add>, %251, %cst_99 [2] : vector<2x8x8xf32> to vector<2x8xf32>
    %253 = vector.shape_cast %252 : vector<2x8xf32> to vector<2x8x1xf32>
    %254 = vector.broadcast %253 : vector<2x8x1xf32> to vector<2x8x8xf32>
    %255 = arith.divf %251, %254 : vector<2x8x8xf32>
    %256 = arith.mulf %255, %33 : vector<2x8x8xf32>
    "tpu.trace_start"() <{level = 10 : i32, message = "bij,bjh->bih"}> : () -> ()
    %cst_100 = arith.constant dense<0.000000e+00> : vector<2x8x32xf32>
    %257 = tpu.matmul %256, %3, %cst_100 {dimension_numbers = #tpu.dot_dimension_numbers<[2], [1], [1], [2], [0, 0, 0, 1, 1, 2], [0], [0]>} : vector<2x8x8xf32>, vector<2x8x32xf32>, vector<2x8x32xf32> -> vector<2x8x32xf32>
    "tpu.trace_stop"() : () -> ()
    "tpu.trace_start"() <{level = 10 : i32, message = "bih,ha->bia"}> : () -> ()
    %cst_101 = arith.constant dense<0.000000e+00> : vector<2x8x16xf32>
    %258 = tpu.matmul %257, %231, %cst_101 {dimension_numbers = #tpu.dot_dimension_numbers<[2], [0], [0, 1], [1], [0, 0, 0, 1, 1, 1], [], []>} : vector<2x8x32xf32>, vector<32x16xf32>, vector<2x8x16xf32> -> vector<2x8x16xf32>
    "tpu.trace_stop"() : () -> ()
    %259 = vector.shape_cast %233 : vector<16xf32> to vector<1x1x16xf32>
    %260 = vector.broadcast %259 : vector<1x1x16xf32> to vector<2x8x16xf32>
    %261 = arith.addf %258, %260 : vector<2x8x16xf32>
    %262 = vector.extract_strided_slice %5 {offsets = [0, 0, 48], sizes = [2, 8, 16], strides = [1, 1, 1]} : vector<2x8x64xf32> to vector<2x8x16xf32>
    %263 = vector.extract_strided_slice %8 {offsets = [3, 0], sizes = [1, 16], strides = [1, 1]} : vector<4x16xf32> to vector<1x16xf32>
    %264 = vector.shape_cast %263 : vector<1x16xf32> to vector<16xf32>
    %265 = vector.extract_strided_slice %10 {offsets = [3, 0, 0], sizes = [1, 32, 16], strides = [1, 1, 1]} : vector<4x32x16xf32> to vector<1x32x16xf32>
    %266 = vector.shape_cast %265 : vector<1x32x16xf32> to vector<32x16xf32>
    %267 = vector.extract_strided_slice %12 {offsets = [3, 0], sizes = [1, 16], strides = [1, 1]} : vector<4x16xf32> to vector<1x16xf32>
    %268 = vector.shape_cast %267 : vector<1x16xf32> to vector<16xf32>
    %269 = vector.shape_cast %264 : vector<16xf32> to vector<1x1x16xf32>
    %270 = vector.broadcast %269 : vector<1x1x16xf32> to vector<2x8x16xf32>
    %271 = arith.mulf %262, %270 : vector<2x8x16xf32>
    "tpu.trace_start"() <{level = 10 : i32, message = "bia,bja->bij"}> : () -> ()
    %cst_102 = arith.constant dense<0.000000e+00> : vector<2x8x8xf32>
    %272 = tpu.matmul %271, %262, %cst_102 {dimension_numbers = #tpu.dot_dimension_numbers<[2], [2], [1], [1], [0, 0, 0, 1, 1, 1], [0], [0]>} : vector<2x8x16xf32>, vector<2x8x16xf32>, vector<2x8x8xf32> -> vector<2x8x8xf32>
    %cst_103 = arith.constant 0.000000e+00 : f32
    "tpu.trace_stop"() : () -> ()
    %273 = vector.broadcast %cst_103 : f32 to vector<2x8x8xf32>
    %274 = arith.cmpf oge, %272, %273 : vector<2x8x8xf32>
    %cst_104 = arith.constant 2.000000e-01 : f32
    %275 = vector.broadcast %cst_104 : f32 to vector<2x8x8xf32>
    %276 = arith.mulf %275, %272 : vector<2x8x8xf32>
    %277 = arith.select %274, %272, %276 : vector<2x8x8xi1>, vector<2x8x8xf32>
    %cst_105 = arith.constant 0.000000e+00 : f32
    %278 = vector.broadcast %cst_105 : f32 to vector<2x8x8xf32>
    %279 = arith.cmpf ogt, %29, %278 : vector<2x8x8xf32>
    %cst_106 = arith.constant -9.99999995E+11 : f32
    %280 = vector.broadcast %cst_106 : f32 to vector<2x8x8xf32>
    %281 = arith.select %279, %277, %280 : vector<2x8x8xi1>, vector<2x8x8xf32>
    %cst_107 = arith.constant dense<0xFF800000> : vector<2x8xf32>
    %282 = vector.multi_reduction <maximumf>, %281, %cst_107 [2] : vector<2x8x8xf32> to vector<2x8xf32>
    %283 = vector.shape_cast %282 : vector<2x8xf32> to vector<2x8x1xf32>
    %284 = vector.broadcast %283 : vector<2x8x1xf32> to vector<2x8x8xf32>
    %285 = arith.subf %281, %284 : vector<2x8x8xf32>
    %286 = math.exp %285 : vector<2x8x8xf32>
    %cst_108 = arith.constant dense<0.000000e+00> : vector<2x8xf32>
    %287 = vector.multi_reduction <add>, %286, %cst_108 [2] : vector<2x8x8xf32> to vector<2x8xf32>
    %288 = vector.shape_cast %287 : vector<2x8xf32> to vector<2x8x1xf32>
    %289 = vector.broadcast %288 : vector<2x8x1xf32> to vector<2x8x8xf32>
    %290 = arith.divf %286, %289 : vector<2x8x8xf32>
    %291 = arith.mulf %290, %29 : vector<2x8x8xf32>
    "tpu.trace_start"() <{level = 10 : i32, message = "bij,bjh->bih"}> : () -> ()
    %cst_109 = arith.constant dense<0.000000e+00> : vector<2x8x32xf32>
    %292 = tpu.matmul %291, %2, %cst_109 {dimension_numbers = #tpu.dot_dimension_numbers<[2], [1], [1], [2], [0, 0, 0, 1, 1, 2], [0], [0]>} : vector<2x8x8xf32>, vector<2x8x32xf32>, vector<2x8x32xf32> -> vector<2x8x32xf32>
    "tpu.trace_stop"() : () -> ()
    "tpu.trace_start"() <{level = 10 : i32, message = "bih,ha->bia"}> : () -> ()
    %cst_110 = arith.constant dense<0.000000e+00> : vector<2x8x16xf32>
    %293 = tpu.matmul %292, %266, %cst_110 {dimension_numbers = #tpu.dot_dimension_numbers<[2], [0], [0, 1], [1], [0, 0, 0, 1, 1, 1], [], []>} : vector<2x8x32xf32>, vector<32x16xf32>, vector<2x8x16xf32> -> vector<2x8x16xf32>
    "tpu.trace_stop"() : () -> ()
    %294 = vector.shape_cast %268 : vector<16xf32> to vector<1x1x16xf32>
    %295 = vector.broadcast %294 : vector<1x1x16xf32> to vector<2x8x16xf32>
    %296 = arith.addf %293, %295 : vector<2x8x16xf32>
    %297 = vector.extract_strided_slice %7 {offsets = [0, 0, 48], sizes = [2, 8, 16], strides = [1, 1, 1]} : vector<2x8x64xf32> to vector<2x8x16xf32>
    %298 = vector.extract_strided_slice %9 {offsets = [3, 0], sizes = [1, 16], strides = [1, 1]} : vector<4x16xf32> to vector<1x16xf32>
    %299 = vector.shape_cast %298 : vector<1x16xf32> to vector<16xf32>
    %300 = vector.extract_strided_slice %11 {offsets = [3, 0, 0], sizes = [1, 32, 16], strides = [1, 1, 1]} : vector<4x32x16xf32> to vector<1x32x16xf32>
    %301 = vector.shape_cast %300 : vector<1x32x16xf32> to vector<32x16xf32>
    %302 = vector.extract_strided_slice %13 {offsets = [3, 0], sizes = [1, 16], strides = [1, 1]} : vector<4x16xf32> to vector<1x16xf32>
    %303 = vector.shape_cast %302 : vector<1x16xf32> to vector<16xf32>
    %304 = vector.shape_cast %299 : vector<16xf32> to vector<1x1x16xf32>
    %305 = vector.broadcast %304 : vector<1x1x16xf32> to vector<2x8x16xf32>
    %306 = arith.mulf %297, %305 : vector<2x8x16xf32>
    "tpu.trace_start"() <{level = 10 : i32, message = "bia,bja->bij"}> : () -> ()
    %cst_111 = arith.constant dense<0.000000e+00> : vector<2x8x8xf32>
    %307 = tpu.matmul %306, %297, %cst_111 {dimension_numbers = #tpu.dot_dimension_numbers<[2], [2], [1], [1], [0, 0, 0, 1, 1, 1], [0], [0]>} : vector<2x8x16xf32>, vector<2x8x16xf32>, vector<2x8x8xf32> -> vector<2x8x8xf32>
    %cst_112 = arith.constant 0.000000e+00 : f32
    "tpu.trace_stop"() : () -> ()
    %308 = vector.broadcast %cst_112 : f32 to vector<2x8x8xf32>
    %309 = arith.cmpf oge, %307, %308 : vector<2x8x8xf32>
    %cst_113 = arith.constant 2.000000e-01 : f32
    %310 = vector.broadcast %cst_113 : f32 to vector<2x8x8xf32>
    %311 = arith.mulf %310, %307 : vector<2x8x8xf32>
    %312 = arith.select %309, %307, %311 : vector<2x8x8xi1>, vector<2x8x8xf32>
    %cst_114 = arith.constant 0.000000e+00 : f32
    %313 = vector.broadcast %cst_114 : f32 to vector<2x8x8xf32>
    %314 = arith.cmpf ogt, %33, %313 : vector<2x8x8xf32>
    %cst_115 = arith.constant -9.99999995E+11 : f32
    %315 = vector.broadcast %cst_115 : f32 to vector<2x8x8xf32>
    %316 = arith.select %314, %312, %315 : vector<2x8x8xi1>, vector<2x8x8xf32>
    %cst_116 = arith.constant dense<0xFF800000> : vector<2x8xf32>
    %317 = vector.multi_reduction <maximumf>, %316, %cst_116 [2] : vector<2x8x8xf32> to vector<2x8xf32>
    %318 = vector.shape_cast %317 : vector<2x8xf32> to vector<2x8x1xf32>
    %319 = vector.broadcast %318 : vector<2x8x1xf32> to vector<2x8x8xf32>
    %320 = arith.subf %316, %319 : vector<2x8x8xf32>
    %321 = math.exp %320 : vector<2x8x8xf32>
    %cst_117 = arith.constant dense<0.000000e+00> : vector<2x8xf32>
    %322 = vector.multi_reduction <add>, %321, %cst_117 [2] : vector<2x8x8xf32> to vector<2x8xf32>
    %323 = vector.shape_cast %322 : vector<2x8xf32> to vector<2x8x1xf32>
    %324 = vector.broadcast %323 : vector<2x8x1xf32> to vector<2x8x8xf32>
    %325 = arith.divf %321, %324 : vector<2x8x8xf32>
    %326 = arith.mulf %325, %33 : vector<2x8x8xf32>
    "tpu.trace_start"() <{level = 10 : i32, message = "bij,bjh->bih"}> : () -> ()
    %cst_118 = arith.constant dense<0.000000e+00> : vector<2x8x32xf32>
    %327 = tpu.matmul %326, %3, %cst_118 {dimension_numbers = #tpu.dot_dimension_numbers<[2], [1], [1], [2], [0, 0, 0, 1, 1, 2], [0], [0]>} : vector<2x8x8xf32>, vector<2x8x32xf32>, vector<2x8x32xf32> -> vector<2x8x32xf32>
    "tpu.trace_stop"() : () -> ()
    "tpu.trace_start"() <{level = 10 : i32, message = "bih,ha->bia"}> : () -> ()
    %cst_119 = arith.constant dense<0.000000e+00> : vector<2x8x16xf32>
    %328 = tpu.matmul %327, %301, %cst_119 {dimension_numbers = #tpu.dot_dimension_numbers<[2], [0], [0, 1], [1], [0, 0, 0, 1, 1, 1], [], []>} : vector<2x8x32xf32>, vector<32x16xf32>, vector<2x8x16xf32> -> vector<2x8x16xf32>
    "tpu.trace_stop"() : () -> ()
    %329 = vector.shape_cast %303 : vector<16xf32> to vector<1x1x16xf32>
    %330 = vector.broadcast %329 : vector<1x1x16xf32> to vector<2x8x16xf32>
    %331 = arith.addf %328, %330 : vector<2x8x16xf32>
    %332 = tpu.concatenate %226, %296 in 2 : vector<2x8x16xf32>, vector<2x8x16xf32> -> vector<2x8x32xf32>
    %333 = tpu.concatenate %261, %331 in 2 : vector<2x8x16xf32>, vector<2x8x16xf32> -> vector<2x8x32xf32>
    %334 = arith.addf %332, %2 : vector<2x8x32xf32>
    %cst_120 = arith.constant 0.000000e+00 : f32
    %335 = vector.broadcast %cst_120 : f32 to vector<2x8x32xf32>
    %336 = arith.cmpf oge, %334, %335 : vector<2x8x32xf32>
    %cst_121 = arith.constant 2.000000e-01 : f32
    %337 = vector.broadcast %cst_121 : f32 to vector<2x8x32xf32>
    %338 = arith.mulf %337, %334 : vector<2x8x32xf32>
    %339 = arith.select %336, %334, %338 : vector<2x8x32xi1>, vector<2x8x32xf32>
    %340 = arith.addf %333, %3 : vector<2x8x32xf32>
    %cst_122 = arith.constant 0.000000e+00 : f32
    %341 = vector.broadcast %cst_122 : f32 to vector<2x8x32xf32>
    %342 = arith.cmpf oge, %340, %341 : vector<2x8x32xf32>
    %cst_123 = arith.constant 2.000000e-01 : f32
    %343 = vector.broadcast %cst_123 : f32 to vector<2x8x32xf32>
    %344 = arith.mulf %343, %340 : vector<2x8x32xf32>
    %345 = arith.select %342, %340, %344 : vector<2x8x32xi1>, vector<2x8x32xf32>
    %346 = arith.addf %339, %345 : vector<2x8x32xf32>
    %c1 = arith.constant 1 : index
    %c0_124 = arith.constant 0 : index
    %c0_125 = arith.constant 0 : index
    %c0_126 = arith.constant 0 : index
    %347 = vector.load %arg12[%c1, %c0_124, %c0_125, %c0_126] : memref<2x2x8x32xf32, #tpu.memory_space<vmem>>, vector<1x2x8x32xf32>
    %348 = vector.shape_cast %347 : vector<1x2x8x32xf32> to vector<2x8x32xf32>
    %349 = vector.shape_cast %346 : vector<2x8x32xf32> to vector<1x2x8x32xf32>
    tpu.vector_store %arg12[%c1, %c0_124, %c0_125, %c0_126], %349 {strides = array<i32>} : memref<2x2x8x32xf32, #tpu.memory_space<vmem>>, vector<1x2x8x32xf32>,
    return
  }
}

module attributes {stable_mosaic.version = 11 : i64} {
  func.func @_scorer_fused_kernel(%arg0: memref<2x2x8x32xf32, #tpu.memory_space<vmem>>, %arg1: memref<2x2x8x32xf32, #tpu.memory_space<vmem>>, %arg2: memref<2x8x32xf32, #tpu.memory_space<vmem>>, %arg3: memref<2x2x32xf32, #tpu.memory_space<vmem>>, %arg4: memref<2x2x32xf32, #tpu.memory_space<vmem>>, %arg5: memref<2x8xf32, #tpu.memory_space<vmem>>, %arg6: memref<256x32xbf16, #tpu.memory_space<vmem>>, %arg7: memref<2x32x96xf32, #tpu.memory_space<vmem>>, %arg8: memref<2x32x64xf32, #tpu.memory_space<vmem>>, %arg9: memref<2x32x32xf32, #tpu.memory_space<vmem>>, %arg10: memref<2x32xf32, #tpu.memory_space<vmem>>, %arg11: memref<2x32x32xf32, #tpu.memory_space<vmem>>, %arg12: memref<2x32xf32, #tpu.memory_space<vmem>>, %arg13: memref<2x32x4xf32, #tpu.memory_space<vmem>>, %arg14: memref<2x4x32xf32, #tpu.memory_space<vmem>>, %arg15: memref<2x32xf32, #tpu.memory_space<vmem>>, %arg16: memref<2x32xf32, #tpu.memory_space<vmem>>, %arg17: memref<2x32x32xf32, #tpu.memory_space<vmem>>, %arg18: memref<2x32x32xf32, #tpu.memory_space<vmem>>, %arg19: memref<2x32xf32, #tpu.memory_space<vmem>>, %arg20: memref<2x2x32xf32, #tpu.memory_space<vmem>>, %arg21: memref<2x2x256xf32, #tpu.memory_space<vmem>>) attributes {dimension_semantics = [], scalar_prefetch = 0 : i64, scratch_operands = 0 : i64, tpu.core_type = #tpu.core_type<tc>} {
    %c0 = arith.constant 0 : index
    %c0_0 = arith.constant 0 : index
    %0 = vector.load %arg5[%c0, %c0_0] : memref<2x8xf32, #tpu.memory_space<vmem>>, vector<2x8xf32>
    %1 = vector.shape_cast %0 : vector<2x8xf32> to vector<2x8x1xf32>
    %c0_1 = arith.constant 0 : index
    %c0_2 = arith.constant 0 : index
    %c0_3 = arith.constant 0 : index
    %2 = vector.load %arg2[%c0_1, %c0_2, %c0_3] : memref<2x8x32xf32, #tpu.memory_space<vmem>>, vector<2x8x32xf32>
    %c0_4 = arith.constant 0 : index
    %c0_5 = arith.constant 0 : index
    %3 = vector.load %arg6[%c0_4, %c0_5] : memref<256x32xbf16, #tpu.memory_space<vmem>>, vector<256x32xbf16>
    %4 = tpu.iota {dimensions = array<i32: 0>} : vector<8x8xi32>
    %5 = tpu.iota {dimensions = array<i32: 1>} : vector<8x8xi32>
    %6 = arith.cmpi sle, %5, %4 : vector<8x8xi32>
    %7 = vector.shape_cast %6 : vector<8x8xi1> to vector<1x8x8xi1>
    %8 = vector.shape_cast %0 : vector<2x8xf32> to vector<2x1x8xf32>
    %cst = arith.constant 0.000000e+00 : f32
    %9 = vector.broadcast %cst : f32 to vector<2x1x8xf32>
    %10 = arith.cmpf ogt, %8, %9 : vector<2x1x8xf32>
    %11 = vector.broadcast %7 : vector<1x8x8xi1> to vector<2x8x8xi1>
    %12 = vector.broadcast %10 : vector<2x1x8xi1> to vector<2x8x8xi1>
    %13 = arith.andi %11, %12 : vector<2x8x8xi1>
    %c0_6 = arith.constant 0 : index
    %c0_7 = arith.constant 0 : index
    %c0_8 = arith.constant 0 : index
    %c0_9 = arith.constant 0 : index
    %14 = vector.load %arg0[%c0_6, %c0_7, %c0_8, %c0_9] : memref<2x2x8x32xf32, #tpu.memory_space<vmem>>, vector<1x2x8x32xf32>
    %15 = vector.shape_cast %14 : vector<1x2x8x32xf32> to vector<2x8x32xf32>
    %16 = vector.broadcast %1 : vector<2x8x1xf32> to vector<2x8x32xf32>
    %17 = arith.mulf %15, %16 : vector<2x8x32xf32>
    %c0_10 = arith.constant 0 : index
    %c0_11 = arith.constant 0 : index
    %c0_12 = arith.constant 0 : index
    %c0_13 = arith.constant 0 : index
    %18 = vector.load %arg1[%c0_10, %c0_11, %c0_12, %c0_13] : memref<2x2x8x32xf32, #tpu.memory_space<vmem>>, vector<1x2x8x32xf32>
    %19 = vector.shape_cast %18 : vector<1x2x8x32xf32> to vector<2x8x32xf32>
    %20 = vector.broadcast %1 : vector<2x8x1xf32> to vector<2x8x32xf32>
    %21 = arith.mulf %19, %20 : vector<2x8x32xf32>
    %c0_14 = arith.constant 0 : index
    %c0_15 = arith.constant 0 : index
    %c0_16 = arith.constant 0 : index
    %22 = vector.load %arg7[%c0_14, %c0_15, %c0_16] : memref<2x32x96xf32, #tpu.memory_space<vmem>>, vector<1x32x96xf32>
    %23 = vector.shape_cast %22 : vector<1x32x96xf32> to vector<32x96xf32>
    "tpu.trace_start"() <{level = 10 : i32, message = "blh,hk->blk"}> : () -> ()
    %cst_17 = arith.constant dense<0.000000e+00> : vector<2x8x96xf32>
    %24 = tpu.matmul %17, %23, %cst_17 {dimension_numbers = #tpu.dot_dimension_numbers<[2], [0], [0, 1], [1], [0, 0, 0, 1, 1, 1], [], []>} : vector<2x8x32xf32>, vector<32x96xf32>, vector<2x8x96xf32> -> vector<2x8x96xf32>
    "tpu.trace_stop"() : () -> ()
    %25 = vector.extract_strided_slice %24 {offsets = [0, 0, 0], sizes = [2, 8, 32], strides = [1, 1, 1]} : vector<2x8x96xf32> to vector<2x8x32xf32>
    %26 = arith.addf %25, %2 : vector<2x8x32xf32>
    %27 = vector.extract_strided_slice %24 {offsets = [0, 0, 32], sizes = [2, 8, 32], strides = [1, 1, 1]} : vector<2x8x96xf32> to vector<2x8x32xf32>
    %28 = arith.addf %27, %2 : vector<2x8x32xf32>
    %29 = vector.extract_strided_slice %24 {offsets = [0, 0, 64], sizes = [2, 8, 32], strides = [1, 1, 1]} : vector<2x8x96xf32> to vector<2x8x32xf32>
    %30 = arith.addf %29, %2 : vector<2x8x32xf32>
    "tpu.trace_start"() <{level = 10 : i32, message = "blh,bmh->blm"}> : () -> ()
    %cst_18 = arith.constant dense<0.000000e+00> : vector<2x8x8xf32>
    %31 = tpu.matmul %26, %28, %cst_18 {dimension_numbers = #tpu.dot_dimension_numbers<[2], [2], [1], [1], [0, 0, 0, 1, 1, 1], [0], [0]>} : vector<2x8x32xf32>, vector<2x8x32xf32>, vector<2x8x8xf32> -> vector<2x8x8xf32>
    "tpu.trace_stop"() : () -> ()
    %cst_19 = arith.constant 0.176776692 : f32
    %32 = vector.broadcast %cst_19 : f32 to vector<2x8x8xf32>
    %33 = arith.mulf %31, %32 : vector<2x8x8xf32>
    %cst_20 = arith.constant -9.99999995E+11 : f32
    %34 = vector.broadcast %cst_20 : f32 to vector<2x8x8xf32>
    %35 = arith.select %13, %33, %34 : vector<2x8x8xi1>, vector<2x8x8xf32>
    %cst_21 = arith.constant dense<0xFF800000> : vector<2x8xf32>
    %36 = vector.multi_reduction <maximumf>, %35, %cst_21 [2] : vector<2x8x8xf32> to vector<2x8xf32>
    %37 = vector.shape_cast %36 : vector<2x8xf32> to vector<2x8x1xf32>
    %38 = vector.broadcast %37 : vector<2x8x1xf32> to vector<2x8x8xf32>
    %39 = arith.subf %35, %38 : vector<2x8x8xf32>
    %40 = math.exp %39 : vector<2x8x8xf32>
    %cst_22 = arith.constant dense<0.000000e+00> : vector<2x8xf32>
    %41 = vector.multi_reduction <add>, %40, %cst_22 [2] : vector<2x8x8xf32> to vector<2x8xf32>
    %42 = vector.shape_cast %41 : vector<2x8xf32> to vector<2x8x1xf32>
    %43 = vector.broadcast %42 : vector<2x8x1xf32> to vector<2x8x8xf32>
    %44 = arith.divf %40, %43 : vector<2x8x8xf32>
    "tpu.trace_start"() <{level = 10 : i32, message = "blm,bmh->blh"}> : () -> ()
    %cst_23 = arith.constant dense<0.000000e+00> : vector<2x8x32xf32>
    %45 = tpu.matmul %44, %30, %cst_23 {dimension_numbers = #tpu.dot_dimension_numbers<[2], [1], [1], [2], [0, 0, 0, 1, 1, 2], [0], [0]>} : vector<2x8x8xf32>, vector<2x8x32xf32>, vector<2x8x32xf32> -> vector<2x8x32xf32>
    "tpu.trace_stop"() : () -> ()
    %46 = vector.broadcast %1 : vector<2x8x1xf32> to vector<2x8x32xf32>
    %47 = arith.mulf %45, %46 : vector<2x8x32xf32>
    %c0_24 = arith.constant 0 : index
    %c0_25 = arith.constant 0 : index
    %c0_26 = arith.constant 0 : index
    %48 = vector.load %arg9[%c0_24, %c0_25, %c0_26] : memref<2x32x32xf32, #tpu.memory_space<vmem>>, vector<1x32x32xf32>
    %49 = vector.shape_cast %48 : vector<1x32x32xf32> to vector<32x32xf32>
    "tpu.trace_start"() <{level = 10 : i32, message = "blh,hk->blk"}> : () -> ()
    %cst_27 = arith.constant dense<0.000000e+00> : vector<2x8x32xf32>
    %50 = tpu.matmul %47, %49, %cst_27 {dimension_numbers = #tpu.dot_dimension_numbers<[2], [0], [0, 1], [1], [0, 0, 0, 1, 1, 1], [], []>} : vector<2x8x32xf32>, vector<32x32xf32>, vector<2x8x32xf32> -> vector<2x8x32xf32>
    "tpu.trace_stop"() : () -> ()
    %c0_28 = arith.constant 0 : index
    %c0_29 = arith.constant 0 : index
    %51 = vector.load %arg10[%c0_28, %c0_29] : memref<2x32xf32, #tpu.memory_space<vmem>>, vector<1x32xf32>
    %52 = vector.shape_cast %51 : vector<1x32xf32> to vector<32xf32>
    %53 = vector.shape_cast %52 : vector<32xf32> to vector<1x1x32xf32>
    %54 = vector.broadcast %53 : vector<1x1x32xf32> to vector<2x8x32xf32>
    %55 = arith.addf %50, %54 : vector<2x8x32xf32>
    %c0_30 = arith.constant 0 : index
    %c0_31 = arith.constant 0 : index
    %c0_32 = arith.constant 0 : index
    %56 = vector.load %arg8[%c0_30, %c0_31, %c0_32] : memref<2x32x64xf32, #tpu.memory_space<vmem>>, vector<1x32x64xf32>
    %57 = vector.shape_cast %56 : vector<1x32x64xf32> to vector<32x64xf32>
    "tpu.trace_start"() <{level = 10 : i32, message = "blh,hk->blk"}> : () -> ()
    %cst_33 = arith.constant dense<0.000000e+00> : vector<2x8x64xf32>
    %58 = tpu.matmul %21, %57, %cst_33 {dimension_numbers = #tpu.dot_dimension_numbers<[2], [0], [0, 1], [1], [0, 0, 0, 1, 1, 1], [], []>} : vector<2x8x32xf32>, vector<32x64xf32>, vector<2x8x64xf32> -> vector<2x8x64xf32>
    "tpu.trace_stop"() : () -> ()
    %59 = vector.extract_strided_slice %58 {offsets = [0, 0, 0], sizes = [2, 8, 32], strides = [1, 1, 1]} : vector<2x8x64xf32> to vector<2x8x32xf32>
    %60 = vector.extract_strided_slice %58 {offsets = [0, 0, 32], sizes = [2, 8, 32], strides = [1, 1, 1]} : vector<2x8x64xf32> to vector<2x8x32xf32>
    %c0_34 = arith.constant 0 : index
    %c0_35 = arith.constant 0 : index
    %c0_36 = arith.constant 0 : index
    %61 = vector.load %arg13[%c0_34, %c0_35, %c0_36] : memref<2x32x4xf32, #tpu.memory_space<vmem>>, vector<1x32x4xf32>
    %62 = vector.shape_cast %61 : vector<1x32x4xf32> to vector<32x4xf32>
    "tpu.trace_start"() <{level = 10 : i32, message = "blh,hm->blm"}> : () -> ()
    %cst_37 = arith.constant dense<0.000000e+00> : vector<2x8x4xf32>
    %63 = tpu.matmul %26, %62, %cst_37 {dimension_numbers = #tpu.dot_dimension_numbers<[2], [0], [0, 1], [1], [0, 0, 0, 1, 1, 1], [], []>} : vector<2x8x32xf32>, vector<32x4xf32>, vector<2x8x4xf32> -> vector<2x8x4xf32>
    "tpu.trace_stop"() : () -> ()
    %cst_38 = arith.constant 0.176776692 : f32
    %64 = vector.broadcast %cst_38 : f32 to vector<2x8x4xf32>
    %65 = arith.mulf %63, %64 : vector<2x8x4xf32>
    "tpu.trace_start"() <{level = 10 : i32, message = "blh,bmh->blm"}> : () -> ()
    %cst_39 = arith.constant dense<0.000000e+00> : vector<2x8x8xf32>
    %66 = tpu.matmul %26, %59, %cst_39 {dimension_numbers = #tpu.dot_dimension_numbers<[2], [2], [1], [1], [0, 0, 0, 1, 1, 1], [0], [0]>} : vector<2x8x32xf32>, vector<2x8x32xf32>, vector<2x8x8xf32> -> vector<2x8x8xf32>
    "tpu.trace_stop"() : () -> ()
    %cst_40 = arith.constant 0.176776692 : f32
    %67 = vector.broadcast %cst_40 : f32 to vector<2x8x8xf32>
    %68 = arith.mulf %66, %67 : vector<2x8x8xf32>
    %cst_41 = arith.constant -9.99999995E+11 : f32
    %69 = vector.broadcast %cst_41 : f32 to vector<2x8x8xf32>
    %70 = arith.select %13, %68, %69 : vector<2x8x8xi1>, vector<2x8x8xf32>
    %cst_42 = arith.constant dense<0xFF800000> : vector<2x8xf32>
    %71 = vector.multi_reduction <maximumf>, %65, %cst_42 [2] : vector<2x8x4xf32> to vector<2x8xf32>
    %72 = vector.shape_cast %71 : vector<2x8xf32> to vector<2x8x1xf32>
    %cst_43 = arith.constant dense<0xFF800000> : vector<2x8xf32>
    %73 = vector.multi_reduction <maximumf>, %70, %cst_43 [2] : vector<2x8x8xf32> to vector<2x8xf32>
    %74 = vector.shape_cast %73 : vector<2x8xf32> to vector<2x8x1xf32>
    %75 = arith.maximumf %72, %74 : vector<2x8x1xf32>
    %76 = vector.broadcast %75 : vector<2x8x1xf32> to vector<2x8x4xf32>
    %77 = arith.subf %65, %76 : vector<2x8x4xf32>
    %78 = math.exp %77 : vector<2x8x4xf32>
    %79 = vector.broadcast %75 : vector<2x8x1xf32> to vector<2x8x8xf32>
    %80 = arith.subf %70, %79 : vector<2x8x8xf32>
    %81 = math.exp %80 : vector<2x8x8xf32>
    %cst_44 = arith.constant dense<0.000000e+00> : vector<2x8xf32>
    %82 = vector.multi_reduction <add>, %78, %cst_44 [2] : vector<2x8x4xf32> to vector<2x8xf32>
    %83 = vector.shape_cast %82 : vector<2x8xf32> to vector<2x8x1xf32>
    %cst_45 = arith.constant dense<0.000000e+00> : vector<2x8xf32>
    %84 = vector.multi_reduction <add>, %81, %cst_45 [2] : vector<2x8x8xf32> to vector<2x8xf32>
    %85 = vector.shape_cast %84 : vector<2x8xf32> to vector<2x8x1xf32>
    %86 = arith.addf %83, %85 : vector<2x8x1xf32>
    %c0_46 = arith.constant 0 : index
    %c0_47 = arith.constant 0 : index
    %c0_48 = arith.constant 0 : index
    %87 = vector.load %arg14[%c0_46, %c0_47, %c0_48] : memref<2x4x32xf32, #tpu.memory_space<vmem>>, vector<1x4x32xf32>
    %88 = vector.shape_cast %87 : vector<1x4x32xf32> to vector<4x32xf32>
    "tpu.trace_start"() <{level = 10 : i32, message = "blm,mh->blh"}> : () -> ()
    %cst_49 = arith.constant dense<0.000000e+00> : vector<2x8x32xf32>
    %89 = tpu.matmul %78, %88, %cst_49 {dimension_numbers = #tpu.dot_dimension_numbers<[2], [0], [0, 1], [1], [0, 0, 0, 1, 1, 1], [], []>} : vector<2x8x4xf32>, vector<4x32xf32>, vector<2x8x32xf32> -> vector<2x8x32xf32>
    "tpu.trace_stop"() : () -> ()
    "tpu.trace_start"() <{level = 10 : i32, message = "blm,bmh->blh"}> : () -> ()
    %cst_50 = arith.constant dense<0.000000e+00> : vector<2x8x32xf32>
    %90 = tpu.matmul %81, %60, %cst_50 {dimension_numbers = #tpu.dot_dimension_numbers<[2], [1], [1], [2], [0, 0, 0, 1, 1, 2], [0], [0]>} : vector<2x8x8xf32>, vector<2x8x32xf32>, vector<2x8x32xf32> -> vector<2x8x32xf32>
    "tpu.trace_stop"() : () -> ()
    %91 = arith.addf %89, %90 : vector<2x8x32xf32>
    %92 = vector.broadcast %86 : vector<2x8x1xf32> to vector<2x8x32xf32>
    %93 = arith.divf %91, %92 : vector<2x8x32xf32>
    %94 = vector.broadcast %1 : vector<2x8x1xf32> to vector<2x8x32xf32>
    %95 = arith.mulf %93, %94 : vector<2x8x32xf32>
    %c0_51 = arith.constant 0 : index
    %c0_52 = arith.constant 0 : index
    %c0_53 = arith.constant 0 : index
    %96 = vector.load %arg11[%c0_51, %c0_52, %c0_53] : memref<2x32x32xf32, #tpu.memory_space<vmem>>, vector<1x32x32xf32>
    %97 = vector.shape_cast %96 : vector<1x32x32xf32> to vector<32x32xf32>
    "tpu.trace_start"() <{level = 10 : i32, message = "blh,hk->blk"}> : () -> ()
    %cst_54 = arith.constant dense<0.000000e+00> : vector<2x8x32xf32>
    %98 = tpu.matmul %95, %97, %cst_54 {dimension_numbers = #tpu.dot_dimension_numbers<[2], [0], [0, 1], [1], [0, 0, 0, 1, 1, 1], [], []>} : vector<2x8x32xf32>, vector<32x32xf32>, vector<2x8x32xf32> -> vector<2x8x32xf32>
    "tpu.trace_stop"() : () -> ()
    %c0_55 = arith.constant 0 : index
    %c0_56 = arith.constant 0 : index
    %99 = vector.load %arg12[%c0_55, %c0_56] : memref<2x32xf32, #tpu.memory_space<vmem>>, vector<1x32xf32>
    %100 = vector.shape_cast %99 : vector<1x32xf32> to vector<32xf32>
    %101 = vector.shape_cast %100 : vector<32xf32> to vector<1x1x32xf32>
    %102 = vector.broadcast %101 : vector<1x1x32xf32> to vector<2x8x32xf32>
    %103 = arith.addf %98, %102 : vector<2x8x32xf32>
    %104 = arith.addf %55, %103 : vector<2x8x32xf32>
    %cst_57 = arith.constant 0.000000e+00 : f32
    %105 = vector.broadcast %cst_57 : f32 to vector<2x8x32xf32>
    %106 = arith.maximumf %104, %105 : vector<2x8x32xf32>
    %c0_58 = arith.constant 0 : index
    %c0_59 = arith.constant 0 : index
    %107 = vector.load %arg15[%c0_58, %c0_59] : memref<2x32xf32, #tpu.memory_space<vmem>>, vector<1x32xf32>
    %108 = vector.shape_cast %107 : vector<1x32xf32> to vector<32xf32>
    %109 = vector.shape_cast %108 : vector<32xf32> to vector<1x1x32xf32>
    %110 = vector.broadcast %109 : vector<1x1x32xf32> to vector<2x8x32xf32>
    %111 = arith.mulf %106, %110 : vector<2x8x32xf32>
    %cst_60 = arith.constant dense<0.000000e+00> : vector<2x8xf32>
    %112 = vector.multi_reduction <add>, %111, %cst_60 [2] : vector<2x8x32xf32> to vector<2x8xf32>
    %c0_61 = arith.constant 0 : index
    %c0_62 = arith.constant 0 : index
    %c0_63 = arith.constant 0 : index
    %113 = vector.load %arg3[%c0_61, %c0_62, %c0_63] : memref<2x2x32xf32, #tpu.memory_space<vmem>>, vector<1x2x32xf32>
    %114 = vector.shape_cast %113 : vector<1x2x32xf32> to vector<2x32xf32>
    %c0_64 = arith.constant 0 : index
    %c0_65 = arith.constant 0 : index
    %115 = vector.load %arg16[%c0_64, %c0_65] : memref<2x32xf32, #tpu.memory_space<vmem>>, vector<1x32xf32>
    %116 = vector.shape_cast %115 : vector<1x32xf32> to vector<32xf32>
    %117 = vector.shape_cast %116 : vector<32xf32> to vector<1x32xf32>
    %118 = vector.broadcast %117 : vector<1x32xf32> to vector<2x32xf32>
    %119 = arith.mulf %114, %118 : vector<2x32xf32>
    %cst_66 = arith.constant dense<0.000000e+00> : vector<2xf32>
    %120 = vector.multi_reduction <add>, %119, %cst_66 [1] : vector<2x32xf32> to vector<2xf32>
    %121 = vector.shape_cast %120 : vector<2xf32> to vector<2x1xf32>
    %122 = vector.broadcast %121 : vector<2x1xf32> to vector<2x8xf32>
    %123 = arith.addf %112, %122 : vector<2x8xf32>
    %cst_67 = arith.constant 0.000000e+00 : f32
    %124 = vector.broadcast %cst_67 : f32 to vector<2x8xf32>
    %125 = arith.cmpf ogt, %0, %124 : vector<2x8xf32>
    %cst_68 = arith.constant -9.99999995E+11 : f32
    %126 = vector.broadcast %cst_68 : f32 to vector<2x8xf32>
    %127 = arith.select %125, %123, %126 : vector<2x8xi1>, vector<2x8xf32>
    %cst_69 = arith.constant dense<0xFF800000> : vector<2xf32>
    %128 = vector.multi_reduction <maximumf>, %127, %cst_69 [1] : vector<2x8xf32> to vector<2xf32>
    %129 = vector.shape_cast %128 : vector<2xf32> to vector<2x1xf32>
    %130 = vector.broadcast %129 : vector<2x1xf32> to vector<2x8xf32>
    %131 = arith.subf %127, %130 : vector<2x8xf32>
    %132 = math.exp %131 : vector<2x8xf32>
    %cst_70 = arith.constant dense<0.000000e+00> : vector<2xf32>
    %133 = vector.multi_reduction <add>, %132, %cst_70 [1] : vector<2x8xf32> to vector<2xf32>
    %134 = vector.shape_cast %133 : vector<2xf32> to vector<2x1xf32>
    %135 = vector.broadcast %134 : vector<2x1xf32> to vector<2x8xf32>
    %136 = arith.divf %132, %135 : vector<2x8xf32>
    %137 = vector.shape_cast %136 : vector<2x8xf32> to vector<2x8x1xf32>
    %138 = vector.broadcast %137 : vector<2x8x1xf32> to vector<2x8x32xf32>
    %139 = arith.mulf %138, %17 : vector<2x8x32xf32>
    %cst_71 = arith.constant dense<0.000000e+00> : vector<2x32xf32>
    %140 = vector.multi_reduction <add>, %139, %cst_71 [1] : vector<2x8x32xf32> to vector<2x32xf32>
    %c0_72 = arith.constant 0 : index
    %c0_73 = arith.constant 0 : index
    %c0_74 = arith.constant 0 : index
    %141 = vector.load %arg17[%c0_72, %c0_73, %c0_74] : memref<2x32x32xf32, #tpu.memory_space<vmem>>, vector<1x32x32xf32>
    %142 = vector.shape_cast %141 : vector<1x32x32xf32> to vector<32x32xf32>
    %cst_75 = arith.constant dense<0.000000e+00> : vector<2x32xf32>
    %143 = tpu.matmul %140, %142, %cst_75 {dimension_numbers = #tpu.dot_dimension_numbers<[1], [0], [0], [1], [0, 0, 1, 1], [], []>} : vector<2x32xf32>, vector<32x32xf32>, vector<2x32xf32> -> vector<2x32xf32>
    %c0_76 = arith.constant 0 : index
    %c0_77 = arith.constant 0 : index
    %c0_78 = arith.constant 0 : index
    %144 = vector.load %arg4[%c0_76, %c0_77, %c0_78] : memref<2x2x32xf32, #tpu.memory_space<vmem>>, vector<1x2x32xf32>
    %145 = vector.shape_cast %144 : vector<1x2x32xf32> to vector<2x32xf32>
    %c0_79 = arith.constant 0 : index
    %c0_80 = arith.constant 0 : index
    %c0_81 = arith.constant 0 : index
    %146 = vector.load %arg18[%c0_79, %c0_80, %c0_81] : memref<2x32x32xf32, #tpu.memory_space<vmem>>, vector<1x32x32xf32>
    %147 = vector.shape_cast %146 : vector<1x32x32xf32> to vector<32x32xf32>
    %cst_82 = arith.constant dense<0.000000e+00> : vector<2x32xf32>
    %148 = tpu.matmul %145, %147, %cst_82 {dimension_numbers = #tpu.dot_dimension_numbers<[1], [0], [0], [1], [0, 0, 1, 1], [], []>} : vector<2x32xf32>, vector<32x32xf32>, vector<2x32xf32> -> vector<2x32xf32>
    %149 = arith.addf %143, %148 : vector<2x32xf32>
    %c0_83 = arith.constant 0 : index
    %c0_84 = arith.constant 0 : index
    %150 = vector.load %arg19[%c0_83, %c0_84] : memref<2x32xf32, #tpu.memory_space<vmem>>, vector<1x32xf32>
    %151 = vector.shape_cast %150 : vector<1x32xf32> to vector<32xf32>
    %152 = vector.shape_cast %151 : vector<32xf32> to vector<1x32xf32>
    %153 = vector.broadcast %152 : vector<1x32xf32> to vector<2x32xf32>
    %154 = arith.addf %149, %153 : vector<2x32xf32>
    %c0_85 = arith.constant 0 : index
    %c0_86 = arith.constant 0 : index
    %c0_87 = arith.constant 0 : index
    %155 = vector.load %arg20[%c0_85, %c0_86, %c0_87] : memref<2x2x32xf32, #tpu.memory_space<vmem>>, vector<1x2x32xf32>
    %156 = vector.shape_cast %155 : vector<1x2x32xf32> to vector<2x32xf32>
    %157 = vector.shape_cast %154 : vector<2x32xf32> to vector<1x2x32xf32>
    tpu.vector_store %arg20[%c0_85, %c0_86, %c0_87], %157 {strides = array<i32>} : memref<2x2x32xf32, #tpu.memory_space<vmem>>, vector<1x2x32xf32>,
    %158 = arith.truncf %154 : vector<2x32xf32> to vector<2x32xbf16>
    "tpu.trace_start"() <{level = 10 : i32, message = "bh,vh->bv"}> : () -> ()
    %cst_88 = arith.constant dense<0.000000e+00> : vector<2x256xf32>
    %159 = tpu.matmul %158, %3, %cst_88 {dimension_numbers = #tpu.dot_dimension_numbers<[1], [1], [0], [0], [0, 0, 1, 0], [], []>} : vector<2x32xbf16>, vector<256x32xbf16>, vector<2x256xf32> -> vector<2x256xf32>
    "tpu.trace_stop"() : () -> ()
    %c0_89 = arith.constant 0 : index
    %c0_90 = arith.constant 0 : index
    %c0_91 = arith.constant 0 : index
    %160 = vector.load %arg21[%c0_89, %c0_90, %c0_91] : memref<2x2x256xf32, #tpu.memory_space<vmem>>, vector<1x2x256xf32>
    %161 = vector.shape_cast %160 : vector<1x2x256xf32> to vector<2x256xf32>
    %162 = vector.shape_cast %159 : vector<2x256xf32> to vector<1x2x256xf32>
    tpu.vector_store %arg21[%c0_89, %c0_90, %c0_91], %162 {strides = array<i32>} : memref<2x2x256xf32, #tpu.memory_space<vmem>>, vector<1x2x256xf32>,
    %c1 = arith.constant 1 : index
    %c0_92 = arith.constant 0 : index
    %c0_93 = arith.constant 0 : index
    %c0_94 = arith.constant 0 : index
    %163 = vector.load %arg0[%c1, %c0_92, %c0_93, %c0_94] : memref<2x2x8x32xf32, #tpu.memory_space<vmem>>, vector<1x2x8x32xf32>
    %164 = vector.shape_cast %163 : vector<1x2x8x32xf32> to vector<2x8x32xf32>
    %165 = vector.broadcast %1 : vector<2x8x1xf32> to vector<2x8x32xf32>
    %166 = arith.mulf %164, %165 : vector<2x8x32xf32>
    %c1_95 = arith.constant 1 : index
    %c0_96 = arith.constant 0 : index
    %c0_97 = arith.constant 0 : index
    %c0_98 = arith.constant 0 : index
    %167 = vector.load %arg1[%c1_95, %c0_96, %c0_97, %c0_98] : memref<2x2x8x32xf32, #tpu.memory_space<vmem>>, vector<1x2x8x32xf32>
    %168 = vector.shape_cast %167 : vector<1x2x8x32xf32> to vector<2x8x32xf32>
    %169 = vector.broadcast %1 : vector<2x8x1xf32> to vector<2x8x32xf32>
    %170 = arith.mulf %168, %169 : vector<2x8x32xf32>
    %c1_99 = arith.constant 1 : index
    %c0_100 = arith.constant 0 : index
    %c0_101 = arith.constant 0 : index
    %171 = vector.load %arg7[%c1_99, %c0_100, %c0_101] : memref<2x32x96xf32, #tpu.memory_space<vmem>>, vector<1x32x96xf32>
    %172 = vector.shape_cast %171 : vector<1x32x96xf32> to vector<32x96xf32>
    "tpu.trace_start"() <{level = 10 : i32, message = "blh,hk->blk"}> : () -> ()
    %cst_102 = arith.constant dense<0.000000e+00> : vector<2x8x96xf32>
    %173 = tpu.matmul %166, %172, %cst_102 {dimension_numbers = #tpu.dot_dimension_numbers<[2], [0], [0, 1], [1], [0, 0, 0, 1, 1, 1], [], []>} : vector<2x8x32xf32>, vector<32x96xf32>, vector<2x8x96xf32> -> vector<2x8x96xf32>
    "tpu.trace_stop"() : () -> ()
    %174 = vector.extract_strided_slice %173 {offsets = [0, 0, 0], sizes = [2, 8, 32], strides = [1, 1, 1]} : vector<2x8x96xf32> to vector<2x8x32xf32>
    %175 = arith.addf %174, %2 : vector<2x8x32xf32>
    %176 = vector.extract_strided_slice %173 {offsets = [0, 0, 32], sizes = [2, 8, 32], strides = [1, 1, 1]} : vector<2x8x96xf32> to vector<2x8x32xf32>
    %177 = arith.addf %176, %2 : vector<2x8x32xf32>
    %178 = vector.extract_strided_slice %173 {offsets = [0, 0, 64], sizes = [2, 8, 32], strides = [1, 1, 1]} : vector<2x8x96xf32> to vector<2x8x32xf32>
    %179 = arith.addf %178, %2 : vector<2x8x32xf32>
    "tpu.trace_start"() <{level = 10 : i32, message = "blh,bmh->blm"}> : () -> ()
    %cst_103 = arith.constant dense<0.000000e+00> : vector<2x8x8xf32>
    %180 = tpu.matmul %175, %177, %cst_103 {dimension_numbers = #tpu.dot_dimension_numbers<[2], [2], [1], [1], [0, 0, 0, 1, 1, 1], [0], [0]>} : vector<2x8x32xf32>, vector<2x8x32xf32>, vector<2x8x8xf32> -> vector<2x8x8xf32>
    "tpu.trace_stop"() : () -> ()
    %cst_104 = arith.constant 0.176776692 : f32
    %181 = vector.broadcast %cst_104 : f32 to vector<2x8x8xf32>
    %182 = arith.mulf %180, %181 : vector<2x8x8xf32>
    %cst_105 = arith.constant -9.99999995E+11 : f32
    %183 = vector.broadcast %cst_105 : f32 to vector<2x8x8xf32>
    %184 = arith.select %13, %182, %183 : vector<2x8x8xi1>, vector<2x8x8xf32>
    %cst_106 = arith.constant dense<0xFF800000> : vector<2x8xf32>
    %185 = vector.multi_reduction <maximumf>, %184, %cst_106 [2] : vector<2x8x8xf32> to vector<2x8xf32>
    %186 = vector.shape_cast %185 : vector<2x8xf32> to vector<2x8x1xf32>
    %187 = vector.broadcast %186 : vector<2x8x1xf32> to vector<2x8x8xf32>
    %188 = arith.subf %184, %187 : vector<2x8x8xf32>
    %189 = math.exp %188 : vector<2x8x8xf32>
    %cst_107 = arith.constant dense<0.000000e+00> : vector<2x8xf32>
    %190 = vector.multi_reduction <add>, %189, %cst_107 [2] : vector<2x8x8xf32> to vector<2x8xf32>
    %191 = vector.shape_cast %190 : vector<2x8xf32> to vector<2x8x1xf32>
    %192 = vector.broadcast %191 : vector<2x8x1xf32> to vector<2x8x8xf32>
    %193 = arith.divf %189, %192 : vector<2x8x8xf32>
    "tpu.trace_start"() <{level = 10 : i32, message = "blm,bmh->blh"}> : () -> ()
    %cst_108 = arith.constant dense<0.000000e+00> : vector<2x8x32xf32>
    %194 = tpu.matmul %193, %179, %cst_108 {dimension_numbers = #tpu.dot_dimension_numbers<[2], [1], [1], [2], [0, 0, 0, 1, 1, 2], [0], [0]>} : vector<2x8x8xf32>, vector<2x8x32xf32>, vector<2x8x32xf32> -> vector<2x8x32xf32>
    "tpu.trace_stop"() : () -> ()
    %195 = vector.broadcast %1 : vector<2x8x1xf32> to vector<2x8x32xf32>
    %196 = arith.mulf %194, %195 : vector<2x8x32xf32>
    %c1_109 = arith.constant 1 : index
    %c0_110 = arith.constant 0 : index
    %c0_111 = arith.constant 0 : index
    %197 = vector.load %arg9[%c1_109, %c0_110, %c0_111] : memref<2x32x32xf32, #tpu.memory_space<vmem>>, vector<1x32x32xf32>
    %198 = vector.shape_cast %197 : vector<1x32x32xf32> to vector<32x32xf32>
    "tpu.trace_start"() <{level = 10 : i32, message = "blh,hk->blk"}> : () -> ()
    %cst_112 = arith.constant dense<0.000000e+00> : vector<2x8x32xf32>
    %199 = tpu.matmul %196, %198, %cst_112 {dimension_numbers = #tpu.dot_dimension_numbers<[2], [0], [0, 1], [1], [0, 0, 0, 1, 1, 1], [], []>} : vector<2x8x32xf32>, vector<32x32xf32>, vector<2x8x32xf32> -> vector<2x8x32xf32>
    "tpu.trace_stop"() : () -> ()
    %c1_113 = arith.constant 1 : index
    %c0_114 = arith.constant 0 : index
    %200 = vector.load %arg10[%c1_113, %c0_114] : memref<2x32xf32, #tpu.memory_space<vmem>>, vector<1x32xf32>
    %201 = vector.shape_cast %200 : vector<1x32xf32> to vector<32xf32>
    %202 = vector.shape_cast %201 : vector<32xf32> to vector<1x1x32xf32>
    %203 = vector.broadcast %202 : vector<1x1x32xf32> to vector<2x8x32xf32>
    %204 = arith.addf %199, %203 : vector<2x8x32xf32>
    %c1_115 = arith.constant 1 : index
    %c0_116 = arith.constant 0 : index
    %c0_117 = arith.constant 0 : index
    %205 = vector.load %arg8[%c1_115, %c0_116, %c0_117] : memref<2x32x64xf32, #tpu.memory_space<vmem>>, vector<1x32x64xf32>
    %206 = vector.shape_cast %205 : vector<1x32x64xf32> to vector<32x64xf32>
    "tpu.trace_start"() <{level = 10 : i32, message = "blh,hk->blk"}> : () -> ()
    %cst_118 = arith.constant dense<0.000000e+00> : vector<2x8x64xf32>
    %207 = tpu.matmul %170, %206, %cst_118 {dimension_numbers = #tpu.dot_dimension_numbers<[2], [0], [0, 1], [1], [0, 0, 0, 1, 1, 1], [], []>} : vector<2x8x32xf32>, vector<32x64xf32>, vector<2x8x64xf32> -> vector<2x8x64xf32>
    "tpu.trace_stop"() : () -> ()
    %208 = vector.extract_strided_slice %207 {offsets = [0, 0, 0], sizes = [2, 8, 32], strides = [1, 1, 1]} : vector<2x8x64xf32> to vector<2x8x32xf32>
    %209 = vector.extract_strided_slice %207 {offsets = [0, 0, 32], sizes = [2, 8, 32], strides = [1, 1, 1]} : vector<2x8x64xf32> to vector<2x8x32xf32>
    %c1_119 = arith.constant 1 : index
    %c0_120 = arith.constant 0 : index
    %c0_121 = arith.constant 0 : index
    %210 = vector.load %arg13[%c1_119, %c0_120, %c0_121] : memref<2x32x4xf32, #tpu.memory_space<vmem>>, vector<1x32x4xf32>
    %211 = vector.shape_cast %210 : vector<1x32x4xf32> to vector<32x4xf32>
    "tpu.trace_start"() <{level = 10 : i32, message = "blh,hm->blm"}> : () -> ()
    %cst_122 = arith.constant dense<0.000000e+00> : vector<2x8x4xf32>
    %212 = tpu.matmul %175, %211, %cst_122 {dimension_numbers = #tpu.dot_dimension_numbers<[2], [0], [0, 1], [1], [0, 0, 0, 1, 1, 1], [], []>} : vector<2x8x32xf32>, vector<32x4xf32>, vector<2x8x4xf32> -> vector<2x8x4xf32>
    "tpu.trace_stop"() : () -> ()
    %cst_123 = arith.constant 0.176776692 : f32
    %213 = vector.broadcast %cst_123 : f32 to vector<2x8x4xf32>
    %214 = arith.mulf %212, %213 : vector<2x8x4xf32>
    "tpu.trace_start"() <{level = 10 : i32, message = "blh,bmh->blm"}> : () -> ()
    %cst_124 = arith.constant dense<0.000000e+00> : vector<2x8x8xf32>
    %215 = tpu.matmul %175, %208, %cst_124 {dimension_numbers = #tpu.dot_dimension_numbers<[2], [2], [1], [1], [0, 0, 0, 1, 1, 1], [0], [0]>} : vector<2x8x32xf32>, vector<2x8x32xf32>, vector<2x8x8xf32> -> vector<2x8x8xf32>
    "tpu.trace_stop"() : () -> ()
    %cst_125 = arith.constant 0.176776692 : f32
    %216 = vector.broadcast %cst_125 : f32 to vector<2x8x8xf32>
    %217 = arith.mulf %215, %216 : vector<2x8x8xf32>
    %cst_126 = arith.constant -9.99999995E+11 : f32
    %218 = vector.broadcast %cst_126 : f32 to vector<2x8x8xf32>
    %219 = arith.select %13, %217, %218 : vector<2x8x8xi1>, vector<2x8x8xf32>
    %cst_127 = arith.constant dense<0xFF800000> : vector<2x8xf32>
    %220 = vector.multi_reduction <maximumf>, %214, %cst_127 [2] : vector<2x8x4xf32> to vector<2x8xf32>
    %221 = vector.shape_cast %220 : vector<2x8xf32> to vector<2x8x1xf32>
    %cst_128 = arith.constant dense<0xFF800000> : vector<2x8xf32>
    %222 = vector.multi_reduction <maximumf>, %219, %cst_128 [2] : vector<2x8x8xf32> to vector<2x8xf32>
    %223 = vector.shape_cast %222 : vector<2x8xf32> to vector<2x8x1xf32>
    %224 = arith.maximumf %221, %223 : vector<2x8x1xf32>
    %225 = vector.broadcast %224 : vector<2x8x1xf32> to vector<2x8x4xf32>
    %226 = arith.subf %214, %225 : vector<2x8x4xf32>
    %227 = math.exp %226 : vector<2x8x4xf32>
    %228 = vector.broadcast %224 : vector<2x8x1xf32> to vector<2x8x8xf32>
    %229 = arith.subf %219, %228 : vector<2x8x8xf32>
    %230 = math.exp %229 : vector<2x8x8xf32>
    %cst_129 = arith.constant dense<0.000000e+00> : vector<2x8xf32>
    %231 = vector.multi_reduction <add>, %227, %cst_129 [2] : vector<2x8x4xf32> to vector<2x8xf32>
    %232 = vector.shape_cast %231 : vector<2x8xf32> to vector<2x8x1xf32>
    %cst_130 = arith.constant dense<0.000000e+00> : vector<2x8xf32>
    %233 = vector.multi_reduction <add>, %230, %cst_130 [2] : vector<2x8x8xf32> to vector<2x8xf32>
    %234 = vector.shape_cast %233 : vector<2x8xf32> to vector<2x8x1xf32>
    %235 = arith.addf %232, %234 : vector<2x8x1xf32>
    %c1_131 = arith.constant 1 : index
    %c0_132 = arith.constant 0 : index
    %c0_133 = arith.constant 0 : index
    %236 = vector.load %arg14[%c1_131, %c0_132, %c0_133] : memref<2x4x32xf32, #tpu.memory_space<vmem>>, vector<1x4x32xf32>
    %237 = vector.shape_cast %236 : vector<1x4x32xf32> to vector<4x32xf32>
    "tpu.trace_start"() <{level = 10 : i32, message = "blm,mh->blh"}> : () -> ()
    %cst_134 = arith.constant dense<0.000000e+00> : vector<2x8x32xf32>
    %238 = tpu.matmul %227, %237, %cst_134 {dimension_numbers = #tpu.dot_dimension_numbers<[2], [0], [0, 1], [1], [0, 0, 0, 1, 1, 1], [], []>} : vector<2x8x4xf32>, vector<4x32xf32>, vector<2x8x32xf32> -> vector<2x8x32xf32>
    "tpu.trace_stop"() : () -> ()
    "tpu.trace_start"() <{level = 10 : i32, message = "blm,bmh->blh"}> : () -> ()
    %cst_135 = arith.constant dense<0.000000e+00> : vector<2x8x32xf32>
    %239 = tpu.matmul %230, %209, %cst_135 {dimension_numbers = #tpu.dot_dimension_numbers<[2], [1], [1], [2], [0, 0, 0, 1, 1, 2], [0], [0]>} : vector<2x8x8xf32>, vector<2x8x32xf32>, vector<2x8x32xf32> -> vector<2x8x32xf32>
    "tpu.trace_stop"() : () -> ()
    %240 = arith.addf %238, %239 : vector<2x8x32xf32>
    %241 = vector.broadcast %235 : vector<2x8x1xf32> to vector<2x8x32xf32>
    %242 = arith.divf %240, %241 : vector<2x8x32xf32>
    %243 = vector.broadcast %1 : vector<2x8x1xf32> to vector<2x8x32xf32>
    %244 = arith.mulf %242, %243 : vector<2x8x32xf32>
    %c1_136 = arith.constant 1 : index
    %c0_137 = arith.constant 0 : index
    %c0_138 = arith.constant 0 : index
    %245 = vector.load %arg11[%c1_136, %c0_137, %c0_138] : memref<2x32x32xf32, #tpu.memory_space<vmem>>, vector<1x32x32xf32>
    %246 = vector.shape_cast %245 : vector<1x32x32xf32> to vector<32x32xf32>
    "tpu.trace_start"() <{level = 10 : i32, message = "blh,hk->blk"}> : () -> ()
    %cst_139 = arith.constant dense<0.000000e+00> : vector<2x8x32xf32>
    %247 = tpu.matmul %244, %246, %cst_139 {dimension_numbers = #tpu.dot_dimension_numbers<[2], [0], [0, 1], [1], [0, 0, 0, 1, 1, 1], [], []>} : vector<2x8x32xf32>, vector<32x32xf32>, vector<2x8x32xf32> -> vector<2x8x32xf32>
    "tpu.trace_stop"() : () -> ()
    %c1_140 = arith.constant 1 : index
    %c0_141 = arith.constant 0 : index
    %248 = vector.load %arg12[%c1_140, %c0_141] : memref<2x32xf32, #tpu.memory_space<vmem>>, vector<1x32xf32>
    %249 = vector.shape_cast %248 : vector<1x32xf32> to vector<32xf32>
    %250 = vector.shape_cast %249 : vector<32xf32> to vector<1x1x32xf32>
    %251 = vector.broadcast %250 : vector<1x1x32xf32> to vector<2x8x32xf32>
    %252 = arith.addf %247, %251 : vector<2x8x32xf32>
    %253 = arith.addf %204, %252 : vector<2x8x32xf32>
    %cst_142 = arith.constant 0.000000e+00 : f32
    %254 = vector.broadcast %cst_142 : f32 to vector<2x8x32xf32>
    %255 = arith.maximumf %253, %254 : vector<2x8x32xf32>
    %c1_143 = arith.constant 1 : index
    %c0_144 = arith.constant 0 : index
    %256 = vector.load %arg15[%c1_143, %c0_144] : memref<2x32xf32, #tpu.memory_space<vmem>>, vector<1x32xf32>
    %257 = vector.shape_cast %256 : vector<1x32xf32> to vector<32xf32>
    %258 = vector.shape_cast %257 : vector<32xf32> to vector<1x1x32xf32>
    %259 = vector.broadcast %258 : vector<1x1x32xf32> to vector<2x8x32xf32>
    %260 = arith.mulf %255, %259 : vector<2x8x32xf32>
    %cst_145 = arith.constant dense<0.000000e+00> : vector<2x8xf32>
    %261 = vector.multi_reduction <add>, %260, %cst_145 [2] : vector<2x8x32xf32> to vector<2x8xf32>
    %c1_146 = arith.constant 1 : index
    %c0_147 = arith.constant 0 : index
    %c0_148 = arith.constant 0 : index
    %262 = vector.load %arg3[%c1_146, %c0_147, %c0_148] : memref<2x2x32xf32, #tpu.memory_space<vmem>>, vector<1x2x32xf32>
    %263 = vector.shape_cast %262 : vector<1x2x32xf32> to vector<2x32xf32>
    %c1_149 = arith.constant 1 : index
    %c0_150 = arith.constant 0 : index
    %264 = vector.load %arg16[%c1_149, %c0_150] : memref<2x32xf32, #tpu.memory_space<vmem>>, vector<1x32xf32>
    %265 = vector.shape_cast %264 : vector<1x32xf32> to vector<32xf32>
    %266 = vector.shape_cast %265 : vector<32xf32> to vector<1x32xf32>
    %267 = vector.broadcast %266 : vector<1x32xf32> to vector<2x32xf32>
    %268 = arith.mulf %263, %267 : vector<2x32xf32>
    %cst_151 = arith.constant dense<0.000000e+00> : vector<2xf32>
    %269 = vector.multi_reduction <add>, %268, %cst_151 [1] : vector<2x32xf32> to vector<2xf32>
    %270 = vector.shape_cast %269 : vector<2xf32> to vector<2x1xf32>
    %271 = vector.broadcast %270 : vector<2x1xf32> to vector<2x8xf32>
    %272 = arith.addf %261, %271 : vector<2x8xf32>
    %cst_152 = arith.constant 0.000000e+00 : f32
    %273 = vector.broadcast %cst_152 : f32 to vector<2x8xf32>
    %274 = arith.cmpf ogt, %0, %273 : vector<2x8xf32>
    %cst_153 = arith.constant -9.99999995E+11 : f32
    %275 = vector.broadcast %cst_153 : f32 to vector<2x8xf32>
    %276 = arith.select %274, %272, %275 : vector<2x8xi1>, vector<2x8xf32>
    %cst_154 = arith.constant dense<0xFF800000> : vector<2xf32>
    %277 = vector.multi_reduction <maximumf>, %276, %cst_154 [1] : vector<2x8xf32> to vector<2xf32>
    %278 = vector.shape_cast %277 : vector<2xf32> to vector<2x1xf32>
    %279 = vector.broadcast %278 : vector<2x1xf32> to vector<2x8xf32>
    %280 = arith.subf %276, %279 : vector<2x8xf32>
    %281 = math.exp %280 : vector<2x8xf32>
    %cst_155 = arith.constant dense<0.000000e+00> : vector<2xf32>
    %282 = vector.multi_reduction <add>, %281, %cst_155 [1] : vector<2x8xf32> to vector<2xf32>
    %283 = vector.shape_cast %282 : vector<2xf32> to vector<2x1xf32>
    %284 = vector.broadcast %283 : vector<2x1xf32> to vector<2x8xf32>
    %285 = arith.divf %281, %284 : vector<2x8xf32>
    %286 = vector.shape_cast %285 : vector<2x8xf32> to vector<2x8x1xf32>
    %287 = vector.broadcast %286 : vector<2x8x1xf32> to vector<2x8x32xf32>
    %288 = arith.mulf %287, %166 : vector<2x8x32xf32>
    %cst_156 = arith.constant dense<0.000000e+00> : vector<2x32xf32>
    %289 = vector.multi_reduction <add>, %288, %cst_156 [1] : vector<2x8x32xf32> to vector<2x32xf32>
    %c1_157 = arith.constant 1 : index
    %c0_158 = arith.constant 0 : index
    %c0_159 = arith.constant 0 : index
    %290 = vector.load %arg17[%c1_157, %c0_158, %c0_159] : memref<2x32x32xf32, #tpu.memory_space<vmem>>, vector<1x32x32xf32>
    %291 = vector.shape_cast %290 : vector<1x32x32xf32> to vector<32x32xf32>
    %cst_160 = arith.constant dense<0.000000e+00> : vector<2x32xf32>
    %292 = tpu.matmul %289, %291, %cst_160 {dimension_numbers = #tpu.dot_dimension_numbers<[1], [0], [0], [1], [0, 0, 1, 1], [], []>} : vector<2x32xf32>, vector<32x32xf32>, vector<2x32xf32> -> vector<2x32xf32>
    %c1_161 = arith.constant 1 : index
    %c0_162 = arith.constant 0 : index
    %c0_163 = arith.constant 0 : index
    %293 = vector.load %arg4[%c1_161, %c0_162, %c0_163] : memref<2x2x32xf32, #tpu.memory_space<vmem>>, vector<1x2x32xf32>
    %294 = vector.shape_cast %293 : vector<1x2x32xf32> to vector<2x32xf32>
    %c1_164 = arith.constant 1 : index
    %c0_165 = arith.constant 0 : index
    %c0_166 = arith.constant 0 : index
    %295 = vector.load %arg18[%c1_164, %c0_165, %c0_166] : memref<2x32x32xf32, #tpu.memory_space<vmem>>, vector<1x32x32xf32>
    %296 = vector.shape_cast %295 : vector<1x32x32xf32> to vector<32x32xf32>
    %cst_167 = arith.constant dense<0.000000e+00> : vector<2x32xf32>
    %297 = tpu.matmul %294, %296, %cst_167 {dimension_numbers = #tpu.dot_dimension_numbers<[1], [0], [0], [1], [0, 0, 1, 1], [], []>} : vector<2x32xf32>, vector<32x32xf32>, vector<2x32xf32> -> vector<2x32xf32>
    %298 = arith.addf %292, %297 : vector<2x32xf32>
    %c1_168 = arith.constant 1 : index
    %c0_169 = arith.constant 0 : index
    %299 = vector.load %arg19[%c1_168, %c0_169] : memref<2x32xf32, #tpu.memory_space<vmem>>, vector<1x32xf32>
    %300 = vector.shape_cast %299 : vector<1x32xf32> to vector<32xf32>
    %301 = vector.shape_cast %300 : vector<32xf32> to vector<1x32xf32>
    %302 = vector.broadcast %301 : vector<1x32xf32> to vector<2x32xf32>
    %303 = arith.addf %298, %302 : vector<2x32xf32>
    %c1_170 = arith.constant 1 : index
    %c0_171 = arith.constant 0 : index
    %c0_172 = arith.constant 0 : index
    %304 = vector.load %arg20[%c1_170, %c0_171, %c0_172] : memref<2x2x32xf32, #tpu.memory_space<vmem>>, vector<1x2x32xf32>
    %305 = vector.shape_cast %304 : vector<1x2x32xf32> to vector<2x32xf32>
    %306 = vector.shape_cast %303 : vector<2x32xf32> to vector<1x2x32xf32>
    tpu.vector_store %arg20[%c1_170, %c0_171, %c0_172], %306 {strides = array<i32>} : memref<2x2x32xf32, #tpu.memory_space<vmem>>, vector<1x2x32xf32>,
    %307 = arith.truncf %303 : vector<2x32xf32> to vector<2x32xbf16>
    "tpu.trace_start"() <{level = 10 : i32, message = "bh,vh->bv"}> : () -> ()
    %cst_173 = arith.constant dense<0.000000e+00> : vector<2x256xf32>
    %308 = tpu.matmul %307, %3, %cst_173 {dimension_numbers = #tpu.dot_dimension_numbers<[1], [1], [0], [0], [0, 0, 1, 0], [], []>} : vector<2x32xbf16>, vector<256x32xbf16>, vector<2x256xf32> -> vector<2x256xf32>
    "tpu.trace_stop"() : () -> ()
    %c1_174 = arith.constant 1 : index
    %c0_175 = arith.constant 0 : index
    %c0_176 = arith.constant 0 : index
    %309 = vector.load %arg21[%c1_174, %c0_175, %c0_176] : memref<2x2x256xf32, #tpu.memory_space<vmem>>, vector<1x2x256xf32>
    %310 = vector.shape_cast %309 : vector<1x2x256xf32> to vector<2x256xf32>
    %311 = vector.shape_cast %308 : vector<2x256xf32> to vector<1x2x256xf32>
    tpu.vector_store %arg21[%c1_174, %c0_175, %c0_176], %311 {strides = array<i32>} : memref<2x2x256xf32, #tpu.memory_space<vmem>>, vector<1x2x256xf32>,
    return
  }
}

</mosaic_0001>

<bundles_post_ra>
// kernel: custom-call.14
= control target key start
LH: loop header
LB: loop body
LE: loop exit
PB: predicated region body
PF: predicated region fallthrough
CT: control target
= control target key end

     0   :  { %s6_s0 = inlined_call_operand.vmem [shape: bf16[8,2,2,32], index: 0, kind: output, shape index: {}]  }

// kernel: custom-call.6
= control target key start
LH: loop header
LB: loop body
LE: loop exit
PB: predicated region body
PF: predicated region fallthrough
CT: control target
= control target key end

     0   :  { %s6_s0 = inlined_call_operand.vmem [shape: f32[2,2,32], index: 0, kind: output, shape index: {}]  }

// kernel: custom-call.15
= control target key start
LH: loop header
LB: loop body
LE: loop exit
PB: predicated region body
PF: predicated region fallthrough
CT: control target
= control target key end

     0   :  { %s6_s0 = inlined_call_operand.vmem [shape: f32[8,2,2,32], index: 0, kind: output, shape index: {}]  }

// kernel: session_graph_forward.2
= control target key start
LH: loop header
LB: loop body
LE: loop exit
PB: predicated region body
PF: predicated region fallthrough
CT: control target
= control target key end

     0   :  { %vm53_vm0 = vcmask 261120   ;;  %v4743_v15 = vmov 0.0   ;;  %vm4744_vm1 = vmmov 0   ;;  %vm264_vm2 = vcmask 64512   ;;  %s4746_s16 = smov 112   ;;  %s4747_s17 = smov 32   ;;  %s5598_s4 = inlined_call_operand.vmem [shape: f32[32,64], index: 4, kind: input, shape index: {}]   ;;  %s5599_s2 = inlined_call_operand.vmem [shape: f32[2,8,32], index: 2, kind: input, shape index: {}, may-alias: {2,3}]   ;;  %s5600_s5 = inlined_call_operand.vmem [shape: f32[32,64], index: 5, kind: input, shape index: {}]   ;;  %s5601_s3 = inlined_call_operand.vmem [shape: f32[2,8,32], index: 3, kind: input, shape index: {}, may-alias: {2,3}]   ;;  %s5602_s1 = inlined_call_operand.vmem [shape: f32[2,8,8], index: 1, kind: input, shape index: {}]   ;;  %s5603_s0 = inlined_call_operand.vmem [shape: f32[2,8,8], index: 0, kind: input, shape index: {}]   ;;  %s5604_s6 = inlined_call_operand.vmem [shape: f32[4,16], index: 6, kind: input, shape index: {}]   ;;  %s5605_s7 = inlined_call_operand.vmem [shape: f32[4,16], index: 7, kind: input, shape index: {}]   ;;  %s5606_s8 = inlined_call_operand.vmem [shape: f32[4,32,16], index: 8, kind: input, shape index: {}]   ;;  %s5607_s9 = inlined_call_operand.vmem [shape: f32[4,32,16], index: 9, kind: input, shape index: {}]   ;;  %s5608_s10 = inlined_call_operand.vmem [shape: f32[4,16], index: 10, kind: input, shape index: {}]   ;;  %s5609_s11 = inlined_call_operand.vmem [shape: f32[4,16], index: 11, kind: input, shape index: {}]   ;;  %s5610_s12 = inlined_call_operand.vmem [shape: f32[2,2,8,32], index: 12, kind: output, shape index: {}]  }
   0x1   :  { %v49_v0 = vld [vmem:[%s5598_s4] sm:$0xff]  ;;  %v50_v1 = vld [vmem:[%s5598_s4 + $0x8] sm:$0xff]  ;;  %v51_v2 = vld [vmem:[%s5598_s4 + $0x10] sm:$0xff]  ;;  %v569_v21 = vlaneseq  ;;  %vm575_vm3 = vcmask 130048   ;;  %s4748_s18 = smov 96  }
   0x2   :  { %v4587_v3 = vpack.c.bf16 %v50_v1, %v49_v0  ;;  %v52_v4 = vld [vmem:[%s5598_s4 + $0x18] sm:$0xff]  ;;  %v4831_v5 = vld [vmem:[%s5599_s2] sm:$0xff]  ;;  %v136_v8 = vld [vmem:[%s5600_s5 + $0x8] sm:$0xff] }
   0x3   :  { %v4591_v6 = vpack.c.bf16 %v52_v4, %v51_v2  ;;  %4305 = vmatprep.mubr.msk.f32.mxu0 %vm53_vm0, %v4831_v5  ;;  %v135_v7 = vld [vmem:[%s5600_s5] sm:$0xff]  ;;  %v137_v9 = vld [vmem:[%s5600_s5 + $0x10] sm:$0xff]  ;;  %v138_v11 = vld [vmem:[%s5600_s5 + $0x18] sm:$0xff]  ;;  %v4918_v22 = vshrl.u32 %v569_v21, 7 }
   0x4   :  { %4588 = vmatprep.subr.bf16.mxu0 %v4587_v3  ;;  %v4595_v10 = vpack.c.bf16 %v136_v8, %v135_v7  ;;  %v4850_v12 = vld [vmem:[%s5601_s3] sm:$0xff]  ;;  %v4599_v13 = vpack.c.bf16 %v138_v11, %v137_v9  ;;  %v4857_v14 = vld [vmem:[%s5599_s2 + $0x8] sm:$0xff] }
   0x5   :  { %4590 = vmatpush3.bf16.msra.mxu0 %v4587_v3  ;;  %4316 = vmatprep.mubr.msk.f32.mxu1 %vm53_vm0, %v4850_v12  ;;  %v4863_v16 = vld [vmem:[%s5602_s1] sm:$0xff]  ;;  %v4868_v17 = vld [vmem:[%s5601_s3 + $0x8] sm:$0xff]  ;;  %v4921_v23 = vsub.s32 0, %v4918_v22 }
   0x6   :  { %4592 = vmatprep.subr.bf16.mxu0 %v4591_v6  ;;  %4596 = vmatprep.subr.bf16.mxu1 %v4595_v10  ;;  %v4876_v18 = vld [vmem:[%s5603_s0] sm:$0xff]  ;;  %v4891_v19 = vld [vmem:[%s5603_s0 + $0x8] sm:$0xff]  ;;  %vm260_vm14 = vcmp.gt.f32.partialorder %v4863_v16, 0.0  ;;  %s4749_s0 = smov 48  }
   0x7   :  { %4598 = vmatpush3.bf16.msra.mxu1 %v4595_v10  ;;  %v4906_v20 = vld [vmem:[%s5602_s1 + $0x8] sm:$0xff]  ;;  %v4926_v24 = vld [vmem:[%s5604_s6] sm:$0xf]  ;;  %vm257_vm4 = vcmp.gt.f32.partialorder %v4891_v19, 0.0  ;;  %v5014_v10 = vsub.s32 1, %v4918_v22  ;;  %vm256_vm11 = vcmp.gt.f32.partialorder %v4876_v18, 0.0 }
   0x8   :  { %4600 = vmatprep.subr.bf16.mxu1 %v4599_v13  ;;  %v572_v25 = vrot.slane %v4926_v24, %v4921_v23  ;;  %v4965_v40 = vsel %vm257_vm4, 1.0, %v4891_v19  ;;  %v4977_v56 = vld [vmem:[%s5605_s7] sm:$0xf]  ;;  %vm261_vm7 = vcmp.gt.f32.partialorder %v4906_v20, 0.0  ;;  %s4745_s7 = smov 16   ;;  %s4750_s1 = smov 80  }
   0x9   :  { %4594 = vmatpush3.bf16.msra.mxu0 %v4591_v6  ;;  %vm735_vm6 = vcmp.gt.f32.partialorder %v4965_v40, 0.0  ;;  %v996_v59 = vrot.slane %v4977_v56, %v4921_v23  ;;  %v5007_v2 = vsel %vm261_vm7, 1.0, %v4906_v20  ;;  %v1419_v11 = vrot.slane %v4926_v24, %v5014_v10 }
   0xa   :  { %4329 = vmatprep.subr.mxu0 %v4743_v15  ;;  %vm1158_vm9 = vcmp.gt.f32.partialorder %v5007_v2, 0.0 }
   0xb   :  { %4602 = vmatpush3.bf16.msra.mxu1 %v4599_v13 }
   0xc   :  { %4306 = vmatmul.mubr.msk.f32.vlgmr.msra.gmra.mrb[0].mxu0 %vm53_vm0, %v4857_v14  ;;  %4319 = vmatprep.subr.mxu1 %v4743_v15 }
   0xd   :  { %4330 = vmatpush3.msra.mxu0 %v4863_v16  ;;  %4331 = vmatprep.mubr.msk.f32.mxu0 %vm4744_vm1, %v4743_v15 }
   0xe   :  { %4317 = vmatmul.mubr.msk.f32.vlgmr.msra.gmra.mrb[0].mxu1 %vm53_vm0, %v4868_v17  ;;  %4339 = vmatprep.subr.mxu0 %v4743_v15 }
   0xf   :  { %4320 = vmatpush3.msra.mxu1 %v4876_v18  ;;  %4321 = vmatprep.mubr.msk.f32.mxu1 %vm4744_vm1, %v4743_v15 }
  0x10   :  { %4324 = vmatprep.subr.mxu1 %v4743_v15  ;;  %4332 = vmatmul.mubr.msk.f32.vlgmr.msra.gmra.mrb[2].mxu0 %vm264_vm2, %v4863_v16 }
  0x11   :  { %4341 = vmatprep.mubr.msk.f32.mxu0 %vm4744_vm1, %v4743_v15 }
  0x12   :  { %4322 = vmatmul.mubr.msk.f32.vlgmr.msra.gmra.mrb[2].mxu1 %vm264_vm2, %v4876_v18 }
  0x13   :  { %4325 = vmatpush3.msra.mxu1 %v4891_v19  ;;  %4326 = vmatprep.mubr.msk.f32.mxu1 %vm4744_vm1, %v4743_v15 }
  0x14   :  { %4334 = vmatprep.subr.mxu1 %v4743_v15 }
  0x16   :  { %4327 = vmatmul.mubr.msk.f32.vlgmr.msra.gmra.mrb[4].mxu1 %vm264_vm2, %v4891_v19 }
  0x17   :  { %4335 = vmatpush3.msra.mxu1 %v4906_v20  ;;  %4336 = vmatprep.mubr.msk.f32.mxu1 %vm4744_vm1, %v4743_v15 }
  0x18   :  { %4344 = vmatprep.subr.mxu1 %v4743_v15 }
  0x1a   :  { %4337 = vmatmul.mubr.msk.f32.vlgmr.msra.gmra.mrb[6].mxu1 %vm264_vm2, %v4906_v20 }
  0x1b   :  { %4346 = vmatprep.mubr.msk.f32.mxu1 %vm4744_vm1, %v4743_v15 }
  0xdf   :  { %v4930_v26 = vpop.f32.mrb[0].mxu0 }
  0xe0   :  { %v4932_v27 = vpop.f32.mrb[1].mxu0  ;;  %4345 = vmatpush3.xpose.msk.msra.mxu1 %vm575_vm3, %v4930_v26  ;;  %v574_v28 = vmul.f32 %v4930_v26, %v572_v25 }
  0xe1   :  { %4340 = vmatpush3.xpose.msk.msra.mxu0 %vm575_vm3, %v4932_v27  ;;  %v573_v29 = vmul.f32 %v572_v25, %v4932_v27  ;;  %v4940_v30 = vpop.f32.mrb[0].mxu1  ;;  %4354 = vmatprep.subr.mxu1 %v4743_v15 }
  0xe2   :  { %v4943_v31 = vpop.f32.mrb[1].mxu1  ;;  %4349 = vmatprep.subr.mxu0 %v4743_v15  ;;  %v998_v61 = vmul.f32 %v4940_v30, %v996_v59 }
  0xe3   :  { %4347 = vmatmul.mubr.msk.f32.vlgmr.msra.gmra.mrb[8].mxu1 %vm575_vm3, %v574_v28  ;;  %v4947_v32 = vpop.f32.mrb[2].mxu0  ;;  %v997_v60 = vmul.f32 %v996_v59, %v4943_v31 }
  0xe4   :  { %4342 = vmatmul.mubr.msk.f32.vlgmr.msra.gmra.mrb[4].mxu0 %vm575_vm3, %v573_v29  ;;  %v4333_v33 = vpop.f32.mrb[3].mxu0  ;;  %4355 = vmatpush3.msra.mxu1 %v4857_v14 }
  0xe5   :  { %v4951_v34 = vpop.f32.mrb[2].mxu1  ;;  %4356 = vmatprep.mubr.msk.f32.mxu1 %vm4744_vm1, %v4743_v15  ;;  %4370 = vmatprep.subr.mxu1 %v4743_v15 }
  0xe6   :  { %v4323_v35 = vpop.f32.mrb[3].mxu1  ;;  %4350 = vmatpush3.msra.mxu0 %v4831_v5  ;;  %4351 = vmatprep.mubr.msk.f32.mxu0 %vm4744_vm1, %v4743_v15 }
  0xe9   :  { %v4959_v36 = vpop.f32.mrb[4].mxu1 }
  0xea   :  { %v4328_v37 = vpop.f32.mrb[5].mxu1 }
  0xed   :  { %v4961_v38 = vpop.f32.mrb[6].mxu1 }
  0xee   :  { %v4338_v39 = vpop.f32.mrb[7].mxu1 }
  0xef   :  { %v1850_v39 = vrot.slane %v4977_v56, %v5014_v10 }
 0x1b6   :  { %v724_v41 = vpop.f32.mrb[8].mxu1 }
 0x1b7   :  { %vm729_vm5 = vcmp.ge.f32.partialorder %v724_v41, 0.0  ;;  %v731_v42 = vmul.f32 0.2, %v724_v41  ;;  %v4967_v43 = vpop.f32.mrb[4].mxu0  ;;  %v4348_v44 = vpop.f32.mrb[9].mxu1 }
 0x1b8   :  { %v4343_v45 = vpop.f32.mrb[5].mxu0  ;;  %vm728_vm12 = vcmp.ge.f32.partialorder %v4967_v43, 0.0 }
 0x1b9   :  { %v733_v46 = vsel %vm729_vm5, %v724_v41, %v731_v42 }
 0x1ba   :  { %v737_v47 = vsel %vm735_vm6, %v733_v46, -1e+12 }
 0x1bb   :  { %v741_v48 = vsel %vm264_vm2, %v737_v47, -inf }
 0x1bc   :  { %742 = vmax.xlane.f32.xlu0 %v741_v48 }
 0x249   :  { %v743_v49 = vpop.xlane.xlu0 %742 }
 0x24a   :  { %v745_v50 = vsub.f32 %v737_v47, %v743_v49 }
 0x24c   :  { %v748_v51 = vmul.f32 1.442695, %v745_v50 }
 0x24e   :  { %4675 = vpow2.f32 %v748_v51 }
 0x258   :  { %v4676_v52 = vpop.eup %4675 }
 0x259   :  { %v753_v53 = vsel %vm264_vm2, %v4676_v52, 0.0 }
 0x25a   :  { %754 = vadd.xlane.f32.xlu0 %v753_v53 }
 0x2e7   :  { %v755_v54 = vpop.xlane.xlu0 %754 }
 0x2e8   :  { %4677 = vrcp.f32 %v755_v54 }
 0x2f2   :  { %v4678_v55 = vpop.eup %4677 }
 0x2f3   :  { %v759_v57 = vmul.f32 %v4678_v55, %v4676_v52 }
 0x2f5   :  { %v761_v58 = vmul.f32 %v759_v57, %v4965_v40 }
 0x2f7   :  { %4357 = vmatmul.mubr.msk.f32.vlgmr.msra.gmra.mrb[10].mxu1 %vm264_vm2, %v761_v58 }
 0x2f8   :  { %4371 = vmatpush3.xpose.msk.msra.mxu1 %vm575_vm3, %v4943_v31  ;;  %4372 = vmatprep.mubr.msk.f32.mxu1 %vm4744_vm1, %v4743_v15 }
 0x2f9   :  { %4375 = vmatprep.subr.mxu1 %v4743_v15 }
 0x2fb   :  { %4373 = vmatmul.mubr.msk.f32.vlgmr.msra.gmra.mrb[12].mxu1 %vm575_vm3, %v997_v60 }
 0x2fc   :  { %4376 = vmatpush3.xpose.msk.msra.mxu1 %vm575_vm3, %v4940_v30  ;;  %4377 = vmatprep.mubr.msk.f32.mxu1 %vm4744_vm1, %v4743_v15 }
 0x2fd   :  { %4385 = vmatprep.subr.mxu1 %v4743_v15 }
 0x2ff   :  { %4378 = vmatmul.mubr.msk.f32.vlgmr.msra.gmra.mrb[14].mxu1 %vm575_vm3, %v998_v61 }
 0x300   :  { %4386 = vmatpush3.msra.mxu1 %v4868_v17  ;;  %4387 = vmatprep.mubr.msk.f32.mxu1 %vm4744_vm1, %v4743_v15 }
 0x301   :  { %4401 = vmatprep.subr.mxu1 %v4743_v15 }
 0x3ca   :  { %v5001_v62 = vpop.f32.mrb[10].mxu1 }
 0x3cb   :  { %v4358_v63 = vpop.f32.mrb[11].mxu1 }
 0x3ce   :  { %v5004_v0 = vpop.f32.mrb[12].mxu1 }
 0x3cf   :  { %v4374_v1 = vpop.f32.mrb[13].mxu1  ;;  %vm1151_vm15 = vcmp.ge.f32.partialorder %v5004_v0, 0.0 }
 0x3d0   :  { %v5057_v1 = vsub.s32 2, %v4918_v22 }
 0x3d2   :  { %v1147_v3 = vpop.f32.mrb[14].mxu1 }
 0x3d3   :  { %vm1152_vm8 = vcmp.ge.f32.partialorder %v1147_v3, 0.0  ;;  %v1154_v4 = vmul.f32 0.2, %v1147_v3  ;;  %v4379_v6 = vpop.f32.mrb[15].mxu1 }
 0x3d4   :  { %v730_v6 = vmul.f32 0.2, %v4967_v43 }
 0x3d5   :  { %v1156_v7 = vsel %vm1152_vm8, %v1147_v3, %v1154_v4  ;;  %v2321_v4 = vrot.slane %v4926_v24, %v5057_v1 }
 0x3d6   :  { %v1160_v8 = vsel %vm1158_vm9, %v1156_v7, -1e+12  ;;  %v5068_v7 = vsel %vm256_vm11, 1.0, %v4876_v18 }
 0x3d7   :  { %v1164_v9 = vsel %vm264_vm2, %v1160_v8, -inf  ;;  %vm734_vm13 = vcmp.gt.f32.partialorder %v5068_v7, 0.0 }
 0x3d8   :  { %1165 = vmax.xlane.f32.xlu1 %v1164_v9 }
 0x3e9   :  { %1421 = vrot.lane.b32.xlu1 %v1419_v11, %s4745_s7 }
 0x465   :  { %v1166_v13 = vpop.xlane.xlu1 %1165 }
 0x466   :  { %v1168_v21 = vsub.f32 %v1160_v8, %v1166_v13  ;;  %v732_v8 = vsel %vm728_vm12, %v4967_v43, %v730_v6 }
 0x467   :  { %v5074_v9 = vsel %vm734_vm13, %v732_v8, -1e+12 }
 0x468   :  { %v1171_v25 = vmul.f32 1.442695, %v1168_v21  ;;  %v738_v11 = vsel %vm264_vm2, %v5074_v9, -inf }
 0x469   :  { %v1422_v28 = vpop.permute.xlu1 %1421 }
 0x46a   :  { %4679 = vpow2.f32 %v1171_v25  ;;  %v1424_v29 = vmul.f32 %v1422_v28, %v4932_v27  ;;  %v1425_v33 = vmul.f32 %v4930_v26, %v1422_v28 }
 0x46c   :  { %1427 = vrot.lane.b32.xlu1 %v1424_v29, %s4746_s16 }
 0x470   :  { %1508 = vrot.lane.b32.xlu1 %v4930_v26, %s4746_s16 }
 0x474   :  { %v4680_v35 = vpop.eup %4679  ;;  %1506 = vrot.lane.b32.xlu1 %v1425_v33, %s4746_s16 }
 0x475   :  { %v1176_v37 = vsel %vm264_vm2, %v4680_v35, 0.0 }
 0x476   :  { %1177 = vadd.xlane.f32.xlu0 %v1176_v37 }
 0x48c   :  { %1429 = vrot.lane.b32.xlu0 %v4932_v27, %s4746_s16 }
 0x490   :  { %1852 = vrot.lane.b32.xlu0 %v1850_v39, %s4745_s7 }
 0x4de   :  { %v1428_v44 = vpop.permute.xlu1 %1427 }
 0x4e2   :  { %v1509_v48 = vpop.permute.xlu1 %1508 }
 0x4e6   :  { %v1507_v49 = vpop.permute.xlu1 %1506 }
 0x503   :  { %v1178_v41 = vpop.xlane.xlu0 %1177 }
 0x504   :  { %4681 = vrcp.f32 %v1178_v41 }
 0x507   :  { %v1430_v47 = vpop.permute.xlu0 %1429 }
 0x50b   :  { %v1853_v61 = vpop.permute.xlu0 %1852 }
 0x50c   :  { %v1855_v63 = vmul.f32 %v1853_v61, %v4943_v31  ;;  %v1856_v3 = vmul.f32 %v4940_v30, %v1853_v61 }
 0x50e   :  { %v4682_v42 = vpop.eup %4681 }
 0x50f   :  { %v1182_v45 = vmul.f32 %v4682_v42, %v4680_v35  ;;  %v1153_v42 = vmul.f32 0.2, %v5004_v0 }
 0x511   :  { %v1184_v46 = vmul.f32 %v1182_v45, %v5007_v2 }
 0x513   :  { %4388 = vmatmul.mubr.msk.f32.vlgmr.msra.gmra.mrb[16].mxu1 %vm264_vm2, %v1184_v46  ;;  %v1155_v46 = vsel %vm1151_vm15, %v5004_v0, %v1153_v42 }
 0x514   :  { %4402 = vmatpush3.xpose.msk.msra.mxu1 %vm575_vm3, %v1430_v47  ;;  %4403 = vmatprep.mubr.msk.f32.mxu1 %vm4744_vm1, %v4743_v15 }
 0x515   :  { %4406 = vmatprep.subr.mxu1 %v4743_v15 }
 0x517   :  { %4404 = vmatmul.mubr.msk.f32.vlgmr.msra.gmra.mrb[18].mxu1 %vm575_vm3, %v1428_v44  ;;  %v5089_v44 = vsel %vm260_vm14, 1.0, %v4863_v16 }
 0x518   :  { %4407 = vmatpush3.xpose.msk.msra.mxu1 %vm575_vm3, %v1509_v48  ;;  %4408 = vmatprep.mubr.msk.f32.mxu1 %vm4744_vm1, %v4743_v15  ;;  %vm1157_vm4 = vcmp.gt.f32.partialorder %v5089_v44, 0.0 }
 0x519   :  { %4416 = vmatprep.subr.mxu1 %v4743_v15  ;;  %v1159_v47 = vsel %vm1157_vm4, %v1155_v46, -1e+12 }
 0x51b   :  { %4409 = vmatmul.mubr.msk.f32.vlgmr.msra.gmra.mrb[20].mxu1 %vm575_vm3, %v1507_v49  ;;  %v1161_v49 = vsel %vm264_vm2, %v1159_v47, -inf }
 0x51c   :  { %4417 = vmatpush3.msra.mxu1 %v4857_v14  ;;  %4418 = vmatprep.mubr.msk.f32.mxu1 %vm4744_vm1, %v4743_v15 }
 0x51d   :  { %4432 = vmatprep.subr.mxu1 %v4743_v15 }
 0x5e6   :  { %v5047_v50 = vpop.f32.mrb[16].mxu1 }
 0x5e7   :  { %v4389_v51 = vpop.f32.mrb[17].mxu1 }
 0x5ea   :  { %v1501_v52 = vpop.f32.mrb[18].mxu1 }
 0x5eb   :  { %v4405_v53 = vpop.f32.mrb[19].mxu1  ;;  %v1586_v45 = vmul.f32 0.2, %v1501_v52  ;;  %vm1584_vm5 = vcmp.ge.f32.partialorder %v1501_v52, 0.0 }
 0x5ed   :  { %v1588_v48 = vsel %vm1584_vm5, %v1501_v52, %v1586_v45 }
 0x5ee   :  { %v1580_v54 = vpop.f32.mrb[20].mxu1  ;;  %v5098_v51 = vsel %vm734_vm13, %v1588_v48, -1e+12 }
 0x5ef   :  { %vm1585_vm10 = vcmp.ge.f32.partialorder %v1580_v54, 0.0  ;;  %v1587_v55 = vmul.f32 0.2, %v1580_v54  ;;  %v4410_v57 = vpop.f32.mrb[21].mxu1  ;;  %v1592_v53 = vsel %vm264_vm2, %v5098_v51, -inf }
 0x5f1   :  { %v1589_v58 = vsel %vm1585_vm10, %v1580_v54, %v1587_v55 }
 0x5f2   :  { %v1591_v59 = vsel %vm735_vm6, %v1589_v58, -1e+12 }
 0x5f3   :  { %v1595_v60 = vsel %vm264_vm2, %v1591_v59, -inf }
 0x5f4   :  { %1596 = vmax.xlane.f32.xlu1 %v1595_v60 }
 0x605   :  { %1858 = vrot.lane.b32.xlu1 %v1855_v63, %s4746_s16 }
 0x609   :  { %1939 = vrot.lane.b32.xlu1 %v4940_v30, %s4746_s16 }
 0x60d   :  { %1937 = vrot.lane.b32.xlu1 %v1856_v3, %s4746_s16 }
 0x611   :  { %2323 = vrot.lane.b32.xlu1 %v2321_v4, %s4747_s17 }
 0x635   :  { %739 = vmax.xlane.f32.xlu1 %v738_v11 }
 0x681   :  { %v1597_v13 = vpop.xlane.xlu1 %1596 }
 0x682   :  { %v1599_v21 = vsub.f32 %v1591_v59, %v1597_v13 }
 0x684   :  { %v1602_v25 = vmul.f32 1.442695, %v1599_v21 }
 0x685   :  { %v1859_v28 = vpop.permute.xlu1 %1858 }
 0x686   :  { %4683 = vpow2.f32 %v1602_v25 }
 0x689   :  { %v1940_v29 = vpop.permute.xlu1 %1939 }
 0x68d   :  { %v1938_v33 = vpop.permute.xlu1 %1937 }
 0x690   :  { %v4684_v35 = vpop.eup %4683 }
 0x691   :  { %v2324_v37 = vpop.permute.xlu1 %2323  ;;  %v1607_v43 = vsel %vm264_vm2, %v4684_v35, 0.0 }
 0x692   :  { %v2326_v39 = vmul.f32 %v2324_v37, %v4932_v27  ;;  %1608 = vadd.xlane.f32.xlu0 %v1607_v43  ;;  %v2327_v41 = vmul.f32 %v4930_v26, %v2324_v37 }
 0x694   :  { %2329 = vrot.lane.b32.xlu1 %v2326_v39, %s4748_s18 }
 0x698   :  { %2408 = vrot.lane.b32.xlu1 %v2327_v41, %s4748_s18 }
 0x6a8   :  { %1860 = vrot.lane.b32.xlu0 %v4943_v31, %s4746_s16 }
 0x6bc   :  { %1162 = vmax.xlane.f32.xlu1 %v1161_v49 }
 0x6c0   :  { %1593 = vmax.xlane.f32.xlu1 %v1592_v53 }
 0x6d1   :  { %2764 = vrot.lane.b32.xlu1 %v4943_v31, %s4748_s18 }
 0x71f   :  { %v1609_v0 = vpop.xlane.xlu0 %1608 }
 0x720   :  { %4685 = vrcp.f32 %v1609_v0 }
 0x723   :  { %v1861_v57 = vpop.permute.xlu0 %1860 }
 0x72a   :  { %v4686_v54 = vpop.eup %4685 }
 0x72b   :  { %v1613_v55 = vmul.f32 %v4686_v54, %v4684_v35 }
 0x72d   :  { %v1615_v52 = vmul.f32 %v1613_v55, %v4965_v40 }
 0x72f   :  { %4419 = vmatmul.mubr.msk.f32.vlgmr.msra.gmra.mrb[22].mxu1 %vm264_vm2, %v1615_v52 }
 0x730   :  { %4433 = vmatpush3.xpose.msk.msra.mxu1 %vm575_vm3, %v1861_v57  ;;  %4434 = vmatprep.mubr.msk.f32.mxu1 %vm4744_vm1, %v4743_v15 }
 0x731   :  { %4437 = vmatprep.subr.mxu1 %v4743_v15 }
 0x733   :  { %4435 = vmatmul.mubr.msk.f32.vlgmr.msra.gmra.mrb[24].mxu1 %vm575_vm3, %v1859_v28 }
 0x734   :  { %4438 = vmatpush3.xpose.msk.msra.mxu1 %vm575_vm3, %v1940_v29  ;;  %4439 = vmatprep.mubr.msk.f32.mxu1 %vm4744_vm1, %v4743_v15  ;;  %v740_v29 = vpop.xlane.xlu1 %739 }
 0x735   :  { %4447 = vmatprep.subr.mxu1 %v4743_v15  ;;  %v744_v37 = vsub.f32 %v5074_v9, %v740_v29 }
 0x737   :  { %4440 = vmatmul.mubr.msk.f32.vlgmr.msra.gmra.mrb[26].mxu1 %vm575_vm3, %v1938_v33  ;;  %v746_v39 = vmul.f32 1.442695, %v744_v37 }
 0x738   :  { %4448 = vmatpush3.msra.mxu1 %v4868_v17  ;;  %4449 = vmatprep.mubr.msk.f32.mxu1 %vm4744_vm1, %v4743_v15  ;;  %v2330_v33 = vpop.permute.xlu1 %2329 }
 0x739   :  { %4463 = vmatprep.subr.mxu1 %v4743_v15 }
 0x73c   :  { %v2409_v35 = vpop.permute.xlu1 %2408 }
 0x749   :  { %v1163_v43 = vpop.xlane.xlu1 %1162 }
 0x74a   :  { %v1167_v41 = vsub.f32 %v1159_v47, %v1163_v43 }
 0x74c   :  { %v1169_v42 = vmul.f32 1.442695, %v1167_v41 }
 0x802   :  { %v5120_v40 = vpop.f32.mrb[22].mxu1 }
 0x803   :  { %v4420_v58 = vpop.f32.mrb[23].mxu1 }
 0x806   :  { %v5122_v59 = vpop.f32.mrb[24].mxu1 }
 0x807   :  { %v4436_v60 = vpop.f32.mrb[25].mxu1  ;;  %vm2015_vm10 = vcmp.ge.f32.partialorder %v5122_v59, 0.0 }
 0x808   :  { %v222_v60 = vld [vmem:[%s5606_s8] sm:$0xff] }
 0x80a   :  { %v2011_v61 = vpop.f32.mrb[26].mxu1 }
 0x80b   :  { %vm2016_vm6 = vcmp.ge.f32.partialorder %v2011_v61, 0.0  ;;  %v2018_v63 = vmul.f32 0.2, %v2011_v61  ;;  %v4441_v3 = vpop.f32.mrb[27].mxu1 }
 0x80c   :  { %v225_v3 = vld [vmem:[%s5606_s8 + $0x18] sm:$0xff] }
 0x80d   :  { %v2020_v4 = vsel %vm2016_vm6, %v2011_v61, %v2018_v63  ;;  %v224_v61 = vld [vmem:[%s5606_s8 + $0x10] sm:$0xff] }
 0x80e   :  { %v2022_v6 = vsel %vm1158_vm9, %v2020_v4, -1e+12  ;;  %v4607_v4 = vpack.c.bf16 %v225_v3, %v224_v61 }
 0x80f   :  { %v2026_v8 = vsel %vm264_vm2, %v2022_v6, -inf }
 0x810   :  { %2027 = vmax.xlane.f32.xlu0 %v2026_v8  ;;  %v558_v8 = vadd.f32 %v4959_v36, %v4891_v19  ;;  %v2754_v19 = vrot.slane %v4977_v56, %v5057_v1 }
 0x812   :  { %vm562_vm7 = vcmp.gt.f32.partialorder %v558_v8, 0.0 }
 0x89d   :  { %v2028_v11 = vpop.xlane.xlu0 %2027 }
 0x89e   :  { %v2030_v13 = vsub.f32 %v2022_v6, %v2028_v11 }
 0x8a0   :  { %v2033_v21 = vmul.f32 1.442695, %v2030_v13 }
 0x8a2   :  { %4687 = vpow2.f32 %v2033_v21 }
 0x8a3   :  { %4689 = vpow2.f32 %v746_v39 }
 0x8a4   :  { %4691 = vpow2.f32 %v1169_v42 }
 0x8ac   :  { %v4688_v25 = vpop.eup %4687 }
 0x8ad   :  { %v2038_v28 = vsel %vm264_vm2, %v4688_v25, 0.0  ;;  %v4690_v45 = vpop.eup %4689 }
 0x8ae   :  { %2039 = vadd.xlane.f32.xlu0 %v2038_v28  ;;  %v750_v46 = vsel %vm264_vm2, %v4690_v45, 0.0  ;;  %v4692_v48 = vpop.eup %4691 }
 0x8af   :  { %v1173_v49 = vsel %vm264_vm2, %v4692_v48, 0.0 }
 0x8c4   :  { %2331 = vrot.lane.b32.xlu0 %v4932_v27, %s4748_s18 }
 0x8c8   :  { %2410 = vrot.lane.b32.xlu0 %v4930_v26, %s4748_s18 }
 0x8e7   :  { %751 = vadd.xlane.f32.xlu0 %v750_v46 }
 0x8eb   :  { %1174 = vadd.xlane.f32.xlu0 %v1173_v49  ;;  %v239_v49 = vld [vmem:[%s5607_s9 + $0x8] sm:$0xff] }
 0x93b   :  { %v2040_v53 = vpop.xlane.xlu0 %2039 }
 0x93c   :  { %4693 = vrcp.f32 %v2040_v53 }
 0x93f   :  { %v2332_v55 = vpop.permute.xlu0 %2331 }
 0x943   :  { %v2411_v47 = vpop.permute.xlu0 %2410 }
 0x946   :  { %v4694_v0 = vpop.eup %4693 }
 0x947   :  { %v2044_v54 = vmul.f32 %v4694_v0, %v4688_v25  ;;  %v5172_v25 = vsel %vm562_vm7, 1.0, %v558_v8  ;;  %v241_v0 = vld [vmem:[%s5607_s9 + $0x18] sm:$0xff] }
 0x948   :  { %vm2493_vm9 = vcmp.gt.f32.partialorder %v5172_v25, 0.0 }
 0x949   :  { %v2046_v9 = vmul.f32 %v2044_v54, %v5007_v2 }
 0x94b   :  { %4450 = vmatmul.mubr.msk.f32.vlgmr.msra.gmra.mrb[28].mxu1 %vm264_vm2, %v2046_v9 }
 0x94c   :  { %4464 = vmatpush3.xpose.msk.msra.mxu1 %vm575_vm3, %v2332_v55  ;;  %4465 = vmatprep.mubr.msk.f32.mxu1 %vm4744_vm1, %v4743_v15 }
 0x94d   :  { %4468 = vmatprep.subr.mxu1 %v4743_v15 }
 0x94f   :  { %4466 = vmatmul.mubr.msk.f32.vlgmr.msra.gmra.mrb[30].mxu1 %vm575_vm3, %v2330_v33 }
 0x950   :  { %4469 = vmatpush3.xpose.msk.msra.mxu1 %vm575_vm3, %v2411_v47  ;;  %4470 = vmatprep.mubr.msk.f32.mxu1 %vm4744_vm1, %v4743_v15 }
 0x951   :  { %4478 = vmatprep.subr.mxu1 %v4743_v15 }
 0x953   :  { %4471 = vmatmul.mubr.msk.f32.vlgmr.msra.gmra.mrb[32].mxu1 %vm575_vm3, %v2409_v35 }
 0x954   :  { %4479 = vmatpush3.msra.mxu1 %v4857_v14  ;;  %4480 = vmatprep.mubr.msk.f32.mxu1 %vm4744_vm1, %v4743_v15  ;;  %v223_v14 = vld [vmem:[%s5606_s8 + $0x8] sm:$0xff] }
 0x955   :  { %4494 = vmatprep.subr.mxu1 %v4743_v15  ;;  %v4603_v63 = vpack.c.bf16 %v223_v14, %v222_v60  ;;  %v2017_v14 = vmul.f32 0.2, %v5122_v59 }
 0x957   :  { %4604 = vmatprep.subr.bf16.mxu0 %v4603_v63  ;;  %v2019_v61 = vsel %vm2015_vm10, %v5122_v59, %v2017_v14 }
 0x974   :  { %v752_v2 = vpop.xlane.xlu0 %751 }
 0x975   :  { %4695 = vrcp.f32 %v752_v2 }
 0x978   :  { %v1175_v36 = vpop.xlane.xlu0 %1174 }
 0x979   :  { %4697 = vrcp.f32 %v1175_v36 }
 0x97f   :  { %v4696_v52 = vpop.eup %4695 }
 0x980   :  { %v757_v57 = vmul.f32 %v4696_v52, %v4690_v45 }
 0x982   :  { %v760_v58 = vmul.f32 %v757_v57, %v5068_v7 }
 0x983   :  { %v4698_v39 = vpop.eup %4697 }
 0x984   :  { %4352 = vmatmul.mubr.msk.f32.vlgmr.msra.gmra.mrb[6].mxu0 %vm264_vm2, %v760_v58  ;;  %v1180_v41 = vmul.f32 %v4698_v39, %v4692_v48  ;;  %v238_v48 = vld [vmem:[%s5607_s9] sm:$0xff] }
 0x985   :  { %4606 = vmatpush3.bf16.msra.mxu0 %v4603_v63  ;;  %v4611_v53 = vpack.c.bf16 %v239_v49, %v238_v48  ;;  %v5214_v63 = vsel %vm1157_vm4, %v2019_v61, -1e+12  ;;  %v560_v61 = vadd.f32 %v4961_v38, %v4906_v20 }
 0x986   :  { %4608 = vmatprep.subr.bf16.mxu0 %v4607_v4  ;;  %v1183_v46 = vmul.f32 %v1180_v41, %v5089_v44  ;;  %v2023_v3 = vsel %vm264_vm2, %v5214_v63, -inf }
 0x987   :  { %vm566_vm14 = vcmp.gt.f32.partialorder %v560_v61, 0.0 }
 0x989   :  { %4610 = vmatpush3.bf16.msra.mxu0 %v4607_v4  ;;  %v1594_v4 = vpop.xlane.xlu1 %1593 }
 0x98a   :  { %4380 = vmatprep.subr.mxu0 %v4743_v15  ;;  %v1598_v8 = vsub.f32 %v5098_v51, %v1594_v4 }
 0xa1e   :  { %v5166_v6 = vpop.f32.mrb[28].mxu1 }
 0xa1f   :  { %v4451_v11 = vpop.f32.mrb[29].mxu1 }
 0xa20   :  { %v1600_v11 = vmul.f32 1.442695, %v1598_v8 }
 0xa22   :  { %v5170_v13 = vpop.f32.mrb[30].mxu1 }
 0xa23   :  { %v4467_v21 = vpop.f32.mrb[31].mxu1  ;;  %vm2486_vm12 = vcmp.ge.f32.partialorder %v5170_v13, 0.0 }
 0xa26   :  { %v2482_v28 = vpop.f32.mrb[32].mxu1 }
 0xa27   :  { %vm2487_vm8 = vcmp.ge.f32.partialorder %v2482_v28, 0.0  ;;  %v2489_v29 = vmul.f32 0.2, %v2482_v28  ;;  %v4472_v33 = vpop.f32.mrb[33].mxu1 }
 0xa29   :  { %v2491_v35 = vsel %vm2487_vm8, %v2482_v28, %v2489_v29  ;;  %v5221_v29 = vsub.s32 3, %v4918_v22  ;;  %v2765_v22 = vpop.permute.xlu1 %2764 }
 0xa2a   :  { %v2495_v37 = vsel %vm2493_vm9, %v2491_v35, -1e+12 }
 0xa2b   :  { %v2499_v43 = vsel %vm264_vm2, %v2495_v37, -inf  ;;  %v3187_v59 = vrot.slane %v4926_v24, %v5221_v29 }
 0xa2c   :  { %2500 = vmax.xlane.f32.xlu0 %v2499_v43 }
 0xa42   :  { %2756 = vrot.lane.b32.xlu0 %v2754_v19, %s4747_s17 }
 0xa57   :  { %v831_v42 = vpop.f32.mrb[6].mxu0 }
 0xa58   :  { %v4353_v45 = vpop.f32.mrb[7].mxu0  ;;  %4367 = vmatprep.mubr.msk.f32.mxu0 %vm53_vm0, %v831_v42 }
 0xa59   :  { %4368 = vmatmul.mubr.msk.f32.vlgmr.msra.gmra.mrb[8].mxu0 %vm53_vm0, %v5001_v62  ;;  %v240_v62 = vld [vmem:[%s5607_s9 + $0x10] sm:$0xff] }
 0xa5a   :  { %4381 = vmatpush3.msra.mxu0 %v4850_v12  ;;  %4382 = vmatprep.mubr.msk.f32.mxu0 %vm4744_vm1, %v4743_v15  ;;  %v4615_v54 = vpack.c.bf16 %v241_v0, %v240_v62  ;;  %v2488_v62 = vmul.f32 0.2, %v5170_v13 }
 0xa5b   :  { %4612 = vmatprep.subr.bf16.mxu0 %v4611_v53 }
 0xa5d   :  { %4383 = vmatmul.mubr.msk.f32.vlgmr.msra.gmra.mrb[10].mxu0 %vm264_vm2, %v1183_v46 }
 0xa5e   :  { %4614 = vmatpush3.bf16.msra.mxu0 %v4611_v53  ;;  %v557_v53 = vadd.f32 %v4951_v34, %v4876_v18  ;;  %v226_v18 = vld [vmem:[%s5606_s8 + $0x20] sm:$0xff]  ;;  %v227_v34 = vld [vmem:[%s5606_s8 + $0x28] sm:$0xff] }
 0xa5f   :  { %4616 = vmatprep.subr.bf16.mxu0 %v4615_v54 }
 0xa60   :  { %vm561_vm11 = vcmp.gt.f32.partialorder %v557_v53, 0.0 }
 0xa61   :  { %v5264_v0 = vsel %vm561_vm11, 1.0, %v557_v53  ;;  %v559_v53 = vadd.f32 %v4947_v32, %v4863_v16  ;;  %v242_v16 = vld [vmem:[%s5607_s9 + $0x20] sm:$0xff]  ;;  %v243_v32 = vld [vmem:[%s5607_s9 + $0x28] sm:$0xff] }
 0xa62   :  { %4618 = vmatpush3.bf16.msra.mxu0 %v4615_v54  ;;  %v2490_v54 = vsel %vm2486_vm12, %v5170_v13, %v2488_v62  ;;  %vm2492_vm13 = vcmp.gt.f32.partialorder %v5264_v0, 0.0  ;;  %v228_v13 = vld [vmem:[%s5606_s8 + $0x30] sm:$0xff] }
 0xa63   :  { %4411 = vmatprep.subr.mxu0 %v4743_v15  ;;  %vm565_vm5 = vcmp.gt.f32.partialorder %v559_v53, 0.0 }
 0xab9   :  { %v2501_v55 = vpop.xlane.xlu0 %2500 }
 0xaba   :  { %v2503_v9 = vsub.f32 %v2495_v37, %v2501_v55  ;;  %v4619_v55 = vpack.c.bf16 %v227_v34, %v226_v18  ;;  %v244_v34 = vld [vmem:[%s5607_s9 + $0x30] sm:$0xff] }
 0xabc   :  { %v2506_v47 = vmul.f32 1.442695, %v2503_v9  ;;  %v229_v9 = vld [vmem:[%s5606_s8 + $0x38] sm:$0xff] }
 0xabd   :  { %v2757_v2 = vpop.permute.xlu0 %2756 }
 0xabe   :  { %4699 = vpow2.f32 %v2506_v47  ;;  %v2759_v52 = vmul.f32 %v2757_v2, %v4943_v31  ;;  %v2760_v57 = vmul.f32 %v4940_v30, %v2757_v2  ;;  %v4623_v47 = vpack.c.bf16 %v229_v9, %v228_v13 }
 0xabf   :  { %4701 = vpow2.f32 %v1600_v11  ;;  %v5296_v11 = vsel %vm566_vm14, 1.0, %v560_v61  ;;  %v4627_v13 = vpack.c.bf16 %v243_v32, %v242_v16 }
 0xac0   :  { %2762 = vrot.lane.b32.xlu0 %v2759_v52, %s4748_s18  ;;  %vm2926_vm4 = vcmp.gt.f32.partialorder %v5296_v11, 0.0 }
 0xac4   :  { %2841 = vrot.lane.b32.xlu0 %v2760_v57, %s4748_s18 }
 0xac8   :  { %v4700_v58 = vpop.eup %4699 }
 0xac9   :  { %v2511_v60 = vsel %vm264_vm2, %v4700_v58, 0.0  ;;  %v4702_v21 = vpop.eup %4701 }
 0xaca   :  { %2512 = vadd.xlane.f32.xlu1 %v2511_v60  ;;  %v1604_v28 = vsel %vm264_vm2, %v4702_v21, 0.0 }
 0xadb   :  { %2843 = vrot.lane.b32.xlu1 %v4940_v30, %s4748_s18 }
 0xae3   :  { %2024 = vmax.xlane.f32.xlu0 %v2023_v3 }
 0xaff   :  { %1605 = vadd.xlane.f32.xlu1 %v1604_v28 }
 0xb10   :  { %3189 = vrot.lane.b32.xlu1 %v3187_v59, %s4749_s0 }
 0xb2c   :  { %v5226_v33 = vpop.f32.mrb[8].mxu0 }
 0xb2d   :  { %v5228_v35 = vpop.f32.mrb[9].mxu0 }
 0xb30   :  { %v1254_v51 = vpop.f32.mrb[10].mxu0 }
 0xb31   :  { %v4384_v37 = vpop.f32.mrb[11].mxu0  ;;  %4398 = vmatprep.mubr.msk.f32.mxu0 %vm53_vm0, %v1254_v51 }
 0xb32   :  { %4399 = vmatmul.mubr.msk.f32.vlgmr.msra.gmra.mrb[12].mxu0 %vm53_vm0, %v5047_v50  ;;  %v2763_v39 = vpop.permute.xlu0 %2762 }
 0xb33   :  { %4412 = vmatpush3.msra.mxu0 %v4831_v5  ;;  %4413 = vmatprep.mubr.msk.f32.mxu0 %vm4744_vm1, %v4743_v15 }
 0xb34   :  { %4620 = vmatprep.subr.bf16.mxu0 %v4619_v55 }
 0xb36   :  { %v2842_v50 = vpop.permute.xlu0 %2841 }
 0xb57   :  { %v2513_v24 = vpop.xlane.xlu1 %2512 }
 0xb58   :  { %4703 = vrcp.f32 %v2513_v24 }
 0xb5b   :  { %v2844_v5 = vpop.permute.xlu1 %2843 }
 0xb62   :  { %v4704_v43 = vpop.eup %4703 }
 0xb63   :  { %v2517_v19 = vmul.f32 %v4704_v43, %v4700_v58 }
 0xb65   :  { %v2519_v36 = vmul.f32 %v2517_v19, %v5172_v25 }
 0xb67   :  { %4481 = vmatmul.mubr.msk.f32.vlgmr.msra.gmra.mrb[34].mxu1 %vm264_vm2, %v2519_v36 }
 0xb68   :  { %4495 = vmatpush3.xpose.msk.msra.mxu1 %vm575_vm3, %v2765_v22  ;;  %4496 = vmatprep.mubr.msk.f32.mxu1 %vm4744_vm1, %v4743_v15 }
 0xb69   :  { %4499 = vmatprep.subr.mxu1 %v4743_v15 }
 0xb6b   :  { %4497 = vmatmul.mubr.msk.f32.vlgmr.msra.gmra.mrb[36].mxu1 %vm575_vm3, %v2763_v39 }
 0xb6c   :  { %4500 = vmatpush3.xpose.msk.msra.mxu1 %vm575_vm3, %v2844_v5  ;;  %4501 = vmatprep.mubr.msk.f32.mxu1 %vm4744_vm1, %v4743_v15 }
 0xb6d   :  { %4509 = vmatprep.subr.mxu1 %v4743_v15 }
 0xb6f   :  { %4502 = vmatmul.mubr.msk.f32.vlgmr.msra.gmra.mrb[38].mxu1 %vm575_vm3, %v2842_v50 }
 0xb70   :  { %4510 = vmatpush3.msra.mxu1 %v4868_v17  ;;  %4511 = vmatprep.mubr.msk.f32.mxu1 %vm4744_vm1, %v4743_v15  ;;  %v2025_v57 = vpop.xlane.xlu0 %2024 }
 0xb71   :  { %4525 = vmatprep.subr.mxu1 %v4743_v15  ;;  %v2029_v58 = vsub.f32 %v5214_v63, %v2025_v57 }
 0xb73   :  { %v2031_v60 = vmul.f32 1.442695, %v2029_v58 }
 0xb8c   :  { %v1606_v41 = vpop.xlane.xlu1 %1605 }
 0xb8d   :  { %4705 = vrcp.f32 %v1606_v41 }
 0xb8e   :  { %4707 = vpow2.f32 %v2031_v60 }
 0xb90   :  { %v3190_v42 = vpop.permute.xlu1 %3189 }
 0xb91   :  { %v3192_v45 = vmul.f32 %v3190_v42, %v4932_v27  ;;  %v3193_v17 = vmul.f32 %v4930_v26, %v3190_v42 }
 0xb93   :  { %3195 = vrot.lane.b32.xlu1 %v3192_v45, %s4750_s1 }
 0xb97   :  { %v4706_v46 = vpop.eup %4705  ;;  %3276 = vrot.lane.b32.xlu1 %v4930_v26, %s4750_s1  ;;  %v5270_v26 = vsel %vm2492_vm13, %v2490_v54, -1e+12  ;;  %v5317_v54 = vsel %vm565_vm5, 1.0, %v559_v53 }
 0xb98   :  { %v1611_v48 = vmul.f32 %v4706_v46, %v4702_v21  ;;  %v4708_v20 = vpop.eup %4707  ;;  %vm2925_vm7 = vcmp.gt.f32.partialorder %v5317_v54, 0.0 }
 0xb99   :  { %v2035_v38 = vsel %vm264_vm2, %v4708_v20, 0.0 }
 0xb9a   :  { %v1614_v49 = vmul.f32 %v1611_v48, %v5068_v7  ;;  %v2496_v7 = vsel %vm264_vm2, %v5270_v26, -inf }
 0xb9b   :  { %3274 = vrot.lane.b32.xlu1 %v3193_v17, %s4750_s1 }
 0xb9c   :  { %4414 = vmatmul.mubr.msk.f32.vlgmr.msra.gmra.mrb[14].mxu0 %vm264_vm2, %v1614_v49 }
 0xb9d   :  { %4622 = vmatpush3.bf16.msra.mxu0 %v4619_v55  ;;  %v245_v55 = vld [vmem:[%s5607_s9 + $0x38] sm:$0xff] }
 0xb9e   :  { %4624 = vmatprep.subr.bf16.mxu0 %v4623_v47  ;;  %v4631_v9 = vpack.c.bf16 %v245_v55, %v244_v34 }
 0xba1   :  { %4626 = vmatpush3.bf16.msra.mxu0 %v4623_v47 }
 0xba2   :  { %4442 = vmatprep.subr.mxu0 %v4743_v15 }
 0xbbf   :  { %2497 = vmax.xlane.f32.xlu1 %v2496_v7 }
 0xc05   :  { %v5287_v2 = vpop.f32.mrb[12].mxu0 }
 0xc06   :  { %v5289_v52 = vpop.f32.mrb[13].mxu0 }
 0xc3a   :  { %v5292_v14 = vpop.f32.mrb[34].mxu1 }
 0xc3b   :  { %v4482_v3 = vpop.f32.mrb[35].mxu1 }
 0xc3e   :  { %v2836_v4 = vpop.f32.mrb[36].mxu1 }
 0xc3f   :  { %v4498_v8 = vpop.f32.mrb[37].mxu1  ;;  %v2921_v62 = vmul.f32 0.2, %v2836_v4  ;;  %vm2919_vm6 = vcmp.ge.f32.partialorder %v2836_v4, 0.0 }
 0xc40   :  { %v5356_v8 = vld [vmem:[%s5599_s2 + $0x8] sm:$0xff] }
 0xc41   :  { %v2923_v7 = vsel %vm2919_vm6, %v2836_v4, %v2921_v62 }
 0xc42   :  { %v2915_v21 = vpop.f32.mrb[38].mxu1 }
 0xc43   :  { %vm2920_vm15 = vcmp.ge.f32.partialorder %v2915_v21, 0.0  ;;  %v2922_v28 = vmul.f32 0.2, %v2915_v21  ;;  %v4503_v59 = vpop.f32.mrb[39].mxu1 }
 0xc45   :  { %v2924_v51 = vsel %vm2920_vm15, %v2915_v21, %v2922_v28 }
 0xc46   :  { %v2928_v63 = vsel %vm2926_vm4, %v2924_v51, -1e+12 }
 0xc47   :  { %v2932_v37 = vsel %vm264_vm2, %v2928_v63, -inf }
 0xc48   :  { %2933 = vmax.xlane.f32.xlu0 %v2932_v37 }
 0xc4c   :  { %2036 = vadd.xlane.f32.xlu0 %v2035_v38 }
 0xc6f   :  { %v1685_v22 = vpop.f32.mrb[14].mxu0 }
 0xc70   :  { %v4415_v24 = vpop.f32.mrb[15].mxu0  ;;  %4429 = vmatprep.mubr.msk.f32.mxu0 %vm53_vm0, %v1685_v22 }
 0xc71   :  { %4430 = vmatmul.mubr.msk.f32.vlgmr.msra.gmra.mrb[16].mxu0 %vm53_vm0, %v5120_v40 }
 0xc72   :  { %4443 = vmatpush3.msra.mxu0 %v4850_v12  ;;  %4444 = vmatprep.mubr.msk.f32.mxu0 %vm4744_vm1, %v4743_v15  ;;  %v3196_v12 = vpop.permute.xlu1 %3195 }
 0xc73   :  { %4628 = vmatprep.subr.bf16.mxu0 %v4627_v13 }
 0xc76   :  { %v3277_v40 = vpop.permute.xlu1 %3276 }
 0xc7a   :  { %v3275_v46 = vpop.permute.xlu1 %3274 }
 0xc7e   :  { %v2498_v48 = vpop.xlane.xlu1 %2497 }
 0xc7f   :  { %v2502_v17 = vsub.f32 %v5270_v26, %v2498_v48 }
 0xc81   :  { %v2504_v49 = vmul.f32 1.442695, %v2502_v17 }
 0xcd5   :  { %v2934_v43 = vpop.xlane.xlu0 %2933 }
 0xcd6   :  { %v2936_v19 = vsub.f32 %v2928_v63, %v2934_v43  ;;  %v5369_v43 = vld [vmem:[%s5599_s2] sm:$0xff] }
 0xcd8   :  { %v2939_v36 = vmul.f32 1.442695, %v2936_v19 }
 0xcd9   :  { %v2037_v39 = vpop.xlane.xlu0 %2036 }
 0xcda   :  { %4709 = vpow2.f32 %v2939_v36  ;;  %v231_v36 = vld [vmem:[%s5606_s8 + $0x48] sm:$0xff] }
 0xcdb   :  { %4711 = vrcp.f32 %v2037_v39 }
 0xcdc   :  { %4713 = vpow2.f32 %v2504_v49 }
 0xce4   :  { %v4710_v5 = vpop.eup %4709 }
 0xce5   :  { %v4712_v50 = vpop.eup %4711  ;;  %v2944_v41 = vsel %vm264_vm2, %v4710_v5, 0.0 }
 0xce6   :  { %v2042_v42 = vmul.f32 %v4712_v50, %v4708_v20  ;;  %2945 = vadd.xlane.f32.xlu0 %v2944_v41  ;;  %v233_v50 = vld [vmem:[%s5606_s8 + $0x58] sm:$0xff] }
 0xce8   :  { %v2045_v45 = vmul.f32 %v2042_v42, %v5089_v44  ;;  %v4714_v44 = vpop.eup %4713 }
 0xce9   :  { %v2508_v18 = vsel %vm264_vm2, %v4714_v44, 0.0 }
 0xcea   :  { %4445 = vmatmul.mubr.msk.f32.vlgmr.msra.gmra.mrb[18].mxu0 %vm264_vm2, %v2045_v45 }
 0xceb   :  { %4630 = vmatpush3.bf16.msra.mxu0 %v4627_v13 }
 0xcec   :  { %4632 = vmatprep.subr.bf16.mxu0 %v4631_v9 }
 0xcef   :  { %4634 = vmatpush3.bf16.msra.mxu0 %v4631_v9 }
 0xcf0   :  { %4473 = vmatprep.subr.mxu0 %v4743_v15 }
 0xcfc   :  { %3197 = vrot.lane.b32.xlu0 %v4932_v27, %s4750_s1  ;;  %v2927_v27 = vsel %vm2925_vm7, %v2923_v7, -1e+12 }
 0xcfd   :  { %v2929_v26 = vsel %vm264_vm2, %v2927_v27, -inf }
 0xd1b   :  { %2509 = vadd.xlane.f32.xlu0 %v2508_v18 }
 0xd1f   :  { %2930 = vmax.xlane.f32.xlu0 %v2929_v26 }
 0xd44   :  { %v5337_v47 = vpop.f32.mrb[16].mxu0 }
 0xd45   :  { %v5339_v57 = vpop.f32.mrb[17].mxu0 }
 0xd73   :  { %v2946_v58 = vpop.xlane.xlu0 %2945 }
 0xd74   :  { %4715 = vrcp.f32 %v2946_v58 }
 0xd77   :  { %v3198_v4 = vpop.permute.xlu0 %3197 }
 0xd7e   :  { %v4716_v60 = vpop.eup %4715 }
 0xd7f   :  { %v2950_v61 = vmul.f32 %v4716_v60, %v4710_v5  ;;  %v232_v5 = vld [vmem:[%s5606_s8 + $0x50] sm:$0xff] }
 0xd80   :  { %v4639_v41 = vpack.c.bf16 %v233_v50, %v232_v5 }
 0xd81   :  { %v2952_v3 = vmul.f32 %v2950_v61, %v5296_v11  ;;  %v247_v61 = vld [vmem:[%s5607_s9 + $0x48] sm:$0xff] }
 0xd83   :  { %4512 = vmatmul.mubr.msk.f32.vlgmr.msra.gmra.mrb[40].mxu1 %vm264_vm2, %v2952_v3 }
 0xd84   :  { %4526 = vmatpush3.xpose.msk.msra.mxu1 %vm575_vm3, %v3198_v4  ;;  %4527 = vmatprep.mubr.msk.f32.mxu1 %vm4744_vm1, %v4743_v15  ;;  %v248_v4 = vld [vmem:[%s5607_s9 + $0x50] sm:$0xff] }
 0xd85   :  { %4530 = vmatprep.subr.mxu1 %v4743_v15 }
 0xd87   :  { %4528 = vmatmul.mubr.msk.f32.vlgmr.msra.gmra.mrb[42].mxu1 %vm575_vm3, %v3196_v12 }
 0xd88   :  { %4531 = vmatpush3.xpose.msk.msra.mxu1 %vm575_vm3, %v3277_v40  ;;  %4532 = vmatprep.mubr.msk.f32.mxu1 %vm4744_vm1, %v4743_v15 }
 0xd89   :  { %4540 = vmatprep.subr.mxu1 %v4743_v15 }
 0xd8b   :  { %4533 = vmatmul.mubr.msk.f32.vlgmr.msra.gmra.mrb[44].mxu1 %vm575_vm3, %v3275_v46 }
 0xd8c   :  { %4541 = vmatpush3.msra.mxu1 %v5356_v8  ;;  %4542 = vmatprep.mubr.msk.f32.mxu1 %vm4744_vm1, %v4743_v15 }
 0xd8d   :  { %4556 = vmatprep.subr.mxu1 %v4743_v15 }
 0xda8   :  { %v2510_v21 = vpop.xlane.xlu0 %2509 }
 0xda9   :  { %4717 = vrcp.f32 %v2510_v21  ;;  %v249_v21 = vld [vmem:[%s5607_s9 + $0x58] sm:$0xff] }
 0xdac   :  { %v2931_v28 = vpop.xlane.xlu0 %2930 }
 0xdad   :  { %v2935_v59 = vsub.f32 %v2927_v27, %v2931_v28  ;;  %v4647_v28 = vpack.c.bf16 %v249_v21, %v248_v4 }
 0xdaf   :  { %v2937_v51 = vmul.f32 1.442695, %v2935_v59 }
 0xdb1   :  { %4719 = vpow2.f32 %v2937_v51 }
 0xdb3   :  { %v4718_v63 = vpop.eup %4717 }
 0xdb4   :  { %v2515_v38 = vmul.f32 %v4718_v63, %v4714_v44  ;;  %v3618_v44 = vrot.slane %v4977_v56, %v5221_v29  ;;  %v5411_v56 = vld [vmem:[%s5601_s3] sm:$0xff] }
 0xdb6   :  { %v2518_v19 = vmul.f32 %v2515_v38, %v5264_v0 }
 0xdbb   :  { %v4720_v37 = vpop.eup %4719 }
 0xdbc   :  { %v2941_v20 = vsel %vm264_vm2, %v4720_v37, 0.0 }
 0xdbd   :  { %v2116_v22 = vpop.f32.mrb[18].mxu0  ;;  %2942 = vadd.xlane.f32.xlu1 %v2941_v20 }
 0xdbe   :  { %v4446_v24 = vpop.f32.mrb[19].mxu0  ;;  %4460 = vmatprep.mubr.msk.f32.mxu0 %vm53_vm0, %v2116_v22 }
 0xdbf   :  { %4461 = vmatmul.mubr.msk.f32.vlgmr.msra.gmra.mrb[20].mxu0 %vm53_vm0, %v5166_v6  ;;  %v230_v6 = vld [vmem:[%s5606_s8 + $0x40] sm:$0xff] }
 0xdc0   :  { %4474 = vmatpush3.msra.mxu0 %v5369_v43  ;;  %4475 = vmatprep.mubr.msk.f32.mxu0 %vm4744_vm1, %v4743_v15  ;;  %v4635_v39 = vpack.c.bf16 %v231_v36, %v230_v6 }
 0xdc2   :  { %4636 = vmatprep.subr.bf16.mxu0 %v4635_v39 }
 0xdc3   :  { %4476 = vmatmul.mubr.msk.f32.vlgmr.msra.gmra.mrb[22].mxu0 %vm264_vm2, %v2518_v19 }
 0xdc4   :  { %4638 = vmatpush3.bf16.msra.mxu0 %v4635_v39 }
 0xdc5   :  { %4640 = vmatprep.subr.bf16.mxu0 %v4639_v41 }
 0xdc8   :  { %4642 = vmatpush3.bf16.msra.mxu0 %v4639_v41 }
 0xdc9   :  { %4504 = vmatprep.subr.mxu0 %v4743_v15 }
 0xdce   :  { %3628 = vrot.lane.b32.xlu1 %v4943_v31, %s4750_s1 }
 0xe4a   :  { %v2943_v7 = vpop.xlane.xlu1 %2942 }
 0xe4b   :  { %4721 = vrcp.f32 %v2943_v7 }
 0xe55   :  { %v4722_v26 = vpop.eup %4721 }
 0xe56   :  { %v5391_v42 = vpop.f32.mrb[40].mxu1  ;;  %v2948_v32 = vmul.f32 %v4722_v26, %v4720_v37  ;;  %v235_v26 = vld [vmem:[%s5606_s8 + $0x68] sm:$0xff] }
 0xe57   :  { %v4513_v45 = vpop.f32.mrb[41].mxu1 }
 0xe58   :  { %v2951_v58 = vmul.f32 %v2948_v32, %v5317_v54  ;;  %v236_v32 = vld [vmem:[%s5606_s8 + $0x70] sm:$0xff] }
 0xe5a   :  { %v3269_v12 = vpop.f32.mrb[42].mxu1 }
 0xe5b   :  { %v4529_v40 = vpop.f32.mrb[43].mxu1  ;;  %v3354_v18 = vmul.f32 0.2, %v3269_v12  ;;  %vm3352_vm10 = vcmp.ge.f32.partialorder %v3269_v12, 0.0 }
 0xe5d   :  { %v3356_v13 = vsel %vm3352_vm10, %v3269_v12, %v3354_v18  ;;  %v234_v18 = vld [vmem:[%s5606_s8 + $0x60] sm:$0xff] }
 0xe5e   :  { %v3348_v46 = vpop.f32.mrb[44].mxu1  ;;  %v3358_v9 = vsel %vm2492_vm13, %v3356_v13, -1e+12  ;;  %v237_v13 = vld [vmem:[%s5606_s8 + $0x78] sm:$0xff] }
 0xe5f   :  { %vm3353_vm8 = vcmp.ge.f32.partialorder %v3348_v46, 0.0  ;;  %v3355_v48 = vmul.f32 0.2, %v3348_v46  ;;  %v4534_v17 = vpop.f32.mrb[45].mxu1  ;;  %v3360_v60 = vsel %vm264_vm2, %v3358_v9, -inf }
 0xe61   :  { %v3357_v49 = vsel %vm3353_vm8, %v3348_v46, %v3355_v48 }
 0xe62   :  { %v3359_v53 = vsel %vm2493_vm9, %v3357_v49, -1e+12 }
 0xe63   :  { %v3363_v62 = vsel %vm264_vm2, %v3359_v53, -inf }
 0xe64   :  { %3364 = vmax.xlane.f32.xlu0 %v3363_v62 }
 0xe7a   :  { %3620 = vrot.lane.b32.xlu0 %v3618_v44, %s4749_s0 }
 0xe7e   :  { %3707 = vrot.lane.b32.xlu0 %v4940_v30, %s4750_s1 }
 0xe92   :  { %v5401_v27 = vpop.f32.mrb[20].mxu0 }
 0xe93   :  { %v5403_v16 = vpop.f32.mrb[21].mxu0 }
 0xe96   :  { %v2589_v34 = vpop.f32.mrb[22].mxu0 }
 0xe97   :  { %v4477_v55 = vpop.f32.mrb[23].mxu0  ;;  %4491 = vmatprep.mubr.msk.f32.mxu0 %vm53_vm0, %v2589_v34  ;;  %v4651_v34 = vpack.c.bf16 %v235_v26, %v234_v18 }
 0xe98   :  { %4492 = vmatmul.mubr.msk.f32.vlgmr.msra.gmra.mrb[24].mxu0 %vm53_vm0, %v5292_v14  ;;  %v246_v14 = vld [vmem:[%s5607_s9 + $0x40] sm:$0xff] }
 0xe99   :  { %4505 = vmatpush3.msra.mxu0 %v5411_v56  ;;  %4506 = vmatprep.mubr.msk.f32.mxu0 %vm4744_vm1, %v4743_v15  ;;  %v4643_v3 = vpack.c.bf16 %v247_v61, %v246_v14 }
 0xe9b   :  { %4644 = vmatprep.subr.bf16.mxu0 %v4643_v3 }
 0xe9c   :  { %4507 = vmatmul.mubr.msk.f32.vlgmr.msra.gmra.mrb[26].mxu0 %vm264_vm2, %v2951_v58 }
 0xe9d   :  { %3361 = vmax.xlane.f32.xlu0 %v3360_v60  ;;  %4646 = vmatpush3.bf16.msra.mxu0 %v4643_v3 }
 0xe9e   :  { %4648 = vmatprep.subr.bf16.mxu0 %v4647_v28 }
 0xea1   :  { %4650 = vmatpush3.bf16.msra.mxu0 %v4647_v28 }
 0xea2   :  { %4535 = vmatprep.subr.mxu0 %v4743_v15 }
 0xef1   :  { %v3365_v59 = vpop.xlane.xlu0 %3364 }
 0xef2   :  { %v3367_v51 = vsub.f32 %v3359_v53, %v3365_v59 }
 0xef4   :  { %v3370_v63 = vmul.f32 1.442695, %v3367_v51 }
 0xef5   :  { %v3621_v38 = vpop.permute.xlu0 %3620 }
 0xef6   :  { %4723 = vpow2.f32 %v3370_v63  ;;  %v3623_v22 = vmul.f32 %v3621_v38, %v4943_v31  ;;  %v3624_v24 = vmul.f32 %v4940_v30, %v3621_v38  ;;  %v3629_v30 = vpop.permute.xlu1 %3628 }
 0xef9   :  { %v3708_v19 = vpop.permute.xlu0 %3707 }
 0xf00   :  { %v4724_v37 = vpop.eup %4723 }
 0xf01   :  { %v3375_v20 = vsel %vm264_vm2, %v4724_v37, 0.0 }
 0xf02   :  { %3376 = vadd.xlane.f32.xlu1 %v3375_v20 }
 0xf13   :  { %3626 = vrot.lane.b32.xlu1 %v3623_v22, %s4750_s1 }
 0xf17   :  { %3705 = vrot.lane.b32.xlu1 %v3624_v24, %s4750_s1 }
 0xf2a   :  { %v3362_v6 = vpop.xlane.xlu0 %3361 }
 0xf2b   :  { %v3366_v36 = vsub.f32 %v3358_v9, %v3362_v6 }
 0xf2d   :  { %v3368_v39 = vmul.f32 1.442695, %v3366_v36 }
 0xf2f   :  { %4725 = vpow2.f32 %v3368_v39 }
 0xf39   :  { %v4726_v5 = vpop.eup %4725 }
 0xf3a   :  { %v3372_v50 = vsel %vm264_vm2, %v4726_v5, 0.0 }
 0xf3b   :  { %3373 = vadd.xlane.f32.xlu1 %v3372_v50 }
 0xf6b   :  { %v5440_v41 = vpop.f32.mrb[24].mxu0 }
 0xf6c   :  { %v5442_v45 = vpop.f32.mrb[25].mxu0 }
 0xf6f   :  { %v3022_v31 = vpop.f32.mrb[26].mxu0 }
 0xf70   :  { %v4508_v12 = vpop.f32.mrb[27].mxu0  ;;  %4522 = vmatprep.mubr.msk.f32.mxu0 %vm53_vm0, %v3022_v31 }
 0xf71   :  { %4523 = vmatmul.mubr.msk.f32.vlgmr.msra.gmra.mrb[28].mxu0 %vm53_vm0, %v5391_v42  ;;  %v5465_v42 = vld [vmem:[%s5601_s3 + $0x8] sm:$0xff] }
 0xf72   :  { %4536 = vmatpush3.msra.mxu0 %v5369_v43  ;;  %4537 = vmatprep.mubr.msk.f32.mxu0 %vm4744_vm1, %v4743_v15 }
 0xf73   :  { %4652 = vmatprep.subr.bf16.mxu0 %v4651_v34 }
 0xf8f   :  { %v3377_v40 = vpop.xlane.xlu1 %3376 }
 0xf90   :  { %4727 = vrcp.f32 %v3377_v40 }
 0xf93   :  { %v3627_v49 = vpop.permute.xlu1 %3626 }
 0xf9a   :  { %v4728_v46 = vpop.eup %4727 }
 0xf9b   :  { %v3381_v48 = vmul.f32 %v4728_v46, %v4724_v37 }
 0xf9d   :  { %v3383_v17 = vmul.f32 %v3381_v48, %v5172_v25  ;;  %v3706_v25 = vpop.permute.xlu1 %3705  ;;  %v5512_v48 = vld [vmem:[%s5609_s11] sm:$0xf] }
 0xf9f   :  { %4543 = vmatmul.mubr.msk.f32.vlgmr.msra.gmra.mrb[46].mxu1 %vm264_vm2, %v3383_v17 }
 0xfa0   :  { %4557 = vmatpush3.xpose.msk.msra.mxu1 %vm575_vm3, %v3629_v30  ;;  %4558 = vmatprep.mubr.msk.f32.mxu1 %vm4744_vm1, %v4743_v15 }
 0xfa1   :  { %4561 = vmatprep.subr.mxu1 %v4743_v15 }
 0xfa3   :  { %4559 = vmatmul.mubr.msk.f32.vlgmr.msra.gmra.mrb[48].mxu1 %vm575_vm3, %v3627_v49  ;;  %v2196_v49 = vrot.slane %v5512_v48, %v5014_v10 }
 0xfa4   :  { %4562 = vmatpush3.xpose.msk.msra.mxu1 %vm575_vm3, %v3708_v19  ;;  %4563 = vmatprep.mubr.msk.f32.mxu1 %vm4744_vm1, %v4743_v15 }
 0xfa5   :  { %4571 = vmatprep.subr.mxu1 %v4743_v15 }
 0xfa7   :  { %4564 = vmatmul.mubr.msk.f32.vlgmr.msra.gmra.mrb[50].mxu1 %vm575_vm3, %v3706_v25 }
 0xfa8   :  { %4572 = vmatpush3.msra.mxu1 %v5465_v42  ;;  %4573 = vmatprep.mubr.msk.f32.mxu1 %vm4744_vm1, %v4743_v15 }
 0xfc8   :  { %v3374_v53 = vpop.xlane.xlu1 %3373 }
 0xfc9   :  { %4729 = vrcp.f32 %v3374_v53  ;;  %v2270_v53 = vadd.f32 %v5403_v16, %v2196_v49 }
 0xfd3   :  { %v4730_v62 = vpop.eup %4729 }
 0xfd4   :  { %v3379_v44 = vmul.f32 %v4730_v62, %v4726_v5  ;;  %v2275_v62 = vadd.f32 %v5401_v27, %v2196_v49 }
 0xfd6   :  { %v3382_v7 = vmul.f32 %v3379_v44, %v5264_v0  ;;  %v4655_v0 = vpack.c.bf16 %v237_v13, %v236_v32 }
 0xfd8   :  { %4538 = vmatmul.mubr.msk.f32.vlgmr.msra.gmra.mrb[30].mxu0 %vm264_vm2, %v3382_v7 }
 0xfd9   :  { %4654 = vmatpush3.bf16.msra.mxu0 %v4651_v34 }
 0xfda   :  { %4656 = vmatprep.subr.bf16.mxu0 %v4655_v0 }
 0xfdd   :  { %4658 = vmatpush3.bf16.msra.mxu0 %v4655_v0 }
 0xfde   :  { %4566 = vmatprep.subr.mxu0 %v4743_v15 }
0x1044   :  { %v5485_v55 = vpop.f32.mrb[28].mxu0 }
0x1045   :  { %v5487_v9 = vpop.f32.mrb[29].mxu0 }
0x1072   :  { %v3526_v58 = vpop.f32.mrb[46].mxu1 }
0x1073   :  { %v4544_v60 = vpop.f32.mrb[47].mxu1 }
0x1074   :  { %v1334_v60 = vrot.slane %v5512_v48, %v4921_v23 }
0x1076   :  { %v3700_v14 = vpop.f32.mrb[48].mxu1 }
0x1077   :  { %vm3783_vm9 = vcmp.ge.f32.partialorder %v3700_v14, 0.0  ;;  %v3785_v61 = vmul.f32 0.2, %v3700_v14  ;;  %v4560_v3 = vpop.f32.mrb[49].mxu1 }
0x1079   :  { %v3787_v4 = vsel %vm3783_vm9, %v3700_v14, %v3785_v61 }
0x107a   :  { %v3779_v21 = vpop.f32.mrb[50].mxu1  ;;  %v3789_v28 = vsel %vm2925_vm7, %v3787_v4, -1e+12 }
0x107b   :  { %vm3784_vm11 = vcmp.ge.f32.partialorder %v3779_v21, 0.0  ;;  %v3786_v59 = vmul.f32 0.2, %v3779_v21  ;;  %v4565_v51 = vpop.f32.mrb[51].mxu1  ;;  %v3791_v63 = vsel %vm264_vm2, %v3789_v28, -inf }
0x107c   :  { %3792 = vmax.xlane.f32.xlu0 %v3791_v63 }
0x107d   :  { %v3788_v37 = vsel %vm3784_vm11, %v3779_v21, %v3786_v59  ;;  %v1408_v21 = vadd.f32 %v5289_v52, %v1334_v60 }
0x107e   :  { %v3790_v20 = vsel %vm2926_vm4, %v3788_v37, -1e+12 }
0x107f   :  { %v3794_v38 = vsel %vm264_vm2, %v3790_v20, -inf }
0x1080   :  { %3795 = vmax.xlane.f32.xlu0 %v3794_v38  ;;  %v1413_v38 = vadd.f32 %v5287_v2, %v1334_v60 }
0x10ab   :  { %v3453_v22 = vpop.f32.mrb[30].mxu0 }
0x10ac   :  { %v4539_v24 = vpop.f32.mrb[31].mxu0  ;;  %4553 = vmatprep.mubr.msk.f32.mxu0 %vm53_vm0, %v3453_v22 }
0x10ad   :  { %4554 = vmatmul.mubr.msk.f32.vlgmr.msra.gmra.mrb[32].mxu0 %vm53_vm0, %v3526_v58 }
0x10ae   :  { %4567 = vmatpush3.msra.mxu0 %v5411_v56  ;;  %4568 = vmatprep.mubr.msk.f32.mxu0 %vm4744_vm1, %v4743_v15  ;;  %v5505_v15 = vld [vmem:[%s5608_s10] sm:$0xf] }
0x10af   :  { %v1765_v46 = vrot.slane %v5505_v15, %v5014_v10  ;;  %v251_v10 = vld [vmem:[%s5607_s9 + $0x68] sm:$0xff]  ;;  %v911_v27 = vrot.slane %v5505_v15, %v4921_v23 }
0x10b1   :  { %v1844_v17 = vadd.f32 %v5337_v47, %v1765_v46  ;;  %v1839_v25 = vadd.f32 %v5339_v57, %v1765_v46  ;;  %v250_v47 = vld [vmem:[%s5607_s9 + $0x60] sm:$0xff]  ;;  %v3533_v57 = vrot.slane %v5505_v15, %v5221_v29  ;;  %v985_v34 = vadd.f32 %v5228_v35, %v911_v27 }
0x10b2   :  { %v4659_v44 = vpack.c.bf16 %v251_v10, %v250_v47  ;;  %v990_v61 = vadd.f32 %v5226_v33, %v911_v27 }
0x10b4   :  { %4660 = vmatprep.subr.bf16.mxu0 %v4659_v44 }
0x1109   :  { %v3793_v19 = vpop.xlane.xlu0 %3792 }
0x110a   :  { %v3797_v6 = vsub.f32 %v3789_v28, %v3793_v19 }
0x110c   :  { %v3799_v36 = vmul.f32 1.442695, %v3797_v6 }
0x110d   :  { %v3796_v39 = vpop.xlane.xlu0 %3795 }
0x110e   :  { %4731 = vpow2.f32 %v3799_v36  ;;  %v3798_v5 = vsub.f32 %v3790_v20, %v3796_v39 }
0x1110   :  { %v3801_v50 = vmul.f32 1.442695, %v3798_v5 }
0x1112   :  { %4733 = vpow2.f32 %v3801_v50 }
0x1118   :  { %v4732_v31 = vpop.eup %4731 }
0x1119   :  { %v3803_v12 = vsel %vm264_vm2, %v4732_v31, 0.0 }
0x111a   :  { %3804 = vadd.xlane.f32.xlu0 %v3803_v12 }
0x111c   :  { %v4734_v30 = vpop.eup %4733 }
0x111d   :  { %v3806_v40 = vsel %vm264_vm2, %v4734_v30, 0.0 }
0x111e   :  { %3807 = vadd.xlane.f32.xlu1 %v3806_v40  ;;  %v253_v40 = vld [vmem:[%s5607_s9 + $0x78] sm:$0xff] }
0x112f   :  { %2282 = vrot.lane.b32.xlu1 %v1844_v17, %s4745_s7 }
0x1130   :  { %2280 = vrot.lane.b32.xlu0 %v1839_v25, %s4745_s7 }
0x1133   :  { %2290 = vrot.lane.b32.xlu1 %v2270_v53, %s4745_s7 }
0x1137   :  { %2292 = vrot.lane.b32.xlu1 %v2275_v62, %s4745_s7  ;;  %v3964_v62 = vrot.slane %v5512_v48, %v5221_v29  ;;  %v3102_v29 = vrot.slane %v5512_v48, %v5057_v1 }
0x1180   :  { %v4555_v16 = vpop.f32.mrb[32].mxu0 }
0x1181   :  { %v3612_v7 = vadd.f32 %v4555_v16, %v3533_v57  ;;  %v3606_v18 = vpop.f32.mrb[33].mxu0  ;;  %v2669_v16 = vrot.slane %v5505_v15, %v5057_v1  ;;  %v3176_v15 = vadd.f32 %v5487_v9, %v3102_v29 }
0x1182   :  { %v3607_v26 = vadd.f32 %v3606_v18, %v3533_v57 }
0x1183   :  { %4050 = vrot.lane.b32.xlu1 %v3612_v7, %s4745_s7  ;;  %v2748_v18 = vadd.f32 %v5440_v41, %v2669_v16  ;;  %v2743_v27 = vadd.f32 %v5442_v45, %v2669_v16 }
0x1184   :  { %4048 = vrot.lane.b32.xlu0 %v3607_v26, %s4745_s7 }
0x11a7   :  { %v3805_v32 = vpop.xlane.xlu0 %3804 }
0x11a8   :  { %4735 = vrcp.f32 %v3805_v32 }
0x11ab   :  { %v3808_v13 = vpop.xlane.xlu1 %3807  ;;  %v2281_v0 = vpop.permute.xlu0 %2280 }
0x11ac   :  { %4737 = vrcp.f32 %v3808_v13  ;;  %v2286_v58 = vsel %vm575_vm3, %v985_v34, %v2281_v0  ;;  %v3181_v0 = vadd.f32 %v5485_v55, %v3102_v29 }
0x11ad   :  { %v2298_v3 = vadd.f32 %v5369_v43, %v2286_v58 }
0x11af   :  { %v2283_v14 = vpop.permute.xlu1 %2282  ;;  %v2302_v51 = vmul.f32 0.2, %v2298_v3  ;;  %vm2300_vm1 = vcmp.ge.f32.partialorder %v2298_v3, 0.0 }
0x11b0   :  { %v2287_v28 = vsel %vm575_vm3, %v990_v61, %v2283_v14 }
0x11b1   :  { %v2299_v37 = vadd.f32 %v5356_v8, %v2287_v28  ;;  %v2304_v19 = vsel %vm2300_vm1, %v2298_v3, %v2302_v51 }
0x11b2   :  { %v4736_v4 = vpop.eup %4735 }
0x11b3   :  { %v3810_v59 = vmul.f32 %v4736_v4, %v4732_v31  ;;  %v2291_v35 = vpop.permute.xlu1 %2290  ;;  %v2303_v36 = vmul.f32 0.2, %v2299_v37  ;;  %vm2301_vm13 = vcmp.ge.f32.partialorder %v2299_v37, 0.0 }
0x11b4   :  { %v2296_v63 = vsel %vm575_vm3, %v1408_v21, %v2291_v35 }
0x11b5   :  { %v2306_v23 = vadd.f32 %v5411_v56, %v2296_v63  ;;  %v3813_v20 = vmul.f32 %v3810_v59, %v5317_v54  ;;  %v2305_v31 = vsel %vm2301_vm13, %v2299_v37, %v2303_v36 }
0x11b6   :  { %v4738_v33 = vpop.eup %4737 }
0x11b7   :  { %v3812_v22 = vmul.f32 %v4738_v33, %v4734_v30  ;;  %vm2308_vm12 = vcmp.ge.f32.partialorder %v2306_v23, 0.0  ;;  %v2310_v52 = vmul.f32 0.2, %v2306_v23  ;;  %v2293_v24 = vpop.permute.xlu1 %2292  ;;  %4569 = vmatmul.mubr.msk.f32.vlgmr.msra.gmra.mrb[34].mxu0 %vm264_vm2, %v3813_v20 }
0x11b8   :  { %v2297_v6 = vsel %vm575_vm3, %v1413_v38, %v2293_v24  ;;  %4662 = vmatpush3.bf16.msra.mxu0 %v4659_v44 }
0x11b9   :  { %v2312_v39 = vsel %vm2308_vm12, %v2306_v23, %v2310_v52  ;;  %v2307_v5 = vadd.f32 %v5465_v42, %v2297_v6  ;;  %v3814_v50 = vmul.f32 %v3812_v22, %v5296_v11  ;;  %v252_v11 = vld [vmem:[%s5607_s9 + $0x70] sm:$0xff] }
0x11ba   :  { %v2314_v54 = vadd.f32 %v2312_v39, %v2304_v19  ;;  %v4663_v46 = vpack.c.bf16 %v253_v40, %v252_v11 }
0x11bb   :  { %vm2309_vm14 = vcmp.ge.f32.partialorder %v2307_v5, 0.0  ;;  %v2311_v2 = vmul.f32 0.2, %v2307_v5  ;;  %4574 = vmatmul.mubr.msk.f32.vlgmr.msra.gmra.mrb[52].mxu1 %vm264_vm2, %v3814_v50 }
0x11bc   :  { %2316 = vst.msk [vmem:[%s5610_s12] sm:$0xff] %vm53_vm0, %v2314_v54  ;;  %4664 = vmatprep.subr.bf16.mxu0 %v4663_v46 }
0x11bd   :  { %v2313_v12 = vsel %vm2309_vm14, %v2307_v5, %v2311_v2  ;;  %4666 = vmatpush3.bf16.msra.mxu0 %v4663_v46 }
0x11be   :  { %v2315_v30 = vadd.f32 %v2313_v12, %v2305_v31 }
0x11c0   :  { %2317 = vst.msk [vmem:[%s5610_s12 + $0x8] sm:$0xff] %vm53_vm0, %v2315_v30 }
0x11f5   :  { %v4051_v7 = vpop.permute.xlu1 %4050 }
0x11f6   :  { %v4049_v26 = vpop.permute.xlu0 %4048  ;;  %v4055_v32 = vsel %vm575_vm3, %v2748_v18, %v4051_v7 }
0x11f7   :  { %v4054_v34 = vsel %vm575_vm3, %v2743_v27, %v4049_v26  ;;  %v4067_v13 = vadd.f32 %v5356_v8, %v4055_v32 }
0x11f8   :  { %v4066_v58 = vadd.f32 %v5369_v43, %v4054_v34 }
0x11f9   :  { %v4071_v45 = vmul.f32 0.2, %v4067_v13  ;;  %vm4069_vm2 = vcmp.ge.f32.partialorder %v4067_v13, 0.0 }
0x11fa   :  { %v4070_v48 = vmul.f32 0.2, %v4066_v58  ;;  %vm4068_vm15 = vcmp.ge.f32.partialorder %v4066_v58, 0.0 }
0x11fb   :  { %v4073_v55 = vsel %vm4069_vm2, %v4067_v13, %v4071_v45 }
0x11fc   :  { %v4072_v4 = vsel %vm4068_vm15, %v4066_v58, %v4070_v48 }
0x128a   :  { %v3884_v17 = vpop.f32.mrb[34].mxu0 }
0x128b   :  { %v4570_v49 = vpop.f32.mrb[35].mxu0  ;;  %4584 = vmatprep.mubr.msk.f32.mxu0 %vm53_vm0, %v3884_v17 }
0x128e   :  { %v3957_v25 = vpop.f32.mrb[52].mxu1 }
0x128f   :  { %v4575_v53 = vpop.f32.mrb[53].mxu1  ;;  %4585 = vmatmul.mubr.msk.f32.vlgmr.msra.gmra.mrb[36].mxu0 %vm53_vm0, %v3957_v25 }
0x1362   :  { %v4586_v47 = vpop.f32.mrb[36].mxu0 }
0x1363   :  { %v4043_v10 = vadd.f32 %v4586_v47, %v3964_v62  ;;  %v4037_v57 = vpop.f32.mrb[37].mxu0 }
0x1364   :  { %v4038_v44 = vadd.f32 %v4037_v57, %v3964_v62 }
0x1365   :  { %4060 = vrot.lane.b32.xlu1 %v4043_v10, %s4745_s7 }
0x1366   :  { %4058 = vrot.lane.b32.xlu0 %v4038_v44, %s4745_s7 }
0x13d7   :  { %v4061_v60 = vpop.permute.xlu1 %4060 }
0x13d8   :  { %v4065_v41 = vsel %vm575_vm3, %v3181_v0, %v4061_v60  ;;  %v4059_v14 = vpop.permute.xlu0 %4058 }
0x13d9   :  { %v4075_v61 = vadd.f32 %v5465_v42, %v4065_v41  ;;  %v4064_v1 = vsel %vm575_vm3, %v3176_v15, %v4059_v14 }
0x13da   :  { %v4074_v3 = vadd.f32 %v5411_v56, %v4064_v1 }
0x13db   :  { %vm4077_vm4 = vcmp.ge.f32.partialorder %v4075_v61, 0.0  ;;  %v4079_v8 = vmul.f32 0.2, %v4075_v61 }
0x13dc   :  { %vm4076_vm5 = vcmp.ge.f32.partialorder %v4074_v3, 0.0  ;;  %v4078_v43 = vmul.f32 0.2, %v4074_v3 }
0x13dd   :  { %v4081_v9 = vsel %vm4077_vm4, %v4075_v61, %v4079_v8 }
0x13de   :  { %v4083_v21 = vadd.f32 %v4081_v9, %v4073_v55  ;;  %v4080_v28 = vsel %vm4076_vm5, %v4074_v3, %v4078_v43 }
0x13df   :  { %v4082_v59 = vadd.f32 %v4080_v28, %v4072_v4 }
0x13e0   :  { %4164 = vst.msk [vmem:[%s5610_s12 + $0x18] sm:$0xff] %vm53_vm0, %v4083_v21 }
0x13e1   :  { %4163 = vst.msk [vmem:[%s5610_s12 + $0x10] sm:$0xff] %vm53_vm0, %v4082_v59 }

// kernel: session_graph_forward.3
= control target key start
LH: loop header
LB: loop body
LE: loop exit
PB: predicated region body
PF: predicated region fallthrough
CT: control target
= control target key end

     0   :  { %v69_v0 = vlaneseq  ;;  %vm177_vm0 = vcmask 261120   ;;  %v4139_v21 = vmov 0.0   ;;  %vm4140_vm1 = vmmov 0   ;;  %s4141_s30 = smov 96   ;;  %s5012_s5 = inlined_call_operand.vmem [shape: f32[2,8], index: 5, kind: input, shape index: {}]   ;;  %s5013_s7 = inlined_call_operand.vmem [shape: f32[2,32,96], index: 7, kind: input, shape index: {}]   ;;  %s5014_s2 = inlined_call_operand.vmem [shape: f32[2,8,32], index: 2, kind: input, shape index: {}]   ;;  %s5015_s0 = inlined_call_operand.vmem [shape: f32[2,2,8,32], index: 0, kind: input, shape index: {}]   ;;  %s5016_s9 = inlined_call_operand.vmem [shape: f32[2,32,32], index: 9, kind: input, shape index: {}]   ;;  %s5017_s8 = inlined_call_operand.vmem [shape: f32[2,32,64], index: 8, kind: input, shape index: {}]   ;;  %s5018_s1 = inlined_call_operand.vmem [shape: f32[2,2,8,32], index: 1, kind: input, shape index: {}]   ;;  %s5019_s13 = inlined_call_operand.vmem [shape: f32[2,32,4], index: 13, kind: input, shape index: {}]   ;;  %s5020_s14 = inlined_call_operand.vmem [shape: f32[2,4,32], index: 14, kind: input, shape index: {}]   ;;  %s5021_s11 = inlined_call_operand.vmem [shape: f32[2,32,32], index: 11, kind: input, shape index: {}]   ;;  %s5022_s3 = inlined_call_operand.vmem [shape: f32[2,2,32], index: 3, kind: input, shape index: {}]   ;;  %s5023_s16 = inlined_call_operand.vmem [shape: f32[2,32], index: 16, kind: input, shape index: {}]   ;;  %s5024_s10 = inlined_call_operand.vmem [shape: f32[2,32], index: 10, kind: input, shape index: {}]   ;;  %s5025_s12 = inlined_call_operand.vmem [shape: f32[2,32], index: 12, kind: input, shape index: {}]   ;;  %s5026_s15 = inlined_call_operand.vmem [shape: f32[2,32], index: 15, kind: input, shape index: {}]   ;;  %s5027_s18 = inlined_call_operand.vmem [shape: f32[2,32,32], index: 18, kind: input, shape index: {}]   ;;  %s5028_s17 = inlined_call_operand.vmem [shape: f32[2,32,32], index: 17, kind: input, shape index: {}]   ;;  %s5029_s4 = inlined_call_operand.vmem [shape: f32[2,2,32], index: 4, kind: input, shape index: {}]   ;;  %s5030_s6 = inlined_call_operand.vmem [shape: bf16[256,32], index: 6, kind: input, shape index: {}]   ;;  %s5031_s19 = inlined_call_operand.vmem [shape: f32[2,32], index: 19, kind: input, shape index: {}]   ;;  %s5032_s20 = inlined_call_operand.vmem [shape: f32[2,2,32], index: 20, kind: output, shape index: {0}]   ;;  %s5033_s21 = inlined_call_operand.vmem [shape: f32[2,2,256], index: 21, kind: output, shape index: {1}]  }
   0x1   :  { %5039 = sst [smem:[#allocation2_spill]] %s5012_s5  ;;  %3707 = vmatprep.subr.mxu0 %v4139_v21  ;;  %3709 = vmatprep.mubr.msk.f32.mxu0 %vm4140_vm1, %v4139_v21  ;;  %v4142_v32 = vmov 0   ;;  %v4143_v33 = vmov 1966171168   ;;  %vm439_vm7 = vcmask 64512   ;;  %vm1024_vm10 = vcmask 31744  }
   0x2   :  { %5040 = sst [smem:[#allocation3_spill]] %s5013_s7  ;;  %v4263_v3 = vshrl.u32 %v69_v0, 7  ;;  %s5046_s22 = sld [smem:[#allocation2_spill]]  ;;  %4071 = vset.pattern.permute.xlu1 %v4142_v32  ;;  %4070 = vset.pattern.permute.xlu0 %v4142_v32  ;;  %v124_v34 = vunpack.c.l.s4 %v4143_v33  ;;  %v4361_v42 = vand.u32 127, %v69_v0  ;;  %vm1224_vm11 = vcmask 1043456  }
   0x3   :  { %5041 = sst [smem:[#allocation4_spill]] %s5014_s2  ;;  %s5045_s26 = sld [smem:[#allocation3_spill]]  ;;  %vm1423_vm12 = vcmask 254976   ;;  %vm1457_vm13 = vcmask 1041409   ;;  %vm1461_vm15 = vcmask 58368  }
   0x4   :  { %5042 = sst [smem:[#allocation5_spill]] %s5015_s0  ;;  %s5047_s24 = sld [smem:[#allocation4_spill]]  ;;  %v4282_v10 = vsub.s32 0, %v4263_v3  ;;  %v4285_v11 = vsub.s32 1, %v4263_v3  ;;  %v125_v35 = vunpack.c.0.s8 %v124_v34  ;;  %vm121_vm4 = vcmp.le.s32.totalorder %v4361_v42, %v4263_v3 }
   0x5   :  { %5043 = sst [smem:[#allocation6_spill]] %s5016_s9  ;;  %s4138_s2 = smov 32  }
   0x6   :  { %5044 = sst [smem:[#allocation7_spill]] %s5017_s8  ;;  %s5048_s29 = sld [smem:[#allocation5_spill]]  ;;  %v128_v36 = vsub.s32 %v125_v35, %v4263_v3 }
   0x7   :  { %s4144_s8 = smov 64   ;;  %s5053_s7 = sld [smem:[#allocation6_spill]] }
   0x8   :  { %v4274_v7 = vld [vmem:[%s5046_s22] sm:$0x3]  ;;  %s5054_s23 = sld [smem:[#allocation7_spill]] }
   0x9   :  { %v173_v1 = vld [vmem:[%s5045_s26] sm:$0xff]  ;;  %v174_v2 = vld [vmem:[%s5045_s26 + $0x8] sm:$0xff]  ;;  %v175_v5 = vld [vmem:[%s5045_s26 + $0x10] sm:$0xff]  ;;  %v72_v13 = vrot.slane %v4274_v7, %v4282_v10  ;;  %v79_v14 = vrot.slane %v4274_v7, %v4285_v11  ;;  %v129_v37 = vrot.slane %v4274_v7, %v128_v36  ;;  %vm1440_vm14 = vcmp.gt.f32.partialorder %v4274_v7, 0.0 }
   0xa   :  { %v3930_v4 = vpack.c.bf16 %v174_v2, %v173_v1  ;;  %v176_v6 = vld [vmem:[%s5045_s26 + $0x18] sm:$0xff]  ;;  %v4279_v9 = vld [vmem:[%s5047_s24] sm:$0xff]  ;;  %v4291_v12 = vld [vmem:[%s5047_s24 + $0x8] sm:$0xff] }
   0xb   :  { %v3934_v8 = vpack.c.bf16 %v176_v6, %v175_v5  ;;  %263 = vrot.lane.b32.xlu1 %v4279_v9, %s4138_s2  ;;  %74 = vbcast.lane.b32.xlu0 %v72_v13, 256  ;;  %v130_v38 = vcombine.high %v129_v37, %v129_v37  ;;  %v137_v39 = vrot.slane %v129_v37, %v128_v36  ;;  %v3522_v7 = vld [vmem:[%s5027_s18 + $0x28] sm:$0xff] }
   0xc   :  { %3931 = vmatprep.subr.bf16.mxu1 %v3930_v4  ;;  %v165_v15 = vld [vmem:[%s5048_s29] sm:$0xff]  ;;  %v166_v18 = vld [vmem:[%s5048_s29 + $0x8] sm:$0xff] }
   0xd   :  { %3933 = vmatpush3.bf16.msra.mxu1 %v3930_v4  ;;  %vm147_vm2 = vcmp.gt.f32.partialorder %v137_v39, 0.0  ;;  %v144_v40 = vrot.slane %v130_v38, %v128_v36  ;;  %v618_v13 = vld [vmem:[%s5053_s7] sm:$0xff]  ;;  %v621_v33 = vld [vmem:[%s5053_s7 + $0x18] sm:$0xff] }
   0xe   :  { %3935 = vmatprep.subr.bf16.mxu1 %v3934_v8  ;;  %v151_v41 = vsel %vm147_vm2, 1, %v4142_v32  ;;  %v708_v35 = vld [vmem:[%s5054_s23] sm:$0xff]  ;;  %v709_v36 = vld [vmem:[%s5054_s23 + $0x8] sm:$0xff] }
   0xf   :  { %265 = vrot.lane.b32.xlu1 %v4291_v12, %s4138_s2  ;;  %81 = vbcast.lane.b32.xlu0 %v79_v14, 256  ;;  %vm148_vm3 = vcmp.gt.f32.partialorder %v144_v40, 0.0  ;;  %v156_v43 = vrot.slane %v151_v41, %v4282_v10  ;;  %v619_v14 = vld [vmem:[%s5053_s7 + $0x8] sm:$0xff]  ;;  %v3946_v37 = vpack.c.bf16 %v709_v36, %v708_v35  ;;  %v710_v41 = vld [vmem:[%s5054_s23 + $0x10] sm:$0xff]  ;;  %v1065_v35 = vld [vmem:[%s5020_s14] sm:$0xf] }
  0x10   :  { %v152_v44 = vsel %vm148_vm3, 1, %v4142_v32  ;;  %v620_v32 = vld [vmem:[%s5053_s7 + $0x10] sm:$0xff] }
  0x11   :  { %3937 = vmatpush3.bf16.msra.mxu1 %v3934_v8  ;;  %vm161_vm5 = vcmp.eq.s32.totalorder %v156_v43, 1  ;;  %v160_v45 = vrot.slane %v152_v44, %v4282_v10  ;;  %v3942_v34 = vpack.c.bf16 %v621_v33, %v620_v32  ;;  %v711_v43 = vld [vmem:[%s5054_s23 + $0x18] sm:$0xff]  ;;  %v169_v44 = vld [vmem:[%s5018_s1] sm:$0xff] }
  0x12   :  { %3697 = vmatprep.subr.mxu1 %v4139_v21  ;;  %vm4367_vm6 = vmand %vm121_vm4, %vm161_vm5 }
  0x13   :  { %vm162_vm8 = vcmp.eq.s32.totalorder %v160_v45, 1 }
  0x14   :  { %vm4374_vm9 = vmand %vm121_vm4, %vm162_vm8 }
  0x7d   :  { %v4301_v16 = vpop.permute.xlu0 %74  ;;  %v4320_v22 = vpop.permute.xlu1 %263 }
  0x7e   :  { %v4304_v17 = vmul.f32 %v165_v15, %v4301_v16 }
  0x80   :  { %3694 = vmatprep.mubr.msk.f32.mxu1 %vm177_vm0, %v4304_v17 }
  0x81   :  { %v4311_v19 = vpop.permute.xlu0 %81  ;;  %v4326_v23 = vpop.permute.xlu1 %265 }
  0x82   :  { %v4314_v20 = vmul.f32 %v166_v18, %v4311_v19 }
  0x84   :  { %3695 = vmatmul.mubr.msk.f32.vlgmr.msra.gmra.mrb[0].mxu1 %vm177_vm0, %v4314_v20 }
  0x85   :  { %3699 = vmatprep.mubr.msk.f32.mxu1 %vm4140_vm1, %v4139_v21 }
 0x157   :  { %v4328_v24 = vpop.f32.mrb[0].mxu1 }
 0x158   :  { %v270_v25 = vadd.f32 %v4328_v24, %v4326_v23  ;;  %v4332_v26 = vpop.f32.mrb[1].mxu1  ;;  %v4351_v31 = vadd.f32 %v4328_v24, %v4291_v12 }
 0x159   :  { %v269_v27 = vadd.f32 %v4320_v22, %v4332_v26  ;;  %v4341_v29 = vadd.f32 %v4332_v26, %v4279_v9 }
 0x15a   :  { %358 = vrot.lane.b32.xlu1 %v270_v25, %s4141_s30 }
 0x15b   :  { %280 = vrot.lane.b32.xlu0 %v269_v27, %s4141_s30 }
 0x1cc   :  { %v359_v30 = vpop.permute.xlu1 %358 }
 0x1cd   :  { %v281_v28 = vpop.permute.xlu0 %280 }
 0x1ce   :  { %3698 = vmatpush3.xpose.msk.msra.mxu1 %vm177_vm0, %v281_v28 }
 0x1cf   :  { %3702 = vmatprep.subr.mxu1 %v4139_v21 }
 0x1d1   :  { %3700 = vmatmul.mubr.msk.f32.vlgmr.msra.gmra.mrb[2].mxu1 %vm177_vm0, %v4341_v29 }
 0x1d2   :  { %3703 = vmatpush3.xpose.msk.msra.mxu1 %vm177_vm0, %v359_v30  ;;  %3704 = vmatprep.mubr.msk.f32.mxu1 %vm4140_vm1, %v4139_v21 }
 0x1d3   :  { %3712 = vmatprep.subr.mxu1 %v4139_v21 }
 0x1d5   :  { %3705 = vmatmul.mubr.msk.f32.vlgmr.msra.gmra.mrb[4].mxu1 %vm177_vm0, %v4351_v31 }
 0x1d6   :  { %3714 = vmatprep.mubr.msk.f32.mxu1 %vm4140_vm1, %v4139_v21 }
 0x2a4   :  { %v353_v46 = vpop.f32.mrb[2].mxu1 }
 0x2a5   :  { %v435_v48 = vmul.f32 0.17677669, %v353_v46  ;;  %v3701_v49 = vpop.f32.mrb[3].mxu1 }
 0x2a6   :  { %v3950_v49 = vpack.c.bf16 %v711_v43, %v710_v41 }
 0x2a7   :  { %v437_v50 = vsel %vm4367_vm6, %v435_v48, -1e+12 }
 0x2a8   :  { %v431_v51 = vpop.f32.mrb[4].mxu1  ;;  %v440_v52 = vsel %vm439_vm7, %v437_v50, -inf }
 0x2a9   :  { %v436_v54 = vmul.f32 0.17677669, %v431_v51  ;;  %441 = vmax.xlane.f32.xlu0 %v440_v52  ;;  %v3706_v55 = vpop.f32.mrb[5].mxu1  ;;  %v793_v51 = vld [vmem:[%s5019_s13] sm:$0xff]  ;;  %v794_v52 = vld [vmem:[%s5019_s13 + $0x8] sm:$0xff] }
 0x2aa   :  { %v170_v55 = vld [vmem:[%s5018_s1 + $0x8] sm:$0xff] }
 0x2ab   :  { %v438_v56 = vsel %vm4374_vm9, %v436_v54, -1e+12  ;;  %v3954_v54 = vpack.c.bf16 %v794_v52, %v793_v51 }
 0x2ac   :  { %v443_v57 = vsel %vm439_vm7, %v438_v56, -inf }
 0x2ad   :  { %444 = vmax.xlane.f32.xlu1 %v443_v57  ;;  %v796_v57 = vld [vmem:[%s5019_s13 + $0x18] sm:$0xff] }
 0x2be   :  { %273 = vrot.lane.b32.xlu1 %v4291_v12, %s4144_s8 }
 0x2bf   :  { %271 = vrot.lane.b32.xlu0 %v4279_v9, %s4144_s8 }
 0x336   :  { %v442_v58 = vpop.xlane.xlu0 %441 }
 0x337   :  { %v446_v59 = vsub.f32 %v437_v50, %v442_v58  ;;  %v171_v50 = vmul.f32 %v169_v44, %v4301_v16  ;;  %v172_v58 = vmul.f32 %v170_v55, %v4311_v19 }
 0x339   :  { %v448_v60 = vmul.f32 1.442695, %v446_v59 }
 0x33a   :  { %v445_v61 = vpop.xlane.xlu1 %444  ;;  %v4389_v6 = vpop.permute.xlu0 %271 }
 0x33b   :  { %4088 = vpow2.f32 %v448_v60  ;;  %v447_v62 = vsub.f32 %v438_v56, %v445_v61  ;;  %v277_v9 = vadd.f32 %v4389_v6, %v4332_v26  ;;  %v795_v56 = vld [vmem:[%s5019_s13 + $0x10] sm:$0xff] }
 0x33c   :  { %v3958_v59 = vpack.c.bf16 %v796_v57, %v795_v56  ;;  %v1309_v57 = vld [vmem:[%s5021_s11] sm:$0xff] }
 0x33d   :  { %v450_v63 = vmul.f32 1.442695, %v447_v62 }
 0x33e   :  { %v4387_v5 = vpop.permute.xlu1 %273 }
 0x33f   :  { %4090 = vpow2.f32 %v450_v63  ;;  %v278_v8 = vadd.f32 %v4328_v24, %v4387_v5  ;;  %v3938_v24 = vpack.c.bf16 %v619_v14, %v618_v13 }
 0x345   :  { %v4089_v0 = vpop.eup %4088 }
 0x346   :  { %v452_v1 = vsel %vm439_vm7, %v4089_v0, 0.0 }
 0x347   :  { %453 = vadd.xlane.f32.xlu0 %v452_v1 }
 0x349   :  { %v4091_v2 = vpop.eup %4090 }
 0x34a   :  { %v455_v4 = vsel %vm439_vm7, %v4091_v2, 0.0 }
 0x34b   :  { %456 = vadd.xlane.f32.xlu1 %v455_v4 }
 0x35c   :  { %540 = vrot.lane.b32.xlu1 %v278_v8, %s4144_s8 }
 0x35d   :  { %463 = vrot.lane.b32.xlu0 %v277_v9, %s4144_s8 }
 0x3d4   :  { %v454_v12 = vpop.xlane.xlu0 %453 }
 0x3d5   :  { %4092 = vrcp.f32 %v454_v12 }
 0x3d8   :  { %v464_v15 = vpop.permute.xlu0 %463  ;;  %v457_v18 = vpop.xlane.xlu1 %456 }
 0x3d9   :  { %4094 = vrcp.f32 %v457_v18  ;;  %3708 = vmatpush3.msra.mxu0 %v464_v15 }
 0x3da   :  { %3760 = vmatprep.subr.mxu0 %v4139_v21 }
 0x3dc   :  { %v541_v25 = vpop.permute.xlu1 %540 }
 0x3dd   :  { %3713 = vmatpush3.msra.mxu1 %v541_v25 }
 0x3de   :  { %3939 = vmatprep.subr.bf16.mxu1 %v3938_v24 }
 0x3df   :  { %v4093_v26 = vpop.eup %4092 }
 0x3e0   :  { %v459_v27 = vmul.f32 %v4093_v26, %v4089_v0 }
 0x3e2   :  { %3710 = vmatmul.mubr.msk.f32.vlgmr.msra.gmra.mrb[0].mxu0 %vm439_vm7, %v459_v27 }
 0x3e3   :  { %v4095_v28 = vpop.eup %4094  ;;  %3762 = vmatprep.mubr.msk.f32.mxu0 %vm4140_vm1, %v4139_v21 }
 0x3e4   :  { %v461_v30 = vmul.f32 %v4095_v28, %v4091_v2 }
 0x3e6   :  { %3715 = vmatmul.mubr.msk.f32.vlgmr.msra.gmra.mrb[6].mxu1 %vm439_vm7, %v461_v30 }
 0x3e7   :  { %3941 = vmatpush3.bf16.msra.mxu1 %v3938_v24 }
 0x3e8   :  { %3943 = vmatprep.subr.bf16.mxu1 %v3942_v34 }
 0x3eb   :  { %3945 = vmatpush3.bf16.msra.mxu1 %v3942_v34 }
 0x3ec   :  { %3947 = vmatprep.subr.bf16.mxu1 %v3946_v37 }
 0x4b5   :  { %v535_v38 = vpop.f32.mrb[0].mxu0 }
 0x4b6   :  { %v616_v39 = vmul.f32 %v535_v38, %v4301_v16  ;;  %v3711_v40 = vpop.f32.mrb[1].mxu0 }
 0x4b8   :  { %3725 = vmatprep.mubr.msk.f32.mxu1 %vm177_vm0, %v616_v39 }
 0x4b9   :  { %v612_v45 = vpop.f32.mrb[6].mxu1 }
 0x4ba   :  { %v617_v46 = vmul.f32 %v612_v45, %v4311_v19  ;;  %v3716_v48 = vpop.f32.mrb[7].mxu1 }
 0x4bc   :  { %3726 = vmatmul.mubr.msk.f32.vlgmr.msra.gmra.mrb[8].mxu1 %vm177_vm0, %v617_v46 }
 0x4bd   :  { %3949 = vmatpush3.bf16.msra.mxu1 %v3946_v37  ;;  %3736 = vmatprep.mubr.msk.f32.mxu1 %vm177_vm0, %v171_v50 }
 0x4be   :  { %3951 = vmatprep.subr.bf16.mxu1 %v3950_v49 }
 0x4c1   :  { %3953 = vmatpush3.bf16.msra.mxu1 %v3950_v49 }
 0x4c2   :  { %3955 = vmatprep.subr.bf16.mxu1 %v3954_v54 }
 0x4c4   :  { %3737 = vmatmul.mubr.msk.f32.vlgmr.msra.gmra.mrb[10].mxu1 %vm177_vm0, %v172_v58  ;;  %v1310_v58 = vld [vmem:[%s5021_s11 + $0x8] sm:$0xff] }
 0x4c5   :  { %3957 = vmatpush3.bf16.msra.mxu1 %v3954_v54  ;;  %3747 = vmatprep.mubr.msk.f32.mxu1 %vm177_vm0, %v4341_v29 }
 0x4c6   :  { %3959 = vmatprep.subr.bf16.mxu1 %v3958_v59 }
 0x4c9   :  { %3961 = vmatpush3.bf16.msra.mxu1 %v3958_v59  ;;  %v3962_v59 = vpack.c.bf16 %v1310_v58, %v1309_v57 }
 0x4ca   :  { %3750 = vmatprep.subr.mxu1 %v4139_v21 }
 0x4cc   :  { %3748 = vmatmul.mubr.msk.f32.vlgmr.msra.gmra.mrb[12].mxu1 %vm177_vm0, %v4351_v31 }
 0x4cd   :  { %3752 = vmatprep.mubr.msk.f32.mxu1 %vm4140_vm1, %v4139_v21 }
 0x58f   :  { %v4459_v60 = vpop.f32.mrb[8].mxu1 }
 0x590   :  { %v4461_v61 = vpop.f32.mrb[9].mxu1 }
 0x597   :  { %v3738_v62 = vpop.f32.mrb[10].mxu1 }
 0x598   :  { %v784_v63 = vpop.f32.mrb[11].mxu1 }
 0x599   :  { %3751 = vmatpush3.xpose.msk.msra.mxu1 %vm177_vm0, %v784_v63 }
 0x59a   :  { %3755 = vmatprep.subr.mxu1 %v4139_v21 }
 0x59c   :  { %3753 = vmatmul.mubr.msk.f32.vlgmr.msra.gmra.mrb[14].mxu1 %vm177_vm0, %v4341_v29 }
 0x59d   :  { %3756 = vmatpush3.xpose.msk.msra.mxu1 %vm177_vm0, %v3738_v62  ;;  %3757 = vmatprep.mubr.msk.f32.mxu1 %vm4140_vm1, %v4139_v21 }
 0x59e   :  { %3765 = vmatprep.subr.mxu1 %v4139_v21 }
 0x59f   :  { %v3749_v0 = vpop.f32.mrb[12].mxu1 }
 0x5a0   :  { %v873_v1 = vmul.f32 0.17677669, %v3749_v0  ;;  %v863_v2 = vpop.f32.mrb[13].mxu1  ;;  %3758 = vmatmul.mubr.msk.f32.vlgmr.msra.gmra.mrb[16].mxu1 %vm177_vm0, %v4351_v31 }
 0x5a1   :  { %3767 = vmatprep.mubr.msk.f32.mxu1 %vm4140_vm1, %v4139_v21  ;;  %v872_v4 = vmul.f32 0.17677669, %v863_v2 }
 0x5a2   :  { %v1028_v29 = vsel %vm1024_vm10, %v873_v1, -inf }
 0x5a3   :  { %1029 = vmax.xlane.f32.xlu0 %v1028_v29  ;;  %v1025_v8 = vsel %vm1024_vm10, %v872_v4, -inf }
 0x5a7   :  { %1026 = vmax.xlane.f32.xlu0 %v1025_v8 }
 0x630   :  { %v1030_v27 = vpop.xlane.xlu0 %1029 }
 0x634   :  { %v1027_v28 = vpop.xlane.xlu0 %1026 }
 0x66f   :  { %v943_v9 = vpop.f32.mrb[14].mxu1 }
 0x670   :  { %v1020_v12 = vmul.f32 0.17677669, %v943_v9  ;;  %v3754_v13 = vpop.f32.mrb[15].mxu1 }
 0x672   :  { %v1022_v14 = vsel %vm4367_vm6, %v1020_v12, -1e+12 }
 0x673   :  { %v1016_v15 = vpop.f32.mrb[16].mxu1  ;;  %v1031_v18 = vsel %vm439_vm7, %v1022_v14, -inf }
 0x674   :  { %v1021_v31 = vmul.f32 0.17677669, %v1016_v15  ;;  %1032 = vmax.xlane.f32.xlu1 %v1031_v18  ;;  %v3759_v24 = vpop.f32.mrb[17].mxu1 }
 0x676   :  { %v1023_v25 = vsel %vm4374_vm9, %v1021_v31, -1e+12 }
 0x677   :  { %v1034_v26 = vsel %vm439_vm7, %v1023_v25, -inf }
 0x678   :  { %1035 = vmax.xlane.f32.xlu0 %v1034_v26 }
 0x685   :  { %1066 = vrot.lane.b32.xlu1 %v784_v63, %s4141_s30  ;;  %v1312_v63 = vld [vmem:[%s5021_s11 + $0x18] sm:$0xff] }
 0x68e   :  { %1142 = vrot.lane.b32.xlu0 %v3738_v62, %s4141_s30  ;;  %v1311_v62 = vld [vmem:[%s5021_s11 + $0x10] sm:$0xff] }
 0x68f   :  { %v3966_v0 = vpack.c.bf16 %v1312_v63, %v1311_v62 }
 0x701   :  { %v1033_v30 = vpop.xlane.xlu1 %1032 }
 0x702   :  { %v1037_v32 = vmax.f32 %v1027_v28, %v1033_v30 }
 0x704   :  { %v1039_v33 = vsub.f32 %v872_v4, %v1037_v32  ;;  %v1045_v34 = vsub.f32 %v1022_v14, %v1037_v32 }
 0x705   :  { %v1067_v36 = vpop.permute.xlu1 %1066  ;;  %v1036_v37 = vpop.xlane.xlu0 %1035 }
 0x706   :  { %v1041_v38 = vmul.f32 1.442695, %v1039_v33  ;;  %v1047_v39 = vmul.f32 1.442695, %v1045_v34  ;;  %v1038_v40 = vmax.f32 %v1030_v27, %v1036_v37  ;;  %3761 = vmatpush3.msra.mxu0 %v1067_v36  ;;  %v1416_v34 = vld [vmem:[%s5022_s3] sm:$0x3] }
 0x707   :  { %3770 = vmatprep.subr.msk.mxu0 %vm1224_vm11, %v1065_v35 }
 0x708   :  { %4096 = vpow2.f32 %v1041_v38  ;;  %v1040_v41 = vsub.f32 %v873_v1, %v1038_v40  ;;  %v1046_v43 = vsub.f32 %v1023_v25, %v1038_v40  ;;  %v3419_v38 = vld [vmem:[%s5024_s10] ss:$0 sm:$0xff] }
 0x709   :  { %4098 = vpow2.f32 %v1047_v39  ;;  %v1143_v44 = vpop.permute.xlu0 %1142  ;;  %v705_v39 = vadd.f32 %v4459_v60, %v3419_v38  ;;  %v700_v40 = vadd.f32 %v3419_v38, %v4461_v61  ;;  %v1507_v38 = vld [vmem:[%s5029_s4] sm:$0x3] }
 0x70a   :  { %v1043_v45 = vmul.f32 1.442695, %v1040_v41  ;;  %v1049_v46 = vmul.f32 1.442695, %v1046_v43  ;;  %3766 = vmatpush3.msra.mxu1 %v1143_v44  ;;  %v3435_v43 = vld [vmem:[%s5025_s12] ss:$0 sm:$0xff] }
 0x70c   :  { %4100 = vpow2.f32 %v1043_v45 }
 0x70d   :  { %4102 = vpow2.f32 %v1049_v46 }
 0x712   :  { %v4097_v48 = vpop.eup %4096 }
 0x713   :  { %v4099_v49 = vpop.eup %4098  ;;  %v1051_v50 = vsel %vm1024_vm10, %v4097_v48, 0.0 }
 0x714   :  { %3763 = vmatmul.mubr.msk.f32.vlgmr.msra.gmra.mrb[2].mxu0 %vm439_vm7, %v4099_v49  ;;  %v1057_v51 = vsel %vm439_vm7, %v4099_v49, 0.0  ;;  %1052 = vadd.xlane.f32.xlu1 %v1051_v50  ;;  %v3438_v50 = vld [vmem:[%s5026_s15] ss:$0 sm:$0xff] }
 0x715   :  { %3771 = vmatpush3.msk.msra.mxu0 %vm1224_vm11, %v1065_v35  ;;  %1058 = vadd.xlane.f32.xlu0 %v1057_v51  ;;  %v3439_v35 = vld [vmem:[%s5023_s16] ss:$0 sm:$0xff] }
 0x716   :  { %v4101_v52 = vpop.eup %4100  ;;  %3772 = vmatprep.mubr.msk.f32.mxu0 %vm1024_vm10, %v4097_v48  ;;  %3963 = vmatprep.subr.bf16.mxu0 %v3962_v59  ;;  %v1422_v36 = vmul.f32 %v3439_v35, %v1416_v34  ;;  %v1503_v35 = vld [vmem:[%s5028_s17] sm:$0xff] }
 0x717   :  { %v4103_v54 = vpop.eup %4102  ;;  %v1054_v55 = vsel %vm1024_vm10, %v4101_v52, 0.0 }
 0x718   :  { %3768 = vmatmul.mubr.msk.f32.vlgmr.msra.gmra.mrb[18].mxu1 %vm439_vm7, %v4103_v54  ;;  %3773 = vmatmul.mubr.msk.f32.vlgmr.msra.gmra.mrb[4].mxu0 %vm1024_vm10, %v4101_v52  ;;  %v1060_v56 = vsel %vm439_vm7, %v4103_v54, 0.0  ;;  %v1424_v37 = vsel %vm1423_vm12, %v1422_v36, 0.0  ;;  %v1504_v36 = vld [vmem:[%s5028_s17 + $0x8] sm:$0xff] }
 0x719   :  { %1061 = vadd.xlane.f32.xlu0 %v1060_v56  ;;  %1055 = vadd.xlane.f32.xlu1 %v1054_v55 }
 0x71a   :  { %3794 = vmatprep.mubr.msk.f32.mxu1 %vm4140_vm1, %v4139_v21  ;;  %3965 = vmatpush3.bf16.msra.mxu0 %v3962_v59 }
 0x71b   :  { %3967 = vmatprep.subr.bf16.mxu0 %v3966_v0 }
 0x71d   :  { %1425 = vadd.xlane.f32.xlu1 %v1424_v37 }
 0x71e   :  { %3969 = vmatpush3.bf16.msra.mxu0 %v3966_v0 }
 0x7a1   :  { %v1053_v1 = vpop.xlane.xlu1 %1052 }
 0x7a2   :  { %v1059_v2 = vpop.xlane.xlu0 %1058 }
 0x7a3   :  { %v1063_v9 = vadd.f32 %v1059_v2, %v1053_v1  ;;  %v4540_v1 = vsub.s32 %v4361_v42, %v4263_v3 }
 0x7a6   :  { %v1056_v4 = vpop.xlane.xlu1 %1055  ;;  %v1062_v29 = vpop.xlane.xlu0 %1061 }
 0x7a7   :  { %v1064_v8 = vadd.f32 %v1062_v29, %v1056_v4 }
 0x7a9   :  { %4104 = vrcp.f32 %v1064_v8 }
 0x7aa   :  { %4106 = vrcp.f32 %v1063_v9  ;;  %v1426_v56 = vpop.xlane.xlu1 %1425 }
 0x7ab   :  { %v1435_v57 = vrot.slane %v1426_v56, %v4285_v11  ;;  %v1431_v58 = vrot.slane %v1426_v56, %v4282_v10 }
 0x7b3   :  { %v4105_v25 = vpop.eup %4104 }
 0x7b4   :  { %v4107_v27 = vpop.eup %4106 }
 0x7e7   :  { %v1138_v12 = vpop.f32.mrb[2].mxu0 }
 0x7e8   :  { %v3764_v13 = vpop.f32.mrb[3].mxu0 }
 0x7eb   :  { %v1214_v14 = vpop.f32.mrb[18].mxu1  ;;  %v3774_v15 = vpop.f32.mrb[4].mxu0 }
 0x7ec   :  { %v1300_v18 = vadd.f32 %v3774_v15, %v1214_v14  ;;  %v3769_v31 = vpop.f32.mrb[19].mxu1  ;;  %v1294_v24 = vpop.f32.mrb[5].mxu0 }
 0x7ed   :  { %v1295_v26 = vadd.f32 %v1294_v24, %v1138_v12  ;;  %v1508_v24 = vld [vmem:[%s5027_s18] sm:$0xff] }
 0x7ee   :  { %v1306_v28 = vmul.f32 %v4105_v25, %v1300_v18  ;;  %v1509_v25 = vld [vmem:[%s5027_s18 + $0x8] sm:$0xff] }
 0x7ef   :  { %v1304_v30 = vmul.f32 %v4107_v27, %v1295_v26  ;;  %v3971_v26 = vpack.c.bf16 %v1509_v25, %v1508_v24  ;;  %v4145_v27 = vmov 0.0|0.0  }
 0x7f0   :  { %v1308_v33 = vmul.f32 %v1306_v28, %v4311_v19  ;;  %3970 = vmatprep.subr.bf16.mxu1 %v4145_v27  ;;  %v1510_v28 = vld [vmem:[%s5027_s18 + $0x10] sm:$0xff] }
 0x7f1   :  { %v1307_v32 = vmul.f32 %v1304_v30, %v4301_v16  ;;  %3972 = vmatpush3.bf16.msra.mxu1 %v3971_v26  ;;  %v1511_v30 = vld [vmem:[%s5027_s18 + $0x18] sm:$0xff] }
 0x7f2   :  { %3973 = vmatprep.subr.bf16.mxu1 %v4145_v27 }
 0x7f3   :  { %3783 = vmatprep.mubr.msk.f32.mxu0 %vm177_vm0, %v1307_v32  ;;  %v3974_v32 = vpack.c.bf16 %v1511_v30, %v1510_v28 }
 0x7f4   :  { %3784 = vmatmul.mubr.msk.f32.vlgmr.msra.gmra.mrb[6].mxu0 %vm177_vm0, %v1308_v33 }
 0x7f5   :  { %3975 = vmatpush3.bf16.msra.mxu1 %v3974_v32 }
 0x7f6   :  { %3976 = vmatprep.subr.bf16.mxu1 %v4145_v27 }
 0x7f8   :  { %3795 = vmatmul.mubr.msk.f32.vlgmr.msra.gmra.mrb[20].mxu1 %vm177_vm0, %v1507_v38 }
 0x7f9   :  { %3805 = vmatprep.mubr.msk.f32.mxu1 %vm4140_vm1, %v4139_v21 }
 0x8c7   :  { %v3785_v41 = vpop.f32.mrb[6].mxu0 }
 0x8c8   :  { %v4035_v44 = vadd.f32 %v3785_v41, %v705_v39  ;;  %v1390_v45 = vpop.f32.mrb[7].mxu0  ;;  %v3977_v39 = vpack.c.bf16 %v1504_v36, %v1503_v35  ;;  %v1506_v41 = vld [vmem:[%s5028_s17 + $0x18] sm:$0xff] }
 0x8c9   :  { %v4038_v46 = vadd.f32 %v1390_v45, %v700_v40  ;;  %v1505_v40 = vld [vmem:[%s5028_s17 + $0x10] sm:$0xff]  ;;  %v3465_v45 = vld [vmem:[%s5045_s26 + $0x20] sm:$0xff]  ;;  %v3468_v36 = vld [vmem:[%s5045_s26 + $0x38] sm:$0xff] }
 0x8ca   :  { %v4036_v48 = vadd.f32 %v4035_v44, %v3435_v43  ;;  %3978 = vmatpush3.bf16.msra.mxu1 %v3977_v39  ;;  %v3980_v44 = vpack.c.bf16 %v1506_v41, %v1505_v40 }
 0x8cb   :  { %v4039_v49 = vadd.f32 %v4038_v46, %v3435_v43  ;;  %3979 = vmatprep.subr.bf16.mxu1 %v4145_v27  ;;  %v3466_v46 = vld [vmem:[%s5045_s26 + $0x28] sm:$0xff] }
 0x8cc   :  { %v1402_v51 = vmax.f32 %v4036_v48, 0.0  ;;  %v4592_v48 = vpack.c.bf16 %v3466_v46, %v3465_v45  ;;  %v1581_v45 = vpop.f32.mrb[20].mxu1 }
 0x8cd   :  { %v1401_v52 = vmax.f32 %v4039_v49, 0.0  ;;  %v4598_v49 = vld [vmem:[%s5030_s6 + $0x40] sm:$0xff]   ;;  %v3796_v46 = vpop.f32.mrb[21].mxu1 }
 0x8ce   :  { %v1409_v54 = vmul.f32 %v3438_v50, %v1402_v51  ;;  %3981 = vmatpush3.bf16.msra.mxu1 %v3980_v44  ;;  %4046 = vmatprep.subr.msk.bf16.mxu0 %vm177_vm0, %v4598_v49  ;;  %v4608_v51 = vld [vmem:[%s5030_s6 + $0x48] sm:$0xff]  }
 0x8cf   :  { %v1408_v60 = vmul.f32 %v3438_v50, %v1401_v52  ;;  %3983 = vmatprep.subr.bf16.mxu1 %v4592_v48  ;;  %v4073_v50 = vld [vmem:[%s5030_s6] sm:$0xff]  }
 0x8d0   :  { %v1413_v61 = vsel %vm177_vm0, %v1409_v54, 0.0  ;;  %v4611_v52 = vsel %vm177_vm0, %v4073_v50, 0  ;;  %v4075_v54 = vld [vmem:[%s5030_s6 + $0x8] sm:$0xff]   ;;  %v4087_v50 = vld [vmem:[%s5030_s6 + $0x38] sm:$0xff]  }
 0x8d1   :  { %1414 = vadd.xlane.f32.xlu1 %v1413_v61  ;;  %v1410_v55 = vsel %vm177_vm0, %v1408_v60, 0.0  ;;  %3592 = vmatpush3.bf16.xpose.msra.mxu0 %v4611_v52  ;;  %v4620_v60 = vsel %vm177_vm0, %v4075_v54, 0  ;;  %v4625_v61 = vld [vmem:[%s5030_s6 + $0x50] sm:$0xff]   ;;  %v4736_v54 = vsel %vm177_vm0, %v4087_v50, 0 }
 0x8d2   :  { %1411 = vadd.xlane.f32.xlu0 %v1410_v55  ;;  %4047 = vmatprep.subr.msk.bf16.mxu0 %vm177_vm0, %v4608_v51  ;;  %v4077_v55 = vld [vmem:[%s5030_s6 + $0x10] sm:$0xff]  }
 0x8d3   :  { %v4634_v56 = vsel %vm177_vm0, %v4077_v55, 0 }
 0x8d9   :  { %3594 = vmatpush3.bf16.xpose.msra.mxu0 %v4620_v60 }
 0x8da   :  { %4048 = vmatprep.subr.msk.bf16.mxu0 %vm177_vm0, %v4625_v61 }
 0x8e1   :  { %3596 = vmatpush3.bf16.xpose.msra.mxu0 %v4634_v56 }
 0x95e   :  { %v1415_v59 = vpop.xlane.xlu1 %1414 }
 0x95f   :  { %v1439_v62 = vadd.f32 %v1435_v57, %v1415_v59  ;;  %v1412_v63 = vpop.xlane.xlu0 %1411  ;;  %v4639_v57 = vld [vmem:[%s5030_s6 + $0x58] sm:$0xff]  }
 0x960   :  { %v1438_v0 = vadd.f32 %v1431_v58, %v1412_v63  ;;  %4049 = vmatprep.subr.msk.bf16.mxu0 %vm177_vm0, %v4639_v57  ;;  %v4079_v58 = vld [vmem:[%s5030_s6 + $0x18] sm:$0xff]   ;;  %v4081_v63 = vld [vmem:[%s5030_s6 + $0x20] sm:$0xff]  }
 0x961   :  { %1447 = vperm.xlu1 %4071, %v1439_v62   ;;  %v4648_v59 = vsel %vm177_vm0, %v4079_v58, 0  ;;  %v4653_v62 = vld [vmem:[%s5030_s6 + $0x60] sm:$0xff]  }
 0x962   :  { %1444 = vperm.xlu0 %4070, %v1438_v0   ;;  %3598 = vmatpush3.bf16.xpose.msra.mxu0 %v4648_v59  ;;  %v4662_v0 = vsel %vm177_vm0, %v4081_v63, 0  ;;  %v3442_v58 = vld [vmem:[%s5031_s19] ss:$0 sm:$0xff] }
 0x963   :  { %4050 = vmatprep.subr.msk.bf16.mxu0 %vm177_vm0, %v4653_v62 }
 0x96a   :  { %3600 = vmatpush3.bf16.xpose.msra.mxu0 %v4662_v0 }
 0x9e0   :  { %v1448_v2 = vpop.permute.xlu1 %1447 }
 0x9e1   :  { %v1456_v4 = vrot.slane %v1448_v2, %v4540_v1  ;;  %v1445_v29 = vpop.permute.xlu0 %1444  ;;  %v4667_v2 = vld [vmem:[%s5030_s6 + $0x68] sm:$0xff]  }
 0x9e2   :  { %v1452_v8 = vrot.slane %v1445_v29, %v4540_v1  ;;  %4051 = vmatprep.subr.msk.bf16.mxu0 %vm177_vm0, %v4667_v2 }
 0x9e4   :  { %v1458_v9 = vsel %vm1457_vm13, %v1456_v4, %v1452_v8  ;;  %v4083_v4 = vld [vmem:[%s5030_s6 + $0x28] sm:$0xff]   ;;  %v4682_v8 = vld [vmem:[%s5030_s6 + $0x70] sm:$0xff]  }
 0x9e5   :  { %v1460_v12 = vsel %vm1440_vm14, %v1458_v9, -1e+12  ;;  %v4676_v29 = vsel %vm177_vm0, %v4083_v4, 0  ;;  %v4085_v9 = vld [vmem:[%s5030_s6 + $0x30] sm:$0xff]  }
 0x9e6   :  { %v1462_v13 = vsel %vm1461_vm15, %v1460_v12, -inf  ;;  %3602 = vmatpush3.bf16.xpose.msra.mxu0 %v4676_v29 }
 0x9e7   :  { %1463 = vmax.xlane.f32.xlu1 %v1462_v13  ;;  %4052 = vmatprep.subr.msk.bf16.mxu0 %vm177_vm0, %v4682_v8 }
 0xa74   :  { %v1464_v3 = vpop.xlane.xlu1 %1463 }
 0xa75   :  { %v1465_v42 = vsub.f32 %v1460_v12, %v1464_v3  ;;  %v4690_v12 = vsel %vm177_vm0, %v4085_v9, 0 }
 0xa76   :  { %3604 = vmatpush3.bf16.xpose.msra.mxu0 %v4690_v12 }
 0xa77   :  { %v1466_v14 = vmul.f32 1.442695, %v1465_v42 }
 0xa79   :  { %4108 = vpow2.f32 %v1466_v14 }
 0xa83   :  { %v4109_v15 = vpop.eup %4108 }
 0xa84   :  { %v1468_v18 = vsel %vm1461_vm15, %v4109_v15, 0.0 }
 0xa85   :  { %1469 = vadd.xlane.f32.xlu0 %v1468_v18 }
 0xb12   :  { %v1470_v31 = vpop.xlane.xlu0 %1469 }
 0xb13   :  { %4110 = vrcp.f32 %v1470_v31 }
 0xb1d   :  { %v4111_v33 = vpop.eup %4110 }
 0xb1e   :  { %v1472_v34 = vmul.f32 %v4111_v33, %v4109_v15 }
 0xb20   :  { %v1476_v37 = vrot.slane %v1472_v34, %v4282_v10  ;;  %v1483_v43 = vrot.slane %v1472_v34, %v4285_v11 }
 0xb22   :  { %1478 = vbcast.lane.b32.xlu1 %v1476_v37, 256 }
 0xb26   :  { %1485 = vbcast.lane.b32.xlu1 %v1483_v43, 256  ;;  %v3462_v43 = vld [vmem:[%s5048_s29 + $0x18] sm:$0xff] }
 0xb27   :  { %v4718_v44 = vmul.f32 %v3462_v43, %v4311_v19 }
 0xb94   :  { %v1479_v13 = vpop.permute.xlu1 %1478 }
 0xb95   :  { %v1487_v3 = vmul.f32 %v1479_v13, %v4304_v17  ;;  %v3467_v17 = vld [vmem:[%s5045_s26 + $0x30] sm:$0xff] }
 0xb96   :  { %v3986_v39 = vpack.c.bf16 %v3468_v36, %v3467_v17 }
 0xb97   :  { %v1489_v42 = vsel %vm177_vm0, %v1487_v3, 0.0 }
 0xb98   :  { %v1490_v14 = vrot.slane %v1489_v42, 4  ;;  %v1486_v15 = vpop.permute.xlu1 %1485 }
 0xb99   :  { %v1488_v18 = vmul.f32 %v1486_v15, %v4314_v20  ;;  %v3461_v20 = vld [vmem:[%s5048_s29 + $0x10] sm:$0xff] }
 0xb9a   :  { %v1491_v31 = vadd.f32 %v1490_v14, %v1489_v42  ;;  %v4708_v41 = vmul.f32 %v3461_v20, %v4301_v16 }
 0xb9b   :  { %v1496_v24 = vsel %vm177_vm0, %v1488_v18, 0.0 }
 0xb9c   :  { %v1492_v25 = vrot.slane %v1491_v31, 2  ;;  %v1497_v26 = vrot.slane %v1496_v24, 4 }
 0xb9e   :  { %v1493_v28 = vadd.f32 %v1492_v25, %v1491_v31  ;;  %v1498_v30 = vadd.f32 %v1497_v26, %v1496_v24  ;;  %v4136_v31 = vld [vmem:[%s5047_s24] sm:$0xff] }
 0xba0   :  { %v1499_v32 = vrot.slane %v1498_v30, 2  ;;  %v1494_v33 = vrot.slane %v1493_v28, 1 }
 0xba2   :  { %v1500_v34 = vadd.f32 %v1499_v32, %v1498_v30  ;;  %v1495_v37 = vadd.f32 %v1494_v33, %v1493_v28 }
 0xba4   :  { %v1501_v35 = vrot.slane %v1500_v34, 1 }
 0xba6   :  { %v1502_v38 = vadd.f32 %v1501_v35, %v1500_v34 }
 0xba8   :  { %v1587_v40 = vsel %vm1457_vm13, %v1502_v38, %v1495_v37 }
 0xba9   :  { %3806 = vmatmul.mubr.msk.f32.vlgmr.msra.gmra.mrb[22].mxu1 %vm177_vm0, %v1587_v40 }
 0xbaa   :  { %3985 = vmatpush3.bf16.msra.mxu1 %v4592_v48  ;;  %3816 = vmatprep.mubr.msk.f32.mxu1 %vm177_vm0, %v4708_v41  ;;  %v4728_v48 = vld [vmem:[%s5030_s6 + $0x78] sm:$0xff]  }
 0xbab   :  { %3987 = vmatprep.subr.bf16.mxu1 %v3986_v39  ;;  %4053 = vmatprep.subr.msk.bf16.mxu0 %vm177_vm0, %v4728_v48 }
 0xbac   :  { %3606 = vmatpush3.bf16.xpose.msra.mxu0 %v4736_v54 }
 0xbad   :  { %4022 = vmatprep.subr.bf16.mxu0 %v4145_v27 }
 0xbae   :  { %3989 = vmatpush3.bf16.msra.mxu1 %v3986_v39 }
 0xbaf   :  { %3819 = vmatprep.subr.mxu1 %v4139_v21 }
 0xbb1   :  { %3817 = vmatmul.mubr.msk.f32.vlgmr.msra.gmra.mrb[24].mxu1 %vm177_vm0, %v4718_v44 }
 0xbb2   :  { %3821 = vmatprep.mubr.msk.f32.mxu1 %vm4140_vm1, %v4139_v21 }
 0xc7c   :  { %v1656_v55 = vpop.f32.mrb[22].mxu1 }
 0xc7d   :  { %v1657_v63 = vadd.f32 %v1656_v55, %v1581_v45  ;;  %v3807_v4 = vpop.f32.mrb[23].mxu1 }
 0xc7f   :  { %v1665_v9 = vadd.f32 %v3442_v58, %v1657_v63 }
 0xc81   :  { %1666 = vst.msk [vmem:[%s5032_s20] sm:$0x3] %vm1423_vm12, %v1665_v9  ;;  %v1667_v13 = vpack.c.bf16 %v1665_v9, %v1665_v9 }
 0xc83   :  { %3607 = vmatprep.mubr.msk.bf16.mxu0 %vm177_vm0, %v1667_v13 }
 0xc84   :  { %v3818_v3 = vpop.f32.mrb[24].mxu1  ;;  %3608 = vmatmul.mubr.msk.bf16.vlgmr.msra.gmra.mrb[8].mxu0 %vm177_vm0, %v1667_v13 }
 0xc85   :  { %v1951_v42 = vadd.f32 %v3818_v3, %v4326_v23  ;;  %v1939_v14 = vpop.f32.mrb[25].mxu1  ;;  %3916 = vmatprep.mubr.msk.f32.mxu0 %vm4140_vm1, %v4139_v21  ;;  %v1953_v45 = vadd.f32 %v3818_v3, %v4387_v5 }
 0xc86   :  { %v1950_v15 = vadd.f32 %v1939_v14, %v4320_v22  ;;  %v4759_v24 = vadd.f32 %v4136_v31, %v1939_v14  ;;  %v4137_v22 = vld [vmem:[%s5047_s24 + $0x8] sm:$0xff]  ;;  %v1952_v5 = vadd.f32 %v1939_v14, %v4389_v6 }
 0xc87   :  { %2033 = vrot.lane.b32.xlu1 %v1951_v42, %s4141_s30  ;;  %v4770_v25 = vadd.f32 %v4137_v22, %v3818_v3  ;;  %v3478_v22 = vld [vmem:[%s5053_s7 + $0x28] sm:$0xff] }
 0xc88   :  { %1955 = vrot.lane.b32.xlu0 %v1950_v15, %s4141_s30 }
 0xcf9   :  { %v2034_v23 = vpop.permute.xlu1 %2033 }
 0xcfa   :  { %v1956_v18 = vpop.permute.xlu0 %1955 }
 0xcfb   :  { %3820 = vmatpush3.xpose.msk.msra.mxu1 %vm177_vm0, %v1956_v18 }
 0xcfc   :  { %3824 = vmatprep.subr.mxu1 %v4139_v21 }
 0xcfe   :  { %3822 = vmatmul.mubr.msk.f32.vlgmr.msra.gmra.mrb[26].mxu1 %vm177_vm0, %v4759_v24 }
 0xcff   :  { %3825 = vmatpush3.xpose.msk.msra.mxu1 %vm177_vm0, %v2034_v23  ;;  %3826 = vmatprep.mubr.msk.f32.mxu1 %vm4140_vm1, %v4139_v21  ;;  %v3477_v23 = vld [vmem:[%s5053_s7 + $0x20] sm:$0xff] }
 0xd00   :  { %3829 = vmatprep.subr.mxu1 %v4139_v21  ;;  %v3990_v14 = vpack.c.bf16 %v3478_v22, %v3477_v23 }
 0xd02   :  { %3827 = vmatmul.mubr.msk.f32.vlgmr.msra.gmra.mrb[28].mxu1 %vm177_vm0, %v4770_v25 }
 0xd03   :  { %3831 = vmatprep.mubr.msk.f32.mxu1 %vm4140_vm1, %v4139_v21 }
 0xd57   :  { %v1833_v26 = vpop.f32.mrb[8].mxu0 }
 0xd58   :  { %v1835_v28 = vpop.f32.mrb[9].mxu0 }
 0xd59   :  { %v1842_v30 = vcombine.low %v1833_v26, %v1835_v28  ;;  %v1837_v32 = vpop.f32.mrb[10].mxu0 }
 0xd5a   :  { %v1838_v33 = vpop.f32.mrb[11].mxu0 }
 0xd5b   :  { %3460 = vst.sshfl [vmem:[%s5033_s21] sm:$0x33 pattern:$0x76325410] %v1842_v30  ;;  %v3479_v33 = vld [vmem:[%s5053_s7 + $0x30] sm:$0xff] }
 0xdd1   :  { %v2028_v34 = vpop.f32.mrb[26].mxu1 }
 0xdd2   :  { %v2110_v35 = vmul.f32 0.17677669, %v2028_v34  ;;  %v3823_v17 = vpop.f32.mrb[27].mxu1  ;;  %v3480_v34 = vld [vmem:[%s5053_s7 + $0x38] sm:$0xff] }
 0xdd3   :  { %v3484_v17 = vld [vmem:[%s5054_s23 + $0x20] sm:$0xff] }
 0xdd4   :  { %v2112_v36 = vsel %vm4367_vm6, %v2110_v35, -1e+12  ;;  %v3994_v35 = vpack.c.bf16 %v3480_v34, %v3479_v33 }
 0xdd5   :  { %v2106_v20 = vpop.f32.mrb[28].mxu1  ;;  %v2114_v37 = vsel %vm439_vm7, %v2112_v36, -inf }
 0xdd6   :  { %v2111_v38 = vmul.f32 0.17677669, %v2106_v20  ;;  %2115 = vmax.xlane.f32.xlu1 %v2114_v37  ;;  %v3828_v39 = vpop.f32.mrb[29].mxu1 }
 0xdd8   :  { %v2113_v40 = vsel %vm4374_vm9, %v2111_v38, -1e+12 }
 0xdd9   :  { %v2117_v43 = vsel %vm439_vm7, %v2113_v40, -inf }
 0xdda   :  { %2118 = vmax.xlane.f32.xlu0 %v2117_v43  ;;  %v3487_v43 = vld [vmem:[%s5054_s23 + $0x38] sm:$0xff] }
 0xdf0   :  { %2214 = vrot.lane.b32.xlu0 %v1953_v45, %s4144_s8  ;;  %v3463_v45 = vld [vmem:[%s5018_s1 + $0x10] sm:$0xff] }
 0xe63   :  { %v2116_v46 = vpop.xlane.xlu1 %2115 }
 0xe64   :  { %v2120_v50 = vsub.f32 %v2112_v36, %v2116_v46  ;;  %v3485_v36 = vld [vmem:[%s5054_s23 + $0x28] sm:$0xff] }
 0xe65   :  { %v3998_v20 = vpack.c.bf16 %v3485_v36, %v3484_v17 }
 0xe66   :  { %v2122_v55 = vmul.f32 1.442695, %v2120_v50 }
 0xe67   :  { %v2119_v58 = vpop.xlane.xlu0 %2118 }
 0xe68   :  { %4112 = vpow2.f32 %v2122_v55  ;;  %v2121_v63 = vsub.f32 %v2113_v40, %v2119_v58  ;;  %v3486_v40 = vld [vmem:[%s5054_s23 + $0x30] sm:$0xff] }
 0xe69   :  { %v4002_v58 = vpack.c.bf16 %v3487_v43, %v3486_v40 }
 0xe6a   :  { %v2124_v4 = vmul.f32 1.442695, %v2121_v63  ;;  %v1860_v63 = vmul.f32 %v3463_v45, %v4301_v16 }
 0xe6b   :  { %v2215_v28 = vpop.permute.xlu0 %2214 }
 0xe6c   :  { %4114 = vpow2.f32 %v2124_v4  ;;  %v3490_v4 = vld [vmem:[%s5019_s13 + $0x20] sm:$0xff] }
 0xe72   :  { %v4113_v9 = vpop.eup %4112 }
 0xe73   :  { %v2126_v13 = vsel %vm439_vm7, %v4113_v9, 0.0 }
 0xe74   :  { %2127 = vadd.xlane.f32.xlu1 %v2126_v13 }
 0xe76   :  { %v4115_v42 = vpop.eup %4114 }
 0xe77   :  { %v2129_v15 = vsel %vm439_vm7, %v4115_v42, 0.0 }
 0xe78   :  { %2130 = vadd.xlane.f32.xlu1 %v2129_v15  ;;  %v3492_v15 = vld [vmem:[%s5019_s13 + $0x30] sm:$0xff] }
 0xe89   :  { %2137 = vrot.lane.b32.xlu1 %v1952_v5, %s4144_s8  ;;  %v3493_v5 = vld [vmem:[%s5019_s13 + $0x38] sm:$0xff] }
 0xf01   :  { %v2128_v3 = vpop.xlane.xlu1 %2127 }
 0xf02   :  { %4116 = vrcp.f32 %v2128_v3 }
 0xf05   :  { %v2131_v18 = vpop.xlane.xlu1 %2130 }
 0xf06   :  { %4118 = vrcp.f32 %v2131_v18  ;;  %v4010_v18 = vpack.c.bf16 %v3493_v5, %v3492_v15 }
 0xf09   :  { %v2138_v31 = vpop.permute.xlu1 %2137 }
 0xf0a   :  { %3830 = vmatpush3.msra.mxu1 %v2138_v31 }
 0xf0b   :  { %3834 = vmatprep.subr.mxu1 %v4139_v21 }
 0xf0c   :  { %v4117_v26 = vpop.eup %4116 }
 0xf0d   :  { %v2133_v6 = vmul.f32 %v4117_v26, %v4113_v9  ;;  %v3491_v9 = vld [vmem:[%s5019_s13 + $0x28] sm:$0xff] }
 0xf0e   :  { %v4006_v13 = vpack.c.bf16 %v3491_v9, %v3490_v4 }
 0xf0f   :  { %3832 = vmatmul.mubr.msk.f32.vlgmr.msra.gmra.mrb[30].mxu1 %vm439_vm7, %v2133_v6 }
 0xf10   :  { %v4119_v30 = vpop.eup %4118  ;;  %3835 = vmatpush3.msra.mxu1 %v2215_v28  ;;  %3836 = vmatprep.mubr.msk.f32.mxu1 %vm4140_vm1, %v4139_v21 }
 0xf11   :  { %v2135_v32 = vmul.f32 %v4119_v30, %v4115_v42  ;;  %3991 = vmatprep.subr.bf16.mxu1 %v3990_v14  ;;  %v3464_v42 = vld [vmem:[%s5018_s1 + $0x18] sm:$0xff] }
 0xf12   :  { %v1861_v3 = vmul.f32 %v3464_v42, %v4311_v19 }
 0xf13   :  { %3837 = vmatmul.mubr.msk.f32.vlgmr.msra.gmra.mrb[32].mxu1 %vm439_vm7, %v2135_v32 }
 0xf14   :  { %3993 = vmatpush3.bf16.msra.mxu1 %v3990_v14 }
 0xf15   :  { %3995 = vmatprep.subr.bf16.mxu1 %v3994_v35 }
 0xf18   :  { %3997 = vmatpush3.bf16.msra.mxu1 %v3994_v35 }
 0xf19   :  { %3999 = vmatprep.subr.bf16.mxu1 %v3998_v20 }
 0xfe2   :  { %v2209_v37 = vpop.f32.mrb[30].mxu1 }
 0xfe3   :  { %v2290_v38 = vmul.f32 %v2209_v37, %v4301_v16  ;;  %v3833_v39 = vpop.f32.mrb[31].mxu1 }
 0xfe5   :  { %3847 = vmatprep.mubr.msk.f32.mxu1 %vm177_vm0, %v2290_v38 }
 0xfe6   :  { %v2286_v46 = vpop.f32.mrb[32].mxu1 }
 0xfe7   :  { %v2291_v50 = vmul.f32 %v2286_v46, %v4311_v19  ;;  %v3838_v55 = vpop.f32.mrb[33].mxu1 }
 0xfe9   :  { %3848 = vmatmul.mubr.msk.f32.vlgmr.msra.gmra.mrb[34].mxu1 %vm177_vm0, %v2291_v50 }
 0xfea   :  { %4001 = vmatpush3.bf16.msra.mxu1 %v3998_v20  ;;  %3858 = vmatprep.mubr.msk.f32.mxu1 %vm177_vm0, %v1860_v63 }
 0xfeb   :  { %4003 = vmatprep.subr.bf16.mxu1 %v4002_v58 }
 0xfee   :  { %4005 = vmatpush3.bf16.msra.mxu1 %v4002_v58 }
 0xfef   :  { %4007 = vmatprep.subr.bf16.mxu1 %v4006_v13 }
 0xff1   :  { %3859 = vmatmul.mubr.msk.f32.vlgmr.msra.gmra.mrb[36].mxu1 %vm177_vm0, %v1861_v3  ;;  %v3500_v3 = vld [vmem:[%s5020_s14 + $0x4] sm:$0xf] }
 0xff2   :  { %4009 = vmatpush3.bf16.msra.mxu1 %v4006_v13  ;;  %3869 = vmatprep.mubr.msk.f32.mxu1 %vm177_vm0, %v4759_v24 }
 0xff3   :  { %4011 = vmatprep.subr.bf16.mxu1 %v4010_v18 }
 0xff6   :  { %4013 = vmatpush3.bf16.msra.mxu1 %v4010_v18 }
 0xff7   :  { %3872 = vmatprep.subr.mxu1 %v4139_v21 }
 0xff9   :  { %3870 = vmatmul.mubr.msk.f32.vlgmr.msra.gmra.mrb[38].mxu1 %vm177_vm0, %v4770_v25 }
 0xffa   :  { %3874 = vmatprep.mubr.msk.f32.mxu1 %vm4140_vm1, %v4139_v21 }
0x10c4   :  { %v3860_v31 = vpop.f32.mrb[36].mxu1 }
0x10c5   :  { %v2460_v23 = vpop.f32.mrb[37].mxu1 }
0x10c6   :  { %3873 = vmatpush3.xpose.msk.msra.mxu1 %vm177_vm0, %v2460_v23 }
0x10c7   :  { %3877 = vmatprep.subr.mxu1 %v4139_v21 }
0x10c9   :  { %3875 = vmatmul.mubr.msk.f32.vlgmr.msra.gmra.mrb[40].mxu1 %vm177_vm0, %v4759_v24 }
0x10ca   :  { %3878 = vmatpush3.xpose.msk.msra.mxu1 %vm177_vm0, %v3860_v31  ;;  %3879 = vmatprep.mubr.msk.f32.mxu1 %vm4140_vm1, %v4139_v21 }
0x10cb   :  { %3882 = vmatprep.subr.mxu1 %v4139_v21 }
0x10cc   :  { %v3871_v22 = vpop.f32.mrb[38].mxu1 }
0x10cd   :  { %v2550_v26 = vmul.f32 0.17677669, %v3871_v22  ;;  %v2540_v6 = vpop.f32.mrb[39].mxu1  ;;  %3880 = vmatmul.mubr.msk.f32.vlgmr.msra.gmra.mrb[42].mxu1 %vm177_vm0, %v4770_v25 }
0x10ce   :  { %3884 = vmatprep.mubr.msk.f32.mxu1 %vm4140_vm1, %v4139_v21  ;;  %v2549_v14 = vmul.f32 0.17677669, %v2540_v6 }
0x10cf   :  { %v2704_v28 = vsel %vm1024_vm10, %v2550_v26, -inf }
0x10d0   :  { %2705 = vmax.xlane.f32.xlu1 %v2704_v28  ;;  %v2701_v24 = vsel %vm1024_vm10, %v2549_v14, -inf  ;;  %v3507_v28 = vld [vmem:[%s5021_s11 + $0x28] sm:$0xff] }
0x10d4   :  { %2702 = vmax.xlane.f32.xlu1 %v2701_v24 }
0x115d   :  { %v2706_v38 = vpop.xlane.xlu1 %2705 }
0x1161   :  { %v2703_v39 = vpop.xlane.xlu1 %2702 }
0x119c   :  { %v2620_v30 = vpop.f32.mrb[40].mxu1 }
0x119d   :  { %v2697_v32 = vmul.f32 0.17677669, %v2620_v30  ;;  %v3876_v33 = vpop.f32.mrb[41].mxu1  ;;  %v3508_v30 = vld [vmem:[%s5021_s11 + $0x30] sm:$0xff] }
0x119f   :  { %v2699_v34 = vsel %vm4367_vm6, %v2697_v32, -1e+12  ;;  %v3509_v32 = vld [vmem:[%s5021_s11 + $0x38] sm:$0xff] }
0x11a0   :  { %v2693_v35 = vpop.f32.mrb[42].mxu1  ;;  %v2707_v17 = vsel %vm439_vm7, %v2699_v34, -inf  ;;  %v4018_v33 = vpack.c.bf16 %v3509_v32, %v3508_v30 }
0x11a1   :  { %v2698_v25 = vmul.f32 0.17677669, %v2693_v35  ;;  %2708 = vmax.xlane.f32.xlu0 %v2707_v17  ;;  %v3881_v36 = vpop.f32.mrb[43].mxu1 }
0x11a3   :  { %v2700_v20 = vsel %vm4374_vm9, %v2698_v25, -1e+12 }
0x11a4   :  { %v2710_v37 = vsel %vm439_vm7, %v2700_v20, -inf }
0x11a5   :  { %2711 = vmax.xlane.f32.xlu1 %v2710_v37 }
0x11b6   :  { %2819 = vrot.lane.b32.xlu1 %v3860_v31, %s4141_s30 }
0x11b7   :  { %2743 = vrot.lane.b32.xlu0 %v2460_v23, %s4141_s30 }
0x122e   :  { %v2709_v47 = vpop.xlane.xlu0 %2708 }
0x122f   :  { %v2713_v40 = vmax.f32 %v2703_v39, %v2709_v47 }
0x1231   :  { %v2715_v43 = vsub.f32 %v2549_v14, %v2713_v40  ;;  %v2721_v45 = vsub.f32 %v2699_v34, %v2713_v40  ;;  %v3506_v14 = vld [vmem:[%s5021_s11 + $0x20] sm:$0xff] }
0x1232   :  { %v2744_v46 = vpop.permute.xlu0 %2743  ;;  %v2712_v50 = vpop.xlane.xlu1 %2711  ;;  %v4014_v24 = vpack.c.bf16 %v3507_v28, %v3506_v14 }
0x1233   :  { %v2717_v55 = vmul.f32 1.442695, %v2715_v43  ;;  %v2723_v58 = vmul.f32 1.442695, %v2721_v45  ;;  %v2714_v63 = vmax.f32 %v2706_v38, %v2712_v50  ;;  %3883 = vmatpush3.msra.mxu1 %v2744_v46 }
0x1234   :  { %3887 = vmatprep.subr.mxu1 %v4139_v21 }
0x1235   :  { %4120 = vpow2.f32 %v2717_v55  ;;  %v2716_v53 = vsub.f32 %v2550_v26, %v2714_v63  ;;  %v2722_v4 = vsub.f32 %v2700_v20, %v2714_v63 }
0x1236   :  { %4122 = vpow2.f32 %v2723_v58  ;;  %v2820_v18 = vpop.permute.xlu1 %2819 }
0x1237   :  { %v2719_v9 = vmul.f32 1.442695, %v2716_v53  ;;  %v2725_v13 = vmul.f32 1.442695, %v2722_v4 }
0x1239   :  { %4124 = vpow2.f32 %v2719_v9  ;;  %v3514_v9 = vld [vmem:[%s5022_s3 + $0x2] sm:$0x3] }
0x123a   :  { %4126 = vpow2.f32 %v2725_v13  ;;  %v3515_v13 = vld [vmem:[%s5023_s16 + $0x1] ss:$0 sm:$0xff] }
0x123f   :  { %v4121_v42 = vpop.eup %4120 }
0x1240   :  { %v4123_v15 = vpop.eup %4122  ;;  %v2727_v5 = vsel %vm1024_vm10, %v4121_v42, 0.0 }
0x1241   :  { %3885 = vmatmul.mubr.msk.f32.vlgmr.msra.gmra.mrb[44].mxu1 %vm439_vm7, %v4123_v15  ;;  %v2733_v31 = vsel %vm439_vm7, %v4123_v15, 0.0  ;;  %2728 = vadd.xlane.f32.xlu1 %v2727_v5 }
0x1242   :  { %3888 = vmatpush3.msra.mxu1 %v2820_v18  ;;  %2734 = vadd.xlane.f32.xlu0 %v2733_v31 }
0x1243   :  { %v4125_v23 = vpop.eup %4124  ;;  %3889 = vmatprep.mubr.msk.f32.mxu1 %vm4140_vm1, %v4139_v21  ;;  %3892 = vmatprep.subr.msk.mxu1 %vm1224_vm11, %v3500_v3 }
0x1244   :  { %v4127_v22 = vpop.eup %4126  ;;  %v2730_v26 = vsel %vm1024_vm10, %v4125_v23, 0.0 }
0x1245   :  { %3890 = vmatmul.mubr.msk.f32.vlgmr.msra.gmra.mrb[46].mxu1 %vm439_vm7, %v4127_v22  ;;  %v2736_v6 = vsel %vm439_vm7, %v4127_v22, 0.0  ;;  %v3513_v22 = vld [vmem:[%s5026_s15 + $0x1] ss:$0 sm:$0xff] }
0x1246   :  { %2737 = vadd.xlane.f32.xlu1 %v2736_v6  ;;  %2731 = vadd.xlane.f32.xlu0 %v2730_v26 }
0x1247   :  { %3893 = vmatpush3.msk.msra.mxu1 %vm1224_vm11, %v3500_v3  ;;  %3894 = vmatprep.mubr.msk.f32.mxu1 %vm1024_vm10, %v4121_v42  ;;  %v3100_v42 = vmul.f32 %v3515_v13, %v3514_v9  ;;  %v3517_v9 = vld [vmem:[%s5028_s17 + $0x28] sm:$0xff] }
0x1248   :  { %4015 = vmatprep.subr.bf16.mxu1 %v4014_v24 }
0x1249   :  { %3895 = vmatmul.mubr.msk.f32.vlgmr.msra.gmra.mrb[48].mxu1 %vm1024_vm10, %v4125_v23 }
0x124a   :  { %4017 = vmatpush3.bf16.msra.mxu1 %v4014_v24 }
0x124b   :  { %4019 = vmatprep.subr.bf16.mxu1 %v4018_v33 }
0x124e   :  { %4021 = vmatpush3.bf16.msra.mxu1 %v4018_v33 }
0x124f   :  { %4028 = vmatprep.subr.bf16.mxu1 %v4145_v27 }
0x12ce   :  { %v2729_v35 = vpop.xlane.xlu1 %2728 }
0x12cf   :  { %v2735_v34 = vpop.xlane.xlu0 %2734 }
0x12d0   :  { %v2739_v20 = vadd.f32 %v2735_v34, %v2729_v35 }
0x12d3   :  { %v2732_v17 = vpop.xlane.xlu0 %2731  ;;  %v2738_v25 = vpop.xlane.xlu1 %2737 }
0x12d4   :  { %v2740_v36 = vadd.f32 %v2738_v25, %v2732_v17 }
0x12d6   :  { %4128 = vrcp.f32 %v2740_v36 }
0x12d7   :  { %4130 = vrcp.f32 %v2739_v20 }
0x12e0   :  { %v4129_v46 = vpop.eup %4128 }
0x12e1   :  { %v4131_v55 = vpop.eup %4130 }
0x1314   :  { %v2815_v37 = vpop.f32.mrb[44].mxu1 }
0x1315   :  { %v3886_v38 = vpop.f32.mrb[45].mxu1 }
0x1318   :  { %v2891_v39 = vpop.f32.mrb[46].mxu1 }
0x1319   :  { %v3891_v47 = vpop.f32.mrb[47].mxu1 }
0x131c   :  { %v3896_v40 = vpop.f32.mrb[48].mxu1 }
0x131d   :  { %v2976_v43 = vadd.f32 %v3896_v40, %v2891_v39  ;;  %v2970_v45 = vpop.f32.mrb[49].mxu1 }
0x131e   :  { %v2971_v50 = vadd.f32 %v2970_v45, %v2815_v37 }
0x131f   :  { %v2982_v58 = vmul.f32 %v4129_v46, %v2976_v43 }
0x1320   :  { %v2980_v63 = vmul.f32 %v4131_v55, %v2971_v50 }
0x1321   :  { %v2984_v4 = vmul.f32 %v2982_v58, %v4311_v19  ;;  %v3481_v19 = vld [vmem:[%s5024_s10 + $0x1] ss:$0 sm:$0xff] }
0x1322   :  { %v2983_v53 = vmul.f32 %v2980_v63, %v4301_v16  ;;  %v3101_v16 = vsel %vm1423_vm12, %v3100_v42, 0.0 }
0x1323   :  { %3102 = vadd.xlane.f32.xlu0 %v3101_v16 }
0x1324   :  { %3905 = vmatprep.mubr.msk.f32.mxu1 %vm177_vm0, %v2983_v53 }
0x1325   :  { %3906 = vmatmul.mubr.msk.f32.vlgmr.msra.gmra.mrb[34].mxu1 %vm177_vm0, %v2984_v4  ;;  %v3516_v4 = vld [vmem:[%s5028_s17 + $0x20] sm:$0xff] }
0x1326   :  { %3927 = vmatprep.mubr.msk.f32.mxu1 %vm4140_vm1, %v4139_v21  ;;  %v3510_v21 = vld [vmem:[%s5025_s12 + $0x1] ss:$0 sm:$0xff]  ;;  %v4029_v42 = vpack.c.bf16 %v3517_v9, %v3516_v4 }
0x1328   :  { %4030 = vmatpush3.bf16.msra.mxu1 %v4029_v42 }
0x1329   :  { %4031 = vmatprep.subr.bf16.mxu1 %v4145_v27 }
0x13b0   :  { %v3103_v32 = vpop.xlane.xlu0 %3102 }
0x13b1   :  { %v3112_v33 = vrot.slane %v3103_v32, %v4285_v11  ;;  %v3108_v34 = vrot.slane %v3103_v32, %v4282_v10 }
0x13f8   :  { %v3907_v15 = vpop.f32.mrb[34].mxu1 }
0x13f9   :  { %v4040_v5 = vadd.f32 %v3907_v15, %v3481_v19  ;;  %v3067_v3 = vpop.f32.mrb[35].mxu1  ;;  %v3524_v15 = vld [vmem:[%s5027_s18 + $0x38] sm:$0xff] }
0x13fa   :  { %v4042_v18 = vadd.f32 %v3481_v19, %v3067_v3  ;;  %v3523_v19 = vld [vmem:[%s5027_s18 + $0x30] sm:$0xff] }
0x13fb   :  { %v4041_v31 = vadd.f32 %v4040_v5, %v3510_v21  ;;  %v4026_v3 = vpack.c.bf16 %v3524_v15, %v3523_v19 }
0x13fc   :  { %v4043_v23 = vadd.f32 %v4042_v18, %v3510_v21  ;;  %v3518_v18 = vld [vmem:[%s5028_s17 + $0x30] sm:$0xff] }
0x13fd   :  { %v3079_v26 = vmax.f32 %v4041_v31, 0.0  ;;  %v3519_v31 = vld [vmem:[%s5028_s17 + $0x38] sm:$0xff] }
0x13fe   :  { %v3078_v6 = vmax.f32 %v4043_v23, 0.0  ;;  %v4032_v23 = vpack.c.bf16 %v3519_v31, %v3518_v18 }
0x13ff   :  { %v3086_v14 = vmul.f32 %v3513_v22, %v3079_v26 }
0x1400   :  { %v3085_v28 = vmul.f32 %v3513_v22, %v3078_v6  ;;  %4033 = vmatpush3.bf16.msra.mxu1 %v4032_v23  ;;  %v3527_v6 = vld [vmem:[%s5031_s19 + $0x1] ss:$0 sm:$0xff] }
0x1401   :  { %v3090_v24 = vsel %vm177_vm0, %v3086_v14, 0.0 }
0x1402   :  { %3091 = vadd.xlane.f32.xlu0 %v3090_v24  ;;  %v3087_v30 = vsel %vm177_vm0, %v3085_v28, 0.0 }
0x1403   :  { %3088 = vadd.xlane.f32.xlu1 %v3087_v30 }
0x148f   :  { %v3092_v35 = vpop.xlane.xlu0 %3091 }
0x1490   :  { %v3116_v17 = vadd.f32 %v3112_v33, %v3092_v35  ;;  %v3089_v25 = vpop.xlane.xlu1 %3088 }
0x1491   :  { %v3115_v36 = vadd.f32 %v3108_v34, %v3089_v25 }
0x1492   :  { %3123 = vperm.xlu0 %4070, %v3116_v17  }
0x1493   :  { %3120 = vperm.xlu1 %4071, %v3115_v36  }
0x1511   :  { %v3124_v20 = vpop.permute.xlu0 %3123 }
0x1512   :  { %v3132_v37 = vrot.slane %v3124_v20, %v4540_v1  ;;  %v3121_v38 = vpop.permute.xlu1 %3120 }
0x1513   :  { %v3128_v39 = vrot.slane %v3121_v38, %v4540_v1  ;;  %v3521_v1 = vld [vmem:[%s5027_s18 + $0x20] sm:$0xff] }
0x1514   :  { %v4023_v53 = vpack.c.bf16 %v3522_v7, %v3521_v1 }
0x1515   :  { %v3133_v47 = vsel %vm1457_vm13, %v3132_v37, %v3128_v39 }
0x1516   :  { %v3135_v40 = vsel %vm1440_vm14, %v3133_v47, -1e+12  ;;  %4024 = vmatpush3.bf16.msra.mxu0 %v4023_v53 }
0x1517   :  { %v3136_v43 = vsel %vm1461_vm15, %v3135_v40, -inf  ;;  %4025 = vmatprep.subr.bf16.mxu0 %v4145_v27 }
0x1518   :  { %3137 = vmax.xlane.f32.xlu1 %v3136_v43 }
0x151a   :  { %4027 = vmatpush3.bf16.msra.mxu0 %v4026_v3 }
0x151b   :  { %4054 = vmatprep.subr.msk.bf16.mxu0 %vm177_vm0, %v4598_v49 }
0x15a5   :  { %v3138_v45 = vpop.xlane.xlu1 %3137 }
0x15a6   :  { %v3139_v46 = vsub.f32 %v3135_v40, %v3138_v45 }
0x15a8   :  { %v3140_v50 = vmul.f32 1.442695, %v3139_v46 }
0x15aa   :  { %4132 = vpow2.f32 %v3140_v50 }
0x15b4   :  { %v4133_v55 = vpop.eup %4132 }
0x15b5   :  { %v3142_v58 = vsel %vm1461_vm15, %v4133_v55, 0.0 }
0x15b6   :  { %3143 = vadd.xlane.f32.xlu0 %v3142_v58 }
0x1643   :  { %v3144_v63 = vpop.xlane.xlu0 %3143 }
0x1644   :  { %4134 = vrcp.f32 %v3144_v63 }
0x164e   :  { %v4135_v13 = vpop.eup %4134 }
0x164f   :  { %v3146_v16 = vmul.f32 %v4135_v13, %v4133_v55 }
0x1651   :  { %v3157_v21 = vrot.slane %v3146_v16, %v4285_v11  ;;  %v3150_v5 = vrot.slane %v3146_v16, %v4282_v10  ;;  %v3520_v10 = vld [vmem:[%s5029_s4 + $0x2] sm:$0x3] }
0x1652   :  { %3917 = vmatmul.mubr.msk.f32.vlgmr.msra.gmra.mrb[12].mxu0 %vm177_vm0, %v3520_v10 }
0x1653   :  { %3159 = vbcast.lane.b32.xlu0 %v3157_v21, 256  ;;  %3152 = vbcast.lane.b32.xlu1 %v3150_v5, 256 }
0x1654   :  { %3669 = vmatpush3.bf16.xpose.msra.mxu0 %v4611_v52 }
0x1655   :  { %4055 = vmatprep.subr.msk.bf16.mxu0 %vm177_vm0, %v4608_v51 }
0x165c   :  { %3671 = vmatpush3.bf16.xpose.msra.mxu0 %v4620_v60 }
0x165d   :  { %4056 = vmatprep.subr.msk.bf16.mxu0 %vm177_vm0, %v4625_v61 }
0x1664   :  { %3673 = vmatpush3.bf16.xpose.msra.mxu0 %v4634_v56 }
0x1665   :  { %4057 = vmatprep.subr.msk.bf16.mxu0 %vm177_vm0, %v4639_v57 }
0x166c   :  { %3675 = vmatpush3.bf16.xpose.msra.mxu0 %v4648_v59 }
0x166d   :  { %4058 = vmatprep.subr.msk.bf16.mxu0 %vm177_vm0, %v4653_v62 }
0x1674   :  { %3677 = vmatpush3.bf16.xpose.msra.mxu0 %v4662_v0 }
0x1675   :  { %4059 = vmatprep.subr.msk.bf16.mxu0 %vm177_vm0, %v4667_v2 }
0x167c   :  { %3679 = vmatpush3.bf16.xpose.msra.mxu0 %v4676_v29 }
0x167d   :  { %4060 = vmatprep.subr.msk.bf16.mxu0 %vm177_vm0, %v4682_v8 }
0x1684   :  { %3681 = vmatpush3.bf16.xpose.msra.mxu0 %v4690_v12 }
0x1685   :  { %4061 = vmatprep.subr.msk.bf16.mxu0 %vm177_vm0, %v4728_v48 }
0x168c   :  { %3683 = vmatpush3.bf16.xpose.msra.mxu0 %v4736_v54 }
0x16c5   :  { %v3160_v11 = vpop.permute.xlu0 %3159  ;;  %v3153_v27 = vpop.permute.xlu1 %3152 }
0x16c6   :  { %v3162_v49 = vmul.f32 %v3160_v11, %v4718_v44  ;;  %v3161_v51 = vmul.f32 %v3153_v27, %v4708_v41 }
0x16c8   :  { %v3170_v52 = vsel %vm177_vm0, %v3162_v49, 0.0  ;;  %v3163_v60 = vsel %vm177_vm0, %v3161_v51, 0.0 }
0x16c9   :  { %v3171_v61 = vrot.slane %v3170_v52, 4  ;;  %v3164_v56 = vrot.slane %v3163_v60, 4 }
0x16cb   :  { %v3172_v57 = vadd.f32 %v3171_v61, %v3170_v52  ;;  %v3165_v59 = vadd.f32 %v3164_v56, %v3163_v60 }
0x16cd   :  { %v3173_v62 = vrot.slane %v3172_v57, 2  ;;  %v3166_v0 = vrot.slane %v3165_v59, 2 }
0x16cf   :  { %v3174_v2 = vadd.f32 %v3173_v62, %v3172_v57  ;;  %v3167_v29 = vadd.f32 %v3166_v0, %v3165_v59 }
0x16d1   :  { %v3175_v8 = vrot.slane %v3174_v2, 1  ;;  %v3168_v12 = vrot.slane %v3167_v29, 1 }
0x16d3   :  { %v3176_v48 = vadd.f32 %v3175_v8, %v3174_v2  ;;  %v3169_v54 = vadd.f32 %v3168_v12, %v3167_v29 }
0x16d5   :  { %v3264_v44 = vsel %vm1457_vm13, %v3176_v48, %v3169_v54 }
0x16d6   :  { %3928 = vmatmul.mubr.msk.f32.vlgmr.msra.gmra.mrb[50].mxu1 %vm177_vm0, %v3264_v44 }
0x1725   :  { %v3258_v41 = vpop.f32.mrb[12].mxu0 }
0x1726   :  { %v3918_v22 = vpop.f32.mrb[13].mxu0 }
0x17a9   :  { %v3333_v26 = vpop.f32.mrb[50].mxu1 }
0x17aa   :  { %v3334_v14 = vadd.f32 %v3333_v26, %v3258_v41  ;;  %v3929_v28 = vpop.f32.mrb[51].mxu1 }
0x17ac   :  { %v3342_v24 = vadd.f32 %v3527_v6, %v3334_v14 }
0x17ae   :  { %3528 = vst.msk [vmem:[%s5032_s20 + $0x2] sm:$0x3] %vm1423_vm12, %v3342_v24  ;;  %v3345_v30 = vpack.c.bf16 %v3342_v24, %v3342_v24 }
0x17b0   :  { %3684 = vmatprep.mubr.msk.bf16.mxu0 %vm177_vm0, %v3345_v30 }
0x17b1   :  { %3685 = vmatmul.mubr.msk.bf16.vlgmr.msra.gmra.mrb[16].mxu0 %vm177_vm0, %v3345_v30 }
0x1884   :  { %v3383_v32 = vpop.f32.mrb[16].mxu0 }
0x1885   :  { %v3385_v33 = vpop.f32.mrb[17].mxu0 }
0x1886   :  { %v3392_v34 = vcombine.low %v3383_v32, %v3385_v33  ;;  %v3387_v35 = vpop.f32.mrb[18].mxu0 }
0x1887   :  { %v3388_v17 = vpop.f32.mrb[19].mxu0 }
0x1888   :  { %3531 = vst.sshfl [vmem:[%s5033_s21 + $0x4] sm:$0x33 pattern:$0x76325410] %v3392_v34 }

</bundles_post_ra>
